<compile_context>
chip_gen: v7x
topology: tpu7x:2x2x1
jax: 0.10.0
libtpu: 0.0.40
codegen_flags: <defaults>
</compile_context>

<pallas_src>
import numpy as np
import jax
import jax.numpy as jnp
from jax import lax
from jax.experimental import pallas as pl
from jax.experimental.pallas import tpu as pltpu

TASKS = ("semantic", "depth", "normal")
TASK_OUT = {"semantic": 13, "depth": 1, "normal": 3}
NT = len(TASKS)
CH = [16, 32, 64, 128]        # scaled-down [256, 512, 1024, 2048]
DEC_MID = 32                  # decoder hidden width
DEC_PAD = 16                  # decoder heads padded to a common output width


# ------------------------- in-kernel helpers -------------------------

def _dot(a, b):
    return jnp.dot(a, b, preferred_element_type=jnp.float32)


def _relu(x):
    return jnp.maximum(x, 0.0)


def _sigmoid(x):
    # exp runs on the EUP; approx reciprocal keeps the divide off the VPU.
    return pl.reciprocal(1.0 + jnp.exp(-x), approx=True)


def _pool4(y):
    # 2x2 max-pool: rows are pre-ordered as 4 contiguous corner segments.
    m = y.shape[0] // 4
    return jnp.maximum(jnp.maximum(y[:m], y[m:2 * m]),
                       jnp.maximum(y[2 * m:3 * m], y[3 * m:]))


# ------------------------- Pallas kernels -------------------------

def _trunk_kernel(cols_ref,
                  ws, bs,
                  w1b, b1b, w1t, b1t,
                  w2b, b2b, w2t, b2t,
                  w3b, b3b, w3t, b3t,
                  w4b, b4b, w4t, b4t,
                  u1b_o, u1t_o, u2b_o, u2t_o, u3b_o, u3t_o, u4b_o, u4t_o):
    """shared_conv + shared_layer{1..4}_{b,t}, fully fused in VMEM."""
    # stem: 3x3/s2 conv (im2col matmul) + BN + ReLU + 2x2 max-pool (4 segments)
    y = _relu(_dot(cols_ref[...], ws[...]) + bs[...])
    x0 = _pool4(y)                                      # /4 resolution
    # shared_layer1_{b,t}
    u1b = _relu(_dot(x0, w1b[...]) + b1b[...])
    u1t = _relu(_dot(u1b, w1t[...]) + b1t[...])
    # shared_layer2_b has stride 2: with pool-corner row ordering this is just
    # the first corner segment of u1t (even rows / even cols).
    m4 = u1t.shape[0] // 4
    u2b = _relu(_dot(u1t[:m4], w2b[...]) + b2b[...])
    u2t = _relu(_dot(u2b, w2t[...]) + b2t[...])
    # layers 3/4 are dilated in MTAN's ResNet -> stride 1
    u3b = _relu(_dot(u2t, w3b[...]) + b3b[...])
    u3t = _relu(_dot(u3b, w3t[...]) + b3t[...])
    u4b = _relu(_dot(u3t, w4b[...]) + b4b[...])
    u4t = _relu(_dot(u4b, w4t[...]) + b4t[...])
    u1b_o[...] = u1b
    u1t_o[...] = u1t
    u2b_o[...] = u2b
    u2t_o[...] = u2t
    u3b_o[...] = u3b
    u3t_o[...] = u3t
    u4b_o[...] = u4b
    u4t_o[...] = u4t


def _encdec_kernel(u1b, u1t, u2b, u2t, u3b, u3t, u4b, u4t,
                   bw1, bb1, bw2, bb2, bw3, bb3,
                   a1w1, a1b1, a1w2, a1b2,
                   a2w1a, a2w1b, a2b1, a2w2, a2b2,
                   a3w1a, a3w1b, a3b1, a3w2, a3b2,
                   a4w1a, a4w1b, a4b1, a4w2, a4b2,
                   dw1, db1, dw2, db2,
                   logits_o):
    """All 4 attention stages + decoder head for ONE task (grid over tasks)."""
    # ---- stage 1 (/4 resolution, pool-corner row order) ----
    h = _relu(_dot(u1b[...], a1w1[...]) + a1b1[...])
    m = _sigmoid(_dot(h, a1w2[...]) + a1b2[...])
    a = m * u1t[...]
    a1 = _pool4(_relu(_dot(a, bw1[...]) + bb1[...]))      # down_sampling
    # ---- stage 2 (/8 resolution); torch.cat == split-weight dual dot ----
    h = _relu(_dot(u2b[...], a2w1a[...]) + _dot(a1, a2w1b[...]) + a2b1[...])
    m = _sigmoid(_dot(h, a2w2[...]) + a2b2[...])
    a2 = _relu(_dot(m * u2t[...], bw2[...]) + bb2[...])
    # ---- stage 3 ----
    h = _relu(_dot(u3b[...], a3w1a[...]) + _dot(a2, a3w1b[...]) + a3b1[...])
    m = _sigmoid(_dot(h, a3w2[...]) + a3b2[...])
    a3 = _relu(_dot(m * u3t[...], bw3[...]) + bb3[...])
    # ---- stage 4 + decoder head ----
    h = _relu(_dot(u4b[...], a4w1a[...]) + _dot(a3, a4w1b[...]) + a4b1[...])
    m = _sigmoid(_dot(h, a4w2[...]) + a4b2[...])
    a4 = m * u4t[...]
    hd = _relu(_dot(a4, dw1[...]) + db1[...])
    logits_o[...] = _dot(hd, dw2[...]) + db2[...]


def _matmul_kernel(a_ref, b_ref, o_ref):
    o_ref[...] = _dot(a_ref[...], b_ref[...])


def _l2norm_kernel(x_ref, o_ref):
    # x: (n, C, H*W); reduce over the (tiny) channel sublane axis so the
    # load/store stays lane-dense along H*W.
    x = x_ref[...]
    inv = lax.rsqrt(jnp.sum(x * x, axis=1, keepdims=True) + 1e-12)
    o_ref[...] = x * inv


# ------------------------- spec / call helpers -------------------------

def _shared_spec(a):
    nd = a.ndim
    return pl.BlockSpec(a.shape, lambda k, _nd=nd: (0,) * _nd)


def _stacked_spec(a):
    trail = tuple(a.shape[1:])
    nz = len(trail)
    return pl.BlockSpec((None,) + trail, lambda k, _nz=nz: (k,) + (0,) * _nz)


def _matmul(a, b):
    return pl.pallas_call(
        _matmul_kernel,
        out_shape=jax.ShapeDtypeStruct((a.shape[0], b.shape[1]), jnp.float32),
    )(a, b)


# ------------------------- parameters -------------------------

class PGen:
    def __init__(self, seed=0):
        self.key = jax.random.PRNGKey(seed)
        self.i = 0

    def __call__(self, shape, scale=0.05):
        self.i += 1
        k = jax.random.fold_in(self.key, self.i)
        return scale * jax.random.normal(k, shape, dtype=jnp.float32)


def _bn_fold(pg, c, eps=1e-5):
    gamma = 1.0 + pg((c,))
    beta = pg((c,))
    mean = pg((c,))
    var = 1.0 + jnp.abs(pg((c,)))
    s = gamma / jnp.sqrt(var + eps)
    b = beta - mean * s
    return s, b


def _conv_w(pg, cin, cout):
    return pg((cin, cout), scale=1.0 / float(np.sqrt(cin)))


def _conv_bn(pg, cin, cout):
    """1x1 conv + folded BN -> (weight, bias); BN scale folded into weight."""
    w = _conv_w(pg, cin, cout)
    s, b = _bn_fold(pg, cout)
    return ((w * s[None, :]).astype(jnp.float32),
            b.reshape(1, cout).astype(jnp.float32))


def _interp_mat(out_size, in_size):
    """align_corners=True bilinear interpolation matrix (out_size, in_size)."""
    W = np.zeros((out_size, in_size), np.float64)
    for i in range(out_size):
        src = 0.0 if out_size == 1 else i * (in_size - 1) / (out_size - 1)
        i0 = min(max(int(np.floor(src)), 0), in_size - 1)
        i1 = min(i0 + 1, in_size - 1)
        f = src - i0
        W[i, i0] += 1.0 - f
        W[i, i1] += f
    return W


def build_params(im_h, im_w, in_ch=3):
    pg = PGen(0)
    P = {}

    # shared trunk
    P["stem"] = _conv_bn(pg, 9 * in_ch, CH[0])
    P["l1b"] = _conv_bn(pg, CH[0], CH[0]); P["l1t"] = _conv_bn(pg, CH[0], CH[0])
    P["l2b"] = _conv_bn(pg, CH[0], CH[1]); P["l2t"] = _conv_bn(pg, CH[1], CH[1])
    P["l3b"] = _conv_bn(pg, CH[1], CH[2]); P["l3t"] = _conv_bn(pg, CH[2], CH[2])
    P["l4b"] = _conv_bn(pg, CH[2], CH[3]); P["l4t"] = _conv_bn(pg, CH[3], CH[3])

    # encoder_block_att_{1,2,3} (shared across tasks)
    P["blk1"] = _conv_bn(pg, CH[0], CH[1])
    P["blk2"] = _conv_bn(pg, CH[1], CH[2])
    P["blk3"] = _conv_bn(pg, CH[2], CH[3])

    def att_stage(cin_b, cin_a, cmid, cout):
        """encoder_att stage for all tasks; BN folded, first conv split so the
        torch.cat((u_b, a_prev)) becomes two dots summed in-kernel."""
        w1a_l, w1b_l, b1_l, w2_l, b2_l = [], [], [], [], []
        for _ in range(NT):
            w1 = _conv_w(pg, cin_b + cin_a, cmid)
            s1, b1 = _bn_fold(pg, cmid)
            w2 = _conv_w(pg, cmid, cout)
            s2, b2 = _bn_fold(pg, cout)
            w1f = w1 * s1[None, :]
            w1a_l.append(w1f[:cin_b])
            w1b_l.append(w1f[cin_b:])
            b1_l.append(b1.reshape(1, cmid))
            w2_l.append(w2 * s2[None, :])
            b2_l.append(b2.reshape(1, cout))
        st = lambda xs: jnp.stack(xs, 0).astype(jnp.float32)
        if cin_a == 0:
            return (st(w1a_l), st(b1_l), st(w2_l), st(b2_l))
        return (st(w1a_l), st(w1b_l), st(b1_l), st(w2_l), st(b2_l))

    P["att1"] = att_stage(CH[0], 0, CH[0] // 4, CH[0])
    P["att2"] = att_stage(CH[1], CH[1], CH[1] // 4, CH[1])
    P["att3"] = att_stage(CH[2], CH[2], CH[2] // 4, CH[2])
    P["att4"] = att_stage(CH[3], CH[3], CH[3] // 4, CH[3])

    # task decoder heads, zero-padded to a shared output width DEC_PAD
    dw1_l, db1_l, dw2_l, db2_l = [], [], [], []
    for t in TASKS:
        cout = TASK_OUT[t]
        w1 = _conv_w(pg, CH[3], DEC_MID)
        s1, b1 = _bn_fold(pg, DEC_MID)
        w2 = _conv_w(pg, DEC_MID, cout)
        bias2 = pg((cout,))
        dw1_l.append(w1 * s1[None, :])
        db1_l.append(b1.reshape(1, DEC_MID))
        dw2_l.append(jnp.pad(w2, ((0, 0), (0, DEC_PAD - cout))))
        db2_l.append(jnp.pad(bias2, (0, DEC_PAD - cout)).reshape(1, DEC_PAD))
    P["dec"] = tuple(jnp.stack(a, 0).astype(jnp.float32)
                     for a in (dw1_l, db1_l, dw2_l, db2_l))

    # separable bilinear interpolation (replaces the O(HW*hw) Kron matrix)
    P["Rh"] = jnp.asarray(_interp_mat(im_h, im_h // 8), jnp.float32)
    P["Rw"] = jnp.asarray(_interp_mat(im_w, im_w // 8), jnp.float32)
    return P


# ------------------------- forward -------------------------

def _im2col3x3_s2(x):
    """3x3 / stride 2 / pad 1 patch extraction (XLA glue; matmul is in Pallas)."""
    n, h, w, c = x.shape
    ho, wo = (h - 1) // 2 + 1, (w - 1) // 2 + 1
    xp = jnp.pad(x, ((0, 0), (1, 1), (1, 1), (0, 0)))
    patches = []
    for dy in range(3):
        for dx in range(3):
            patches.append(
                xp[:, dy:dy + 2 * (ho - 1) + 1:2, dx:dx + 2 * (wo - 1) + 1:2, :])
    return jnp.concatenate(patches, axis=-1), ho, wo


def forward(params, x_nchw):
    P = params
    n, _, im_h, im_w = x_nchw.shape
    assert im_h % 8 == 0 and im_w % 8 == 0, "H/W must be multiples of 8"
    x = jnp.transpose(x_nchw, (0, 2, 3, 1)).astype(jnp.float32)   # NCHW -> NHWC

    # stem im2col; rows reordered once (XLA glue) so that BOTH max-pools (stem
    # pool and stage-1 down_sampling) become contiguous 4-segment maxes inside
    # the kernels and the stride-2 conv is "take segment 0".
    cols, ho, wo = _im2col3x3_s2(x)                 # (n, ho, wo, 9*cin)
    h4, w4 = ho // 4, wo // 4                       # /8-resolution grid
    m4 = n * h4 * w4
    assert m4 % 8 == 0, "need n*(H/8)*(W/8) to be a multiple of 8 sublanes"
    kdim = cols.shape[-1]
    # y16 = 4*i + 2*r + p, x16 = 4*j + 2*s + q
    cols = cols.reshape(n, h4, 2, 2, w4, 2, 2, kdim)
    # -> (p, q, r, s, n, i, j, K): outer segments = stem-pool corners,
    #    inner segments = stage-1-pool corners.
    cols = cols.transpose(3, 6, 2, 5, 0, 1, 4, 7).reshape(16 * m4, kdim)

    f32 = jnp.float32
    trunk_outs = pl.pallas_call(
        _trunk_kernel,
        out_shape=[
            jax.ShapeDtypeStruct((4 * m4, CH[0]), f32),   # u_1_b
            jax.ShapeDtypeStruct((4 * m4, CH[0]), f32),   # u_1_t
            jax.ShapeDtypeStruct((m4, CH[1]), f32),       # u_2_b
            jax.ShapeDtypeStruct((m4, CH[1]), f32),       # u_2_t
            jax.ShapeDtypeStruct((m4, CH[2]), f32),       # u_3_b
            jax.ShapeDtypeStruct((m4, CH[2]), f32),       # u_3_t
            jax.ShapeDtypeStruct((m4, CH[3]), f32),       # u_4_b
            jax.ShapeDtypeStruct((m4, CH[3]), f32),       # u_4_t
        ],
    )(cols,
      *P["stem"], *P["l1b"], *P["l1t"], *P["l2b"], *P["l2t"],
      *P["l3b"], *P["l3t"], *P["l4b"], *P["l4t"])
    u1b, u1t, u2b, u2t, u3b, u3t, u4b, u4t = trunk_outs

    # fused attention stages 1-4 + decoder heads; grid over the 3 tasks
    shared_args = [u1b, u1t, u2b, u2t, u3b, u3t, u4b, u4t,
                   *P["blk1"], *P["blk2"], *P["blk3"]]
    task_args = [*P["att1"], *P["att2"], *P["att3"], *P["att4"], *P["dec"]]
    logits = pl.pallas_call(
        _encdec_kernel,
        grid=(NT,),
        in_specs=([_shared_spec(a) for a in shared_args]
                  + [_stacked_spec(a) for a in task_args]),
        out_specs=pl.BlockSpec((None, m4, DEC_PAD), lambda k: (k, 0, 0)),
        out_shape=jax.ShapeDtypeStruct((NT, m4, DEC_PAD), f32),
        compiler_params=pltpu.CompilerParams(
            dimension_semantics=("parallel",)),
    )(*shared_args, *task_args)

    # separable bilinear upsample (align_corners=True) as two lane-dense matmuls
    logits5 = logits.reshape(NT, n, h4, w4, DEC_PAD)
    xw = logits5.transpose(3, 0, 1, 2, 4).reshape(w4, NT * n * h4 * DEC_PAD)
    yw = _matmul(P["Rw"], xw)                                   # (im_w, T*n*h4*C)
    xh = yw.reshape(im_w, NT, n, h4, DEC_PAD).transpose(3, 0, 1, 2, 4)
    xh = xh.reshape(h4, im_w * NT * n * DEC_PAD)
    yh = _matmul(P["Rh"], xh)                                   # (im_h, im_w*T*n*C)
    up = yh.reshape(im_h, im_w, NT, n, DEC_PAD).transpose(2, 3, 4, 0, 1)

    outs = []
    for k, t in enumerate(TASKS):
        cout = TASK_OUT[t]
        o = up[k, :, :cout]                                     # (n, cout, H, W)
        if t == "normal":
            # normalize in (n, C, H*W) layout: lane-dense, no NHWC transpose
            flat = o.reshape(n, cout, im_h * im_w)
            flat = pl.pallas_call(
                _l2norm_kernel,
                out_shape=jax.ShapeDtypeStruct(flat.shape, f32),
            )(flat)
            o = flat.reshape(n, cout, im_h, im_w)
        outs.append(o)
    return outs


# ------------------------- main -------------------------

if __name__ == "__main__":
    im_h = im_w = 32
    params = build_params(im_h, im_w, in_ch=3)
    x = jax.random.normal(jax.random.PRNGKey(0), (2, 3, im_h, im_w), jnp.float32)

    fwd = jax.jit(forward)
    outs = fwd(params, x)
    outs = jax.block_until_ready(outs)

    for t, o in zip(TASKS, outs):
        assert o.shape == (2, TASK_OUT[t], im_h, im_w), (t, o.shape)
        assert o.dtype == jnp.float32
    # 'normal' task output must be unit L2-norm along the channel axis
    nrm = jnp.sqrt(jnp.sum(outs[2] ** 2, axis=1))
    assert bool(jnp.allclose(nrm, 1.0, atol=1e-4))

    print("KERNEL_OK")
</pallas_src>

<mosaic_0001>
module attributes {stable_mosaic.version = 11 : i64} {
  func.func @_trunk_kernel(%arg0: memref<512x27xf32, #tpu.memory_space<vmem>>, %arg1: memref<27x16xf32, #tpu.memory_space<vmem>>, %arg2: memref<1x16xf32, #tpu.memory_space<vmem>>, %arg3: memref<16x16xf32, #tpu.memory_space<vmem>>, %arg4: memref<1x16xf32, #tpu.memory_space<vmem>>, %arg5: memref<16x16xf32, #tpu.memory_space<vmem>>, %arg6: memref<1x16xf32, #tpu.memory_space<vmem>>, %arg7: memref<16x32xf32, #tpu.memory_space<vmem>>, %arg8: memref<1x32xf32, #tpu.memory_space<vmem>>, %arg9: memref<32x32xf32, #tpu.memory_space<vmem>>, %arg10: memref<1x32xf32, #tpu.memory_space<vmem>>, %arg11: memref<32x64xf32, #tpu.memory_space<vmem>>, %arg12: memref<1x64xf32, #tpu.memory_space<vmem>>, %arg13: memref<64x64xf32, #tpu.memory_space<vmem>>, %arg14: memref<1x64xf32, #tpu.memory_space<vmem>>, %arg15: memref<64x128xf32, #tpu.memory_space<vmem>>, %arg16: memref<1x128xf32, #tpu.memory_space<vmem>>, %arg17: memref<128x128xf32, #tpu.memory_space<vmem>>, %arg18: memref<1x128xf32, #tpu.memory_space<vmem>>, %arg19: memref<128x16xf32, #tpu.memory_space<vmem>>, %arg20: memref<128x16xf32, #tpu.memory_space<vmem>>, %arg21: memref<32x32xf32, #tpu.memory_space<vmem>>, %arg22: memref<32x32xf32, #tpu.memory_space<vmem>>, %arg23: memref<32x64xf32, #tpu.memory_space<vmem>>, %arg24: memref<32x64xf32, #tpu.memory_space<vmem>>, %arg25: memref<32x128xf32, #tpu.memory_space<vmem>>, %arg26: memref<32x128xf32, #tpu.memory_space<vmem>>) attributes {dimension_semantics = [], scalar_prefetch = 0 : i64, scratch_operands = 0 : i64, tpu.core_type = #tpu.core_type<tc>} {
    %c0 = arith.constant 0 : index
    %c0_0 = arith.constant 0 : index
    %0 = vector.load %arg0[%c0, %c0_0] : memref<512x27xf32, #tpu.memory_space<vmem>>, vector<512x27xf32>
    %c0_1 = arith.constant 0 : index
    %c0_2 = arith.constant 0 : index
    %1 = vector.load %arg1[%c0_1, %c0_2] : memref<27x16xf32, #tpu.memory_space<vmem>>, vector<27x16xf32>
    %cst = arith.constant dense<0.000000e+00> : vector<512x16xf32>
    %2 = tpu.matmul %0, %1, %cst {dimension_numbers = #tpu.dot_dimension_numbers<[1], [0], [0], [1], [0, 0, 1, 1], [], []>} : vector<512x27xf32>, vector<27x16xf32>, vector<512x16xf32> -> vector<512x16xf32>
    %c0_3 = arith.constant 0 : index
    %c0_4 = arith.constant 0 : index
    %3 = vector.load %arg2[%c0_3, %c0_4] : memref<1x16xf32, #tpu.memory_space<vmem>>, vector<1x16xf32>
    %4 = vector.broadcast %3 : vector<1x16xf32> to vector<512x16xf32>
    %5 = arith.addf %2, %4 : vector<512x16xf32>
    %cst_5 = arith.constant 0.000000e+00 : f32
    %6 = vector.broadcast %cst_5 : f32 to vector<512x16xf32>
    %7 = arith.maximumf %5, %6 : vector<512x16xf32>
    %8 = vector.extract_strided_slice %7 {offsets = [0, 0], sizes = [128, 16], strides = [1, 1]} : vector<512x16xf32> to vector<128x16xf32>
    %9 = vector.extract_strided_slice %7 {offsets = [128, 0], sizes = [128, 16], strides = [1, 1]} : vector<512x16xf32> to vector<128x16xf32>
    %10 = arith.maximumf %8, %9 : vector<128x16xf32>
    %11 = vector.extract_strided_slice %7 {offsets = [256, 0], sizes = [128, 16], strides = [1, 1]} : vector<512x16xf32> to vector<128x16xf32>
    %12 = vector.extract_strided_slice %7 {offsets = [384, 0], sizes = [128, 16], strides = [1, 1]} : vector<512x16xf32> to vector<128x16xf32>
    %13 = arith.maximumf %11, %12 : vector<128x16xf32>
    %14 = arith.maximumf %10, %13 : vector<128x16xf32>
    %c0_6 = arith.constant 0 : index
    %c0_7 = arith.constant 0 : index
    %15 = vector.load %arg3[%c0_6, %c0_7] : memref<16x16xf32, #tpu.memory_space<vmem>>, vector<16x16xf32>
    %cst_8 = arith.constant dense<0.000000e+00> : vector<128x16xf32>
    %16 = tpu.matmul %14, %15, %cst_8 {dimension_numbers = #tpu.dot_dimension_numbers<[1], [0], [0], [1], [0, 0, 1, 1], [], []>} : vector<128x16xf32>, vector<16x16xf32>, vector<128x16xf32> -> vector<128x16xf32>
    %c0_9 = arith.constant 0 : index
    %c0_10 = arith.constant 0 : index
    %17 = vector.load %arg4[%c0_9, %c0_10] : memref<1x16xf32, #tpu.memory_space<vmem>>, vector<1x16xf32>
    %18 = vector.broadcast %17 : vector<1x16xf32> to vector<128x16xf32>
    %19 = arith.addf %16, %18 : vector<128x16xf32>
    %cst_11 = arith.constant 0.000000e+00 : f32
    %20 = vector.broadcast %cst_11 : f32 to vector<128x16xf32>
    %21 = arith.maximumf %19, %20 : vector<128x16xf32>
    %c0_12 = arith.constant 0 : index
    %c0_13 = arith.constant 0 : index
    %22 = vector.load %arg5[%c0_12, %c0_13] : memref<16x16xf32, #tpu.memory_space<vmem>>, vector<16x16xf32>
    %cst_14 = arith.constant dense<0.000000e+00> : vector<128x16xf32>
    %23 = tpu.matmul %21, %22, %cst_14 {dimension_numbers = #tpu.dot_dimension_numbers<[1], [0], [0], [1], [0, 0, 1, 1], [], []>} : vector<128x16xf32>, vector<16x16xf32>, vector<128x16xf32> -> vector<128x16xf32>
    %c0_15 = arith.constant 0 : index
    %c0_16 = arith.constant 0 : index
    %24 = vector.load %arg6[%c0_15, %c0_16] : memref<1x16xf32, #tpu.memory_space<vmem>>, vector<1x16xf32>
    %25 = vector.broadcast %24 : vector<1x16xf32> to vector<128x16xf32>
    %26 = arith.addf %23, %25 : vector<128x16xf32>
    %cst_17 = arith.constant 0.000000e+00 : f32
    %27 = vector.broadcast %cst_17 : f32 to vector<128x16xf32>
    %28 = arith.maximumf %26, %27 : vector<128x16xf32>
    %29 = vector.extract_strided_slice %28 {offsets = [0, 0], sizes = [32, 16], strides = [1, 1]} : vector<128x16xf32> to vector<32x16xf32>
    %c0_18 = arith.constant 0 : index
    %c0_19 = arith.constant 0 : index
    %30 = vector.load %arg7[%c0_18, %c0_19] : memref<16x32xf32, #tpu.memory_space<vmem>>, vector<16x32xf32>
    %cst_20 = arith.constant dense<0.000000e+00> : vector<32x32xf32>
    %31 = tpu.matmul %29, %30, %cst_20 {dimension_numbers = #tpu.dot_dimension_numbers<[1], [0], [0], [1], [0, 0, 1, 1], [], []>} : vector<32x16xf32>, vector<16x32xf32>, vector<32x32xf32> -> vector<32x32xf32>
    %c0_21 = arith.constant 0 : index
    %c0_22 = arith.constant 0 : index
    %32 = vector.load %arg8[%c0_21, %c0_22] : memref<1x32xf32, #tpu.memory_space<vmem>>, vector<1x32xf32>
    %33 = vector.broadcast %32 : vector<1x32xf32> to vector<32x32xf32>
    %34 = arith.addf %31, %33 : vector<32x32xf32>
    %cst_23 = arith.constant 0.000000e+00 : f32
    %35 = vector.broadcast %cst_23 : f32 to vector<32x32xf32>
    %36 = arith.maximumf %34, %35 : vector<32x32xf32>
    %c0_24 = arith.constant 0 : index
    %c0_25 = arith.constant 0 : index
    %37 = vector.load %arg9[%c0_24, %c0_25] : memref<32x32xf32, #tpu.memory_space<vmem>>, vector<32x32xf32>
    %cst_26 = arith.constant dense<0.000000e+00> : vector<32x32xf32>
    %38 = tpu.matmul %36, %37, %cst_26 {dimension_numbers = #tpu.dot_dimension_numbers<[1], [0], [0], [1], [0, 0, 1, 1], [], []>} : vector<32x32xf32>, vector<32x32xf32>, vector<32x32xf32> -> vector<32x32xf32>
    %c0_27 = arith.constant 0 : index
    %c0_28 = arith.constant 0 : index
    %39 = vector.load %arg10[%c0_27, %c0_28] : memref<1x32xf32, #tpu.memory_space<vmem>>, vector<1x32xf32>
    %40 = vector.broadcast %39 : vector<1x32xf32> to vector<32x32xf32>
    %41 = arith.addf %38, %40 : vector<32x32xf32>
    %cst_29 = arith.constant 0.000000e+00 : f32
    %42 = vector.broadcast %cst_29 : f32 to vector<32x32xf32>
    %43 = arith.maximumf %41, %42 : vector<32x32xf32>
    %c0_30 = arith.constant 0 : index
    %c0_31 = arith.constant 0 : index
    %44 = vector.load %arg11[%c0_30, %c0_31] : memref<32x64xf32, #tpu.memory_space<vmem>>, vector<32x64xf32>
    %cst_32 = arith.constant dense<0.000000e+00> : vector<32x64xf32>
    %45 = tpu.matmul %43, %44, %cst_32 {dimension_numbers = #tpu.dot_dimension_numbers<[1], [0], [0], [1], [0, 0, 1, 1], [], []>} : vector<32x32xf32>, vector<32x64xf32>, vector<32x64xf32> -> vector<32x64xf32>
    %c0_33 = arith.constant 0 : index
    %c0_34 = arith.constant 0 : index
    %46 = vector.load %arg12[%c0_33, %c0_34] : memref<1x64xf32, #tpu.memory_space<vmem>>, vector<1x64xf32>
    %47 = vector.broadcast %46 : vector<1x64xf32> to vector<32x64xf32>
    %48 = arith.addf %45, %47 : vector<32x64xf32>
    %cst_35 = arith.constant 0.000000e+00 : f32
    %49 = vector.broadcast %cst_35 : f32 to vector<32x64xf32>
    %50 = arith.maximumf %48, %49 : vector<32x64xf32>
    %c0_36 = arith.constant 0 : index
    %c0_37 = arith.constant 0 : index
    %51 = vector.load %arg13[%c0_36, %c0_37] : memref<64x64xf32, #tpu.memory_space<vmem>>, vector<64x64xf32>
    %cst_38 = arith.constant dense<0.000000e+00> : vector<32x64xf32>
    %52 = tpu.matmul %50, %51, %cst_38 {dimension_numbers = #tpu.dot_dimension_numbers<[1], [0], [0], [1], [0, 0, 1, 1], [], []>} : vector<32x64xf32>, vector<64x64xf32>, vector<32x64xf32> -> vector<32x64xf32>
    %c0_39 = arith.constant 0 : index
    %c0_40 = arith.constant 0 : index
    %53 = vector.load %arg14[%c0_39, %c0_40] : memref<1x64xf32, #tpu.memory_space<vmem>>, vector<1x64xf32>
    %54 = vector.broadcast %53 : vector<1x64xf32> to vector<32x64xf32>
    %55 = arith.addf %52, %54 : vector<32x64xf32>
    %cst_41 = arith.constant 0.000000e+00 : f32
    %56 = vector.broadcast %cst_41 : f32 to vector<32x64xf32>
    %57 = arith.maximumf %55, %56 : vector<32x64xf32>
    %c0_42 = arith.constant 0 : index
    %c0_43 = arith.constant 0 : index
    %58 = vector.load %arg15[%c0_42, %c0_43] : memref<64x128xf32, #tpu.memory_space<vmem>>, vector<64x128xf32>
    %cst_44 = arith.constant dense<0.000000e+00> : vector<32x128xf32>
    %59 = tpu.matmul %57, %58, %cst_44 {dimension_numbers = #tpu.dot_dimension_numbers<[1], [0], [0], [1], [0, 0, 1, 1], [], []>} : vector<32x64xf32>, vector<64x128xf32>, vector<32x128xf32> -> vector<32x128xf32>
    %c0_45 = arith.constant 0 : index
    %c0_46 = arith.constant 0 : index
    %60 = vector.load %arg16[%c0_45, %c0_46] : memref<1x128xf32, #tpu.memory_space<vmem>>, vector<1x128xf32>
    %61 = vector.broadcast %60 : vector<1x128xf32> to vector<32x128xf32>
    %62 = arith.addf %59, %61 : vector<32x128xf32>
    %cst_47 = arith.constant 0.000000e+00 : f32
    %63 = vector.broadcast %cst_47 : f32 to vector<32x128xf32>
    %64 = arith.maximumf %62, %63 : vector<32x128xf32>
    %c0_48 = arith.constant 0 : index
    %c0_49 = arith.constant 0 : index
    %65 = vector.load %arg17[%c0_48, %c0_49] : memref<128x128xf32, #tpu.memory_space<vmem>>, vector<128x128xf32>
    %cst_50 = arith.constant dense<0.000000e+00> : vector<32x128xf32>
    %66 = tpu.matmul %64, %65, %cst_50 {dimension_numbers = #tpu.dot_dimension_numbers<[1], [0], [0], [1], [0, 0, 1, 1], [], []>} : vector<32x128xf32>, vector<128x128xf32>, vector<32x128xf32> -> vector<32x128xf32>
    %c0_51 = arith.constant 0 : index
    %c0_52 = arith.constant 0 : index
    %67 = vector.load %arg18[%c0_51, %c0_52] : memref<1x128xf32, #tpu.memory_space<vmem>>, vector<1x128xf32>
    %68 = vector.broadcast %67 : vector<1x128xf32> to vector<32x128xf32>
    %69 = arith.addf %66, %68 : vector<32x128xf32>
    %cst_53 = arith.constant 0.000000e+00 : f32
    %70 = vector.broadcast %cst_53 : f32 to vector<32x128xf32>
    %71 = arith.maximumf %69, %70 : vector<32x128xf32>
    %c0_54 = arith.constant 0 : index
    %c0_55 = arith.constant 0 : index
    %72 = vector.load %arg19[%c0_54, %c0_55] : memref<128x16xf32, #tpu.memory_space<vmem>>, vector<128x16xf32>
    tpu.vector_store %arg19[%c0_54, %c0_55], %21 {strides = array<i32>} : memref<128x16xf32, #tpu.memory_space<vmem>>, vector<128x16xf32>,
    %c0_56 = arith.constant 0 : index
    %c0_57 = arith.constant 0 : index
    %73 = vector.load %arg20[%c0_56, %c0_57] : memref<128x16xf32, #tpu.memory_space<vmem>>, vector<128x16xf32>
    tpu.vector_store %arg20[%c0_56, %c0_57], %28 {strides = array<i32>} : memref<128x16xf32, #tpu.memory_space<vmem>>, vector<128x16xf32>,
    %c0_58 = arith.constant 0 : index
    %c0_59 = arith.constant 0 : index
    %74 = vector.load %arg21[%c0_58, %c0_59] : memref<32x32xf32, #tpu.memory_space<vmem>>, vector<32x32xf32>
    tpu.vector_store %arg21[%c0_58, %c0_59], %36 {strides = array<i32>} : memref<32x32xf32, #tpu.memory_space<vmem>>, vector<32x32xf32>,
    %c0_60 = arith.constant 0 : index
    %c0_61 = arith.constant 0 : index
    %75 = vector.load %arg22[%c0_60, %c0_61] : memref<32x32xf32, #tpu.memory_space<vmem>>, vector<32x32xf32>
    tpu.vector_store %arg22[%c0_60, %c0_61], %43 {strides = array<i32>} : memref<32x32xf32, #tpu.memory_space<vmem>>, vector<32x32xf32>,
    %c0_62 = arith.constant 0 : index
    %c0_63 = arith.constant 0 : index
    %76 = vector.load %arg23[%c0_62, %c0_63] : memref<32x64xf32, #tpu.memory_space<vmem>>, vector<32x64xf32>
    tpu.vector_store %arg23[%c0_62, %c0_63], %50 {strides = array<i32>} : memref<32x64xf32, #tpu.memory_space<vmem>>, vector<32x64xf32>,
    %c0_64 = arith.constant 0 : index
    %c0_65 = arith.constant 0 : index
    %77 = vector.load %arg24[%c0_64, %c0_65] : memref<32x64xf32, #tpu.memory_space<vmem>>, vector<32x64xf32>
    tpu.vector_store %arg24[%c0_64, %c0_65], %57 {strides = array<i32>} : memref<32x64xf32, #tpu.memory_space<vmem>>, vector<32x64xf32>,
    %c0_66 = arith.constant 0 : index
    %c0_67 = arith.constant 0 : index
    %78 = vector.load %arg25[%c0_66, %c0_67] : memref<32x128xf32, #tpu.memory_space<vmem>>, vector<32x128xf32>
    tpu.vector_store %arg25[%c0_66, %c0_67], %64 {strides = array<i32>} : memref<32x128xf32, #tpu.memory_space<vmem>>, vector<32x128xf32>,
    %c0_68 = arith.constant 0 : index
    %c0_69 = arith.constant 0 : index
    %79 = vector.load %arg26[%c0_68, %c0_69] : memref<32x128xf32, #tpu.memory_space<vmem>>, vector<32x128xf32>
    tpu.vector_store %arg26[%c0_68, %c0_69], %71 {strides = array<i32>} : memref<32x128xf32, #tpu.memory_space<vmem>>, vector<32x128xf32>,
    return
  }
}

module attributes {stable_mosaic.version = 11 : i64} {
  func.func @_encdec_kernel(%arg0: i32, %arg1: memref<128x16xf32, #tpu.memory_space<vmem>>, %arg2: memref<128x16xf32, #tpu.memory_space<vmem>>, %arg3: memref<32x32xf32, #tpu.memory_space<vmem>>, %arg4: memref<32x32xf32, #tpu.memory_space<vmem>>, %arg5: memref<32x64xf32, #tpu.memory_space<vmem>>, %arg6: memref<32x64xf32, #tpu.memory_space<vmem>>, %arg7: memref<32x128xf32, #tpu.memory_space<vmem>>, %arg8: memref<32x128xf32, #tpu.memory_space<vmem>>, %arg9: memref<16x32xf32, #tpu.memory_space<vmem>>, %arg10: memref<1x32xf32, #tpu.memory_space<vmem>>, %arg11: memref<32x64xf32, #tpu.memory_space<vmem>>, %arg12: memref<1x64xf32, #tpu.memory_space<vmem>>, %arg13: memref<64x128xf32, #tpu.memory_space<vmem>>, %arg14: memref<1x128xf32, #tpu.memory_space<vmem>>, %arg15: memref<1x16x4xf32, #tpu.memory_space<vmem>>, %arg16: memref<1x1x4xf32, #tpu.memory_space<vmem>>, %arg17: memref<1x4x16xf32, #tpu.memory_space<vmem>>, %arg18: memref<1x1x16xf32, #tpu.memory_space<vmem>>, %arg19: memref<1x32x8xf32, #tpu.memory_space<vmem>>, %arg20: memref<1x32x8xf32, #tpu.memory_space<vmem>>, %arg21: memref<1x1x8xf32, #tpu.memory_space<vmem>>, %arg22: memref<1x8x32xf32, #tpu.memory_space<vmem>>, %arg23: memref<1x1x32xf32, #tpu.memory_space<vmem>>, %arg24: memref<1x64x16xf32, #tpu.memory_space<vmem>>, %arg25: memref<1x64x16xf32, #tpu.memory_space<vmem>>, %arg26: memref<1x1x16xf32, #tpu.memory_space<vmem>>, %arg27: memref<1x16x64xf32, #tpu.memory_space<vmem>>, %arg28: memref<1x1x64xf32, #tpu.memory_space<vmem>>, %arg29: memref<1x128x32xf32, #tpu.memory_space<vmem>>, %arg30: memref<1x128x32xf32, #tpu.memory_space<vmem>>, %arg31: memref<1x1x32xf32, #tpu.memory_space<vmem>>, %arg32: memref<1x32x128xf32, #tpu.memory_space<vmem>>, %arg33: memref<1x1x128xf32, #tpu.memory_space<vmem>>, %arg34: memref<1x128x32xf32, #tpu.memory_space<vmem>>, %arg35: memref<1x1x32xf32, #tpu.memory_space<vmem>>, %arg36: memref<1x32x16xf32, #tpu.memory_space<vmem>>, %arg37: memref<1x1x16xf32, #tpu.memory_space<vmem>>, %arg38: memref<1x32x16xf32, #tpu.memory_space<vmem>>) attributes {dimension_semantics = [#tpu.dimension_semantics<parallel>], iteration_bounds = array<i64: 3>, scalar_prefetch = 0 : i64, scratch_operands = 0 : i64, tpu.core_type = #tpu.core_type<tc>, window_params = [{pipeline_mode = #tpu.pipeline_mode<synchronous>, transform_indices = @transform_0, window_bounds = array<i64: 128, 16>}, {pipeline_mode = #tpu.pipeline_mode<synchronous>, transform_indices = @transform_1, window_bounds = array<i64: 128, 16>}, {pipeline_mode = #tpu.pipeline_mode<synchronous>, transform_indices = @transform_2, window_bounds = array<i64: 32, 32>}, {pipeline_mode = #tpu.pipeline_mode<synchronous>, transform_indices = @transform_3, window_bounds = array<i64: 32, 32>}, {pipeline_mode = #tpu.pipeline_mode<synchronous>, transform_indices = @transform_4, window_bounds = array<i64: 32, 64>}, {pipeline_mode = #tpu.pipeline_mode<synchronous>, transform_indices = @transform_5, window_bounds = array<i64: 32, 64>}, {pipeline_mode = #tpu.pipeline_mode<synchronous>, transform_indices = @transform_6, window_bounds = array<i64: 32, 128>}, {pipeline_mode = #tpu.pipeline_mode<synchronous>, transform_indices = @transform_7, window_bounds = array<i64: 32, 128>}, {pipeline_mode = #tpu.pipeline_mode<synchronous>, transform_indices = @transform_8, window_bounds = array<i64: 16, 32>}, {pipeline_mode = #tpu.pipeline_mode<synchronous>, transform_indices = @transform_9, window_bounds = array<i64: 1, 32>}, {pipeline_mode = #tpu.pipeline_mode<synchronous>, transform_indices = @transform_10, window_bounds = array<i64: 32, 64>}, {pipeline_mode = #tpu.pipeline_mode<synchronous>, transform_indices = @transform_11, window_bounds = array<i64: 1, 64>}, {pipeline_mode = #tpu.pipeline_mode<synchronous>, transform_indices = @transform_12, window_bounds = array<i64: 64, 128>}, {pipeline_mode = #tpu.pipeline_mode<synchronous>, transform_indices = @transform_13, window_bounds = array<i64: 1, 128>}, {transform_indices = @transform_14, window_bounds = array<i64: 1, 16, 4>}, {transform_indices = @transform_15, window_bounds = array<i64: 1, 1, 4>}, {transform_indices = @transform_16, window_bounds = array<i64: 1, 4, 16>}, {transform_indices = @transform_17, window_bounds = array<i64: 1, 1, 16>}, {transform_indices = @transform_18, window_bounds = array<i64: 1, 32, 8>}, {transform_indices = @transform_19, window_bounds = array<i64: 1, 32, 8>}, {transform_indices = @transform_20, window_bounds = array<i64: 1, 1, 8>}, {transform_indices = @transform_21, window_bounds = array<i64: 1, 8, 32>}, {transform_indices = @transform_22, window_bounds = array<i64: 1, 1, 32>}, {transform_indices = @transform_23, window_bounds = array<i64: 1, 64, 16>}, {transform_indices = @transform_24, window_bounds = array<i64: 1, 64, 16>}, {transform_indices = @transform_25, window_bounds = array<i64: 1, 1, 16>}, {transform_indices = @transform_26, window_bounds = array<i64: 1, 16, 64>}, {transform_indices = @transform_27, window_bounds = array<i64: 1, 1, 64>}, {transform_indices = @transform_28, window_bounds = array<i64: 1, 128, 32>}, {transform_indices = @transform_29, window_bounds = array<i64: 1, 128, 32>}, {transform_indices = @transform_30, window_bounds = array<i64: 1, 1, 32>}, {transform_indices = @transform_31, window_bounds = array<i64: 1, 32, 128>}, {transform_indices = @transform_32, window_bounds = array<i64: 1, 1, 128>}, {transform_indices = @transform_33, window_bounds = array<i64: 1, 128, 32>}, {transform_indices = @transform_34, window_bounds = array<i64: 1, 1, 32>}, {transform_indices = @transform_35, window_bounds = array<i64: 1, 32, 16>}, {transform_indices = @transform_36, window_bounds = array<i64: 1, 1, 16>}, {transform_indices = @transform_37, window_bounds = array<i64: 1, 32, 16>}]} {
    %c0 = arith.constant 0 : index
    %c0_0 = arith.constant 0 : index
    %0 = vector.load %arg1[%c0, %c0_0] : memref<128x16xf32, #tpu.memory_space<vmem>>, vector<128x16xf32>
    %c0_1 = arith.constant 0 : index
    %c0_2 = arith.constant 0 : index
    %c0_3 = arith.constant 0 : index
    %1 = vector.load %arg15[%c0_1, %c0_2, %c0_3] : memref<1x16x4xf32, #tpu.memory_space<vmem>>, vector<1x16x4xf32>
    %2 = vector.shape_cast %1 : vector<1x16x4xf32> to vector<16x4xf32>
    %cst = arith.constant dense<0.000000e+00> : vector<128x4xf32>
    %3 = tpu.matmul %0, %2, %cst {dimension_numbers = #tpu.dot_dimension_numbers<[1], [0], [0], [1], [0, 0, 1, 1], [], []>} : vector<128x16xf32>, vector<16x4xf32>, vector<128x4xf32> -> vector<128x4xf32>
    %c0_4 = arith.constant 0 : index
    %c0_5 = arith.constant 0 : index
    %c0_6 = arith.constant 0 : index
    %4 = vector.load %arg16[%c0_4, %c0_5, %c0_6] : memref<1x1x4xf32, #tpu.memory_space<vmem>>, vector<1x1x4xf32>
    %5 = vector.shape_cast %4 : vector<1x1x4xf32> to vector<1x4xf32>
    %6 = vector.broadcast %5 : vector<1x4xf32> to vector<128x4xf32>
    %7 = arith.addf %3, %6 : vector<128x4xf32>
    %cst_7 = arith.constant 0.000000e+00 : f32
    %8 = vector.broadcast %cst_7 : f32 to vector<128x4xf32>
    %9 = arith.maximumf %7, %8 : vector<128x4xf32>
    %c0_8 = arith.constant 0 : index
    %c0_9 = arith.constant 0 : index
    %c0_10 = arith.constant 0 : index
    %10 = vector.load %arg17[%c0_8, %c0_9, %c0_10] : memref<1x4x16xf32, #tpu.memory_space<vmem>>, vector<1x4x16xf32>
    %11 = vector.shape_cast %10 : vector<1x4x16xf32> to vector<4x16xf32>
    %cst_11 = arith.constant dense<0.000000e+00> : vector<128x16xf32>
    %12 = tpu.matmul %9, %11, %cst_11 {dimension_numbers = #tpu.dot_dimension_numbers<[1], [0], [0], [1], [0, 0, 1, 1], [], []>} : vector<128x4xf32>, vector<4x16xf32>, vector<128x16xf32> -> vector<128x16xf32>
    %c0_12 = arith.constant 0 : index
    %c0_13 = arith.constant 0 : index
    %c0_14 = arith.constant 0 : index
    %13 = vector.load %arg18[%c0_12, %c0_13, %c0_14] : memref<1x1x16xf32, #tpu.memory_space<vmem>>, vector<1x1x16xf32>
    %14 = vector.shape_cast %13 : vector<1x1x16xf32> to vector<1x16xf32>
    %15 = vector.broadcast %14 : vector<1x16xf32> to vector<128x16xf32>
    %16 = arith.addf %12, %15 : vector<128x16xf32>
    %cst_15 = arith.constant 0.000000e+00 : f32
    %17 = vector.broadcast %cst_15 : f32 to vector<128x16xf32>
    %18 = arith.subf %17, %16 : vector<128x16xf32>
    %19 = math.exp %18 : vector<128x16xf32>
    %cst_16 = arith.constant 1.000000e+00 : f32
    %20 = vector.broadcast %cst_16 : f32 to vector<128x16xf32>
    %21 = arith.addf %20, %19 : vector<128x16xf32>
    %22 = tpu.reciprocal %21 {approx = true} : vector<128x16xf32> -> vector<128x16xf32>
    %c0_17 = arith.constant 0 : index
    %c0_18 = arith.constant 0 : index
    %23 = vector.load %arg2[%c0_17, %c0_18] : memref<128x16xf32, #tpu.memory_space<vmem>>, vector<128x16xf32>
    %24 = arith.mulf %22, %23 : vector<128x16xf32>
    %c0_19 = arith.constant 0 : index
    %c0_20 = arith.constant 0 : index
    %25 = vector.load %arg9[%c0_19, %c0_20] : memref<16x32xf32, #tpu.memory_space<vmem>>, vector<16x32xf32>
    %cst_21 = arith.constant dense<0.000000e+00> : vector<128x32xf32>
    %26 = tpu.matmul %24, %25, %cst_21 {dimension_numbers = #tpu.dot_dimension_numbers<[1], [0], [0], [1], [0, 0, 1, 1], [], []>} : vector<128x16xf32>, vector<16x32xf32>, vector<128x32xf32> -> vector<128x32xf32>
    %c0_22 = arith.constant 0 : index
    %c0_23 = arith.constant 0 : index
    %27 = vector.load %arg10[%c0_22, %c0_23] : memref<1x32xf32, #tpu.memory_space<vmem>>, vector<1x32xf32>
    %28 = vector.broadcast %27 : vector<1x32xf32> to vector<128x32xf32>
    %29 = arith.addf %26, %28 : vector<128x32xf32>
    %cst_24 = arith.constant 0.000000e+00 : f32
    %30 = vector.broadcast %cst_24 : f32 to vector<128x32xf32>
    %31 = arith.maximumf %29, %30 : vector<128x32xf32>
    %32 = vector.extract_strided_slice %31 {offsets = [0, 0], sizes = [32, 32], strides = [1, 1]} : vector<128x32xf32> to vector<32x32xf32>
    %33 = vector.extract_strided_slice %31 {offsets = [32, 0], sizes = [32, 32], strides = [1, 1]} : vector<128x32xf32> to vector<32x32xf32>
    %34 = arith.maximumf %32, %33 : vector<32x32xf32>
    %35 = vector.extract_strided_slice %31 {offsets = [64, 0], sizes = [32, 32], strides = [1, 1]} : vector<128x32xf32> to vector<32x32xf32>
    %36 = vector.extract_strided_slice %31 {offsets = [96, 0], sizes = [32, 32], strides = [1, 1]} : vector<128x32xf32> to vector<32x32xf32>
    %37 = arith.maximumf %35, %36 : vector<32x32xf32>
    %38 = arith.maximumf %34, %37 : vector<32x32xf32>
    %c0_25 = arith.constant 0 : index
    %c0_26 = arith.constant 0 : index
    %39 = vector.load %arg3[%c0_25, %c0_26] : memref<32x32xf32, #tpu.memory_space<vmem>>, vector<32x32xf32>
    %c0_27 = arith.constant 0 : index
    %c0_28 = arith.constant 0 : index
    %c0_29 = arith.constant 0 : index
    %40 = vector.load %arg19[%c0_27, %c0_28, %c0_29] : memref<1x32x8xf32, #tpu.memory_space<vmem>>, vector<1x32x8xf32>
    %41 = vector.shape_cast %40 : vector<1x32x8xf32> to vector<32x8xf32>
    %cst_30 = arith.constant dense<0.000000e+00> : vector<32x8xf32>
    %42 = tpu.matmul %39, %41, %cst_30 {dimension_numbers = #tpu.dot_dimension_numbers<[1], [0], [0], [1], [0, 0, 1, 1], [], []>} : vector<32x32xf32>, vector<32x8xf32>, vector<32x8xf32> -> vector<32x8xf32>
    %c0_31 = arith.constant 0 : index
    %c0_32 = arith.constant 0 : index
    %c0_33 = arith.constant 0 : index
    %43 = vector.load %arg20[%c0_31, %c0_32, %c0_33] : memref<1x32x8xf32, #tpu.memory_space<vmem>>, vector<1x32x8xf32>
    %44 = vector.shape_cast %43 : vector<1x32x8xf32> to vector<32x8xf32>
    %cst_34 = arith.constant dense<0.000000e+00> : vector<32x8xf32>
    %45 = tpu.matmul %38, %44, %cst_34 {dimension_numbers = #tpu.dot_dimension_numbers<[1], [0], [0], [1], [0, 0, 1, 1], [], []>} : vector<32x32xf32>, vector<32x8xf32>, vector<32x8xf32> -> vector<32x8xf32>
    %46 = arith.addf %42, %45 : vector<32x8xf32>
    %c0_35 = arith.constant 0 : index
    %c0_36 = arith.constant 0 : index
    %c0_37 = arith.constant 0 : index
    %47 = vector.load %arg21[%c0_35, %c0_36, %c0_37] : memref<1x1x8xf32, #tpu.memory_space<vmem>>, vector<1x1x8xf32>
    %48 = vector.shape_cast %47 : vector<1x1x8xf32> to vector<1x8xf32>
    %49 = vector.broadcast %48 : vector<1x8xf32> to vector<32x8xf32>
    %50 = arith.addf %46, %49 : vector<32x8xf32>
    %cst_38 = arith.constant 0.000000e+00 : f32
    %51 = vector.broadcast %cst_38 : f32 to vector<32x8xf32>
    %52 = arith.maximumf %50, %51 : vector<32x8xf32>
    %c0_39 = arith.constant 0 : index
    %c0_40 = arith.constant 0 : index
    %c0_41 = arith.constant 0 : index
    %53 = vector.load %arg22[%c0_39, %c0_40, %c0_41] : memref<1x8x32xf32, #tpu.memory_space<vmem>>, vector<1x8x32xf32>
    %54 = vector.shape_cast %53 : vector<1x8x32xf32> to vector<8x32xf32>
    %cst_42 = arith.constant dense<0.000000e+00> : vector<32x32xf32>
    %55 = tpu.matmul %52, %54, %cst_42 {dimension_numbers = #tpu.dot_dimension_numbers<[1], [0], [0], [1], [0, 0, 1, 1], [], []>} : vector<32x8xf32>, vector<8x32xf32>, vector<32x32xf32> -> vector<32x32xf32>
    %c0_43 = arith.constant 0 : index
    %c0_44 = arith.constant 0 : index
    %c0_45 = arith.constant 0 : index
    %56 = vector.load %arg23[%c0_43, %c0_44, %c0_45] : memref<1x1x32xf32, #tpu.memory_space<vmem>>, vector<1x1x32xf32>
    %57 = vector.shape_cast %56 : vector<1x1x32xf32> to vector<1x32xf32>
    %58 = vector.broadcast %57 : vector<1x32xf32> to vector<32x32xf32>
    %59 = arith.addf %55, %58 : vector<32x32xf32>
    %cst_46 = arith.constant 0.000000e+00 : f32
    %60 = vector.broadcast %cst_46 : f32 to vector<32x32xf32>
    %61 = arith.subf %60, %59 : vector<32x32xf32>
    %62 = math.exp %61 : vector<32x32xf32>
    %cst_47 = arith.constant 1.000000e+00 : f32
    %63 = vector.broadcast %cst_47 : f32 to vector<32x32xf32>
    %64 = arith.addf %63, %62 : vector<32x32xf32>
    %65 = tpu.reciprocal %64 {approx = true} : vector<32x32xf32> -> vector<32x32xf32>
    %c0_48 = arith.constant 0 : index
    %c0_49 = arith.constant 0 : index
    %66 = vector.load %arg4[%c0_48, %c0_49] : memref<32x32xf32, #tpu.memory_space<vmem>>, vector<32x32xf32>
    %67 = arith.mulf %65, %66 : vector<32x32xf32>
    %c0_50 = arith.constant 0 : index
    %c0_51 = arith.constant 0 : index
    %68 = vector.load %arg11[%c0_50, %c0_51] : memref<32x64xf32, #tpu.memory_space<vmem>>, vector<32x64xf32>
    %cst_52 = arith.constant dense<0.000000e+00> : vector<32x64xf32>
    %69 = tpu.matmul %67, %68, %cst_52 {dimension_numbers = #tpu.dot_dimension_numbers<[1], [0], [0], [1], [0, 0, 1, 1], [], []>} : vector<32x32xf32>, vector<32x64xf32>, vector<32x64xf32> -> vector<32x64xf32>
    %c0_53 = arith.constant 0 : index
    %c0_54 = arith.constant 0 : index
    %70 = vector.load %arg12[%c0_53, %c0_54] : memref<1x64xf32, #tpu.memory_space<vmem>>, vector<1x64xf32>
    %71 = vector.broadcast %70 : vector<1x64xf32> to vector<32x64xf32>
    %72 = arith.addf %69, %71 : vector<32x64xf32>
    %cst_55 = arith.constant 0.000000e+00 : f32
    %73 = vector.broadcast %cst_55 : f32 to vector<32x64xf32>
    %74 = arith.maximumf %72, %73 : vector<32x64xf32>
    %c0_56 = arith.constant 0 : index
    %c0_57 = arith.constant 0 : index
    %75 = vector.load %arg5[%c0_56, %c0_57] : memref<32x64xf32, #tpu.memory_space<vmem>>, vector<32x64xf32>
    %c0_58 = arith.constant 0 : index
    %c0_59 = arith.constant 0 : index
    %c0_60 = arith.constant 0 : index
    %76 = vector.load %arg24[%c0_58, %c0_59, %c0_60] : memref<1x64x16xf32, #tpu.memory_space<vmem>>, vector<1x64x16xf32>
    %77 = vector.shape_cast %76 : vector<1x64x16xf32> to vector<64x16xf32>
    %cst_61 = arith.constant dense<0.000000e+00> : vector<32x16xf32>
    %78 = tpu.matmul %75, %77, %cst_61 {dimension_numbers = #tpu.dot_dimension_numbers<[1], [0], [0], [1], [0, 0, 1, 1], [], []>} : vector<32x64xf32>, vector<64x16xf32>, vector<32x16xf32> -> vector<32x16xf32>
    %c0_62 = arith.constant 0 : index
    %c0_63 = arith.constant 0 : index
    %c0_64 = arith.constant 0 : index
    %79 = vector.load %arg25[%c0_62, %c0_63, %c0_64] : memref<1x64x16xf32, #tpu.memory_space<vmem>>, vector<1x64x16xf32>
    %80 = vector.shape_cast %79 : vector<1x64x16xf32> to vector<64x16xf32>
    %cst_65 = arith.constant dense<0.000000e+00> : vector<32x16xf32>
    %81 = tpu.matmul %74, %80, %cst_65 {dimension_numbers = #tpu.dot_dimension_numbers<[1], [0], [0], [1], [0, 0, 1, 1], [], []>} : vector<32x64xf32>, vector<64x16xf32>, vector<32x16xf32> -> vector<32x16xf32>
    %82 = arith.addf %78, %81 : vector<32x16xf32>
    %c0_66 = arith.constant 0 : index
    %c0_67 = arith.constant 0 : index
    %c0_68 = arith.constant 0 : index
    %83 = vector.load %arg26[%c0_66, %c0_67, %c0_68] : memref<1x1x16xf32, #tpu.memory_space<vmem>>, vector<1x1x16xf32>
    %84 = vector.shape_cast %83 : vector<1x1x16xf32> to vector<1x16xf32>
    %85 = vector.broadcast %84 : vector<1x16xf32> to vector<32x16xf32>
    %86 = arith.addf %82, %85 : vector<32x16xf32>
    %cst_69 = arith.constant 0.000000e+00 : f32
    %87 = vector.broadcast %cst_69 : f32 to vector<32x16xf32>
    %88 = arith.maximumf %86, %87 : vector<32x16xf32>
    %c0_70 = arith.constant 0 : index
    %c0_71 = arith.constant 0 : index
    %c0_72 = arith.constant 0 : index
    %89 = vector.load %arg27[%c0_70, %c0_71, %c0_72] : memref<1x16x64xf32, #tpu.memory_space<vmem>>, vector<1x16x64xf32>
    %90 = vector.shape_cast %89 : vector<1x16x64xf32> to vector<16x64xf32>
    %cst_73 = arith.constant dense<0.000000e+00> : vector<32x64xf32>
    %91 = tpu.matmul %88, %90, %cst_73 {dimension_numbers = #tpu.dot_dimension_numbers<[1], [0], [0], [1], [0, 0, 1, 1], [], []>} : vector<32x16xf32>, vector<16x64xf32>, vector<32x64xf32> -> vector<32x64xf32>
    %c0_74 = arith.constant 0 : index
    %c0_75 = arith.constant 0 : index
    %c0_76 = arith.constant 0 : index
    %92 = vector.load %arg28[%c0_74, %c0_75, %c0_76] : memref<1x1x64xf32, #tpu.memory_space<vmem>>, vector<1x1x64xf32>
    %93 = vector.shape_cast %92 : vector<1x1x64xf32> to vector<1x64xf32>
    %94 = vector.broadcast %93 : vector<1x64xf32> to vector<32x64xf32>
    %95 = arith.addf %91, %94 : vector<32x64xf32>
    %cst_77 = arith.constant 0.000000e+00 : f32
    %96 = vector.broadcast %cst_77 : f32 to vector<32x64xf32>
    %97 = arith.subf %96, %95 : vector<32x64xf32>
    %98 = math.exp %97 : vector<32x64xf32>
    %cst_78 = arith.constant 1.000000e+00 : f32
    %99 = vector.broadcast %cst_78 : f32 to vector<32x64xf32>
    %100 = arith.addf %99, %98 : vector<32x64xf32>
    %101 = tpu.reciprocal %100 {approx = true} : vector<32x64xf32> -> vector<32x64xf32>
    %c0_79 = arith.constant 0 : index
    %c0_80 = arith.constant 0 : index
    %102 = vector.load %arg6[%c0_79, %c0_80] : memref<32x64xf32, #tpu.memory_space<vmem>>, vector<32x64xf32>
    %103 = arith.mulf %101, %102 : vector<32x64xf32>
    %c0_81 = arith.constant 0 : index
    %c0_82 = arith.constant 0 : index
    %104 = vector.load %arg13[%c0_81, %c0_82] : memref<64x128xf32, #tpu.memory_space<vmem>>, vector<64x128xf32>
    %cst_83 = arith.constant dense<0.000000e+00> : vector<32x128xf32>
    %105 = tpu.matmul %103, %104, %cst_83 {dimension_numbers = #tpu.dot_dimension_numbers<[1], [0], [0], [1], [0, 0, 1, 1], [], []>} : vector<32x64xf32>, vector<64x128xf32>, vector<32x128xf32> -> vector<32x128xf32>
    %c0_84 = arith.constant 0 : index
    %c0_85 = arith.constant 0 : index
    %106 = vector.load %arg14[%c0_84, %c0_85] : memref<1x128xf32, #tpu.memory_space<vmem>>, vector<1x128xf32>
    %107 = vector.broadcast %106 : vector<1x128xf32> to vector<32x128xf32>
    %108 = arith.addf %105, %107 : vector<32x128xf32>
    %cst_86 = arith.constant 0.000000e+00 : f32
    %109 = vector.broadcast %cst_86 : f32 to vector<32x128xf32>
    %110 = arith.maximumf %108, %109 : vector<32x128xf32>
    %c0_87 = arith.constant 0 : index
    %c0_88 = arith.constant 0 : index
    %111 = vector.load %arg7[%c0_87, %c0_88] : memref<32x128xf32, #tpu.memory_space<vmem>>, vector<32x128xf32>
    %c0_89 = arith.constant 0 : index
    %c0_90 = arith.constant 0 : index
    %c0_91 = arith.constant 0 : index
    %112 = vector.load %arg29[%c0_89, %c0_90, %c0_91] : memref<1x128x32xf32, #tpu.memory_space<vmem>>, vector<1x128x32xf32>
    %113 = vector.shape_cast %112 : vector<1x128x32xf32> to vector<128x32xf32>
    %cst_92 = arith.constant dense<0.000000e+00> : vector<32x32xf32>
    %114 = tpu.matmul %111, %113, %cst_92 {dimension_numbers = #tpu.dot_dimension_numbers<[1], [0], [0], [1], [0, 0, 1, 1], [], []>} : vector<32x128xf32>, vector<128x32xf32>, vector<32x32xf32> -> vector<32x32xf32>
    %c0_93 = arith.constant 0 : index
    %c0_94 = arith.constant 0 : index
    %c0_95 = arith.constant 0 : index
    %115 = vector.load %arg30[%c0_93, %c0_94, %c0_95] : memref<1x128x32xf32, #tpu.memory_space<vmem>>, vector<1x128x32xf32>
    %116 = vector.shape_cast %115 : vector<1x128x32xf32> to vector<128x32xf32>
    %cst_96 = arith.constant dense<0.000000e+00> : vector<32x32xf32>
    %117 = tpu.matmul %110, %116, %cst_96 {dimension_numbers = #tpu.dot_dimension_numbers<[1], [0], [0], [1], [0, 0, 1, 1], [], []>} : vector<32x128xf32>, vector<128x32xf32>, vector<32x32xf32> -> vector<32x32xf32>
    %118 = arith.addf %114, %117 : vector<32x32xf32>
    %c0_97 = arith.constant 0 : index
    %c0_98 = arith.constant 0 : index
    %c0_99 = arith.constant 0 : index
    %119 = vector.load %arg31[%c0_97, %c0_98, %c0_99] : memref<1x1x32xf32, #tpu.memory_space<vmem>>, vector<1x1x32xf32>
    %120 = vector.shape_cast %119 : vector<1x1x32xf32> to vector<1x32xf32>
    %121 = vector.broadcast %120 : vector<1x32xf32> to vector<32x32xf32>
    %122 = arith.addf %118, %121 : vector<32x32xf32>
    %cst_100 = arith.constant 0.000000e+00 : f32
    %123 = vector.broadcast %cst_100 : f32 to vector<32x32xf32>
    %124 = arith.maximumf %122, %123 : vector<32x32xf32>
    %c0_101 = arith.constant 0 : index
    %c0_102 = arith.constant 0 : index
    %c0_103 = arith.constant 0 : index
    %125 = vector.load %arg32[%c0_101, %c0_102, %c0_103] : memref<1x32x128xf32, #tpu.memory_space<vmem>>, vector<1x32x128xf32>
    %126 = vector.shape_cast %125 : vector<1x32x128xf32> to vector<32x128xf32>
    %cst_104 = arith.constant dense<0.000000e+00> : vector<32x128xf32>
    %127 = tpu.matmul %124, %126, %cst_104 {dimension_numbers = #tpu.dot_dimension_numbers<[1], [0], [0], [1], [0, 0, 1, 1], [], []>} : vector<32x32xf32>, vector<32x128xf32>, vector<32x128xf32> -> vector<32x128xf32>
    %c0_105 = arith.constant 0 : index
    %c0_106 = arith.constant 0 : index
    %c0_107 = arith.constant 0 : index
    %128 = vector.load %arg33[%c0_105, %c0_106, %c0_107] : memref<1x1x128xf32, #tpu.memory_space<vmem>>, vector<1x1x128xf32>
    %129 = vector.shape_cast %128 : vector<1x1x128xf32> to vector<1x128xf32>
    %130 = vector.broadcast %129 : vector<1x128xf32> to vector<32x128xf32>
    %131 = arith.addf %127, %130 : vector<32x128xf32>
    %cst_108 = arith.constant 0.000000e+00 : f32
    %132 = vector.broadcast %cst_108 : f32 to vector<32x128xf32>
    %133 = arith.subf %132, %131 : vector<32x128xf32>
    %134 = math.exp %133 : vector<32x128xf32>
    %cst_109 = arith.constant 1.000000e+00 : f32
    %135 = vector.broadcast %cst_109 : f32 to vector<32x128xf32>
    %136 = arith.addf %135, %134 : vector<32x128xf32>
    %137 = tpu.reciprocal %136 {approx = true} : vector<32x128xf32> -> vector<32x128xf32>
    %c0_110 = arith.constant 0 : index
    %c0_111 = arith.constant 0 : index
    %138 = vector.load %arg8[%c0_110, %c0_111] : memref<32x128xf32, #tpu.memory_space<vmem>>, vector<32x128xf32>
    %139 = arith.mulf %137, %138 : vector<32x128xf32>
    %c0_112 = arith.constant 0 : index
    %c0_113 = arith.constant 0 : index
    %c0_114 = arith.constant 0 : index
    %140 = vector.load %arg34[%c0_112, %c0_113, %c0_114] : memref<1x128x32xf32, #tpu.memory_space<vmem>>, vector<1x128x32xf32>
    %141 = vector.shape_cast %140 : vector<1x128x32xf32> to vector<128x32xf32>
    %cst_115 = arith.constant dense<0.000000e+00> : vector<32x32xf32>
    %142 = tpu.matmul %139, %141, %cst_115 {dimension_numbers = #tpu.dot_dimension_numbers<[1], [0], [0], [1], [0, 0, 1, 1], [], []>} : vector<32x128xf32>, vector<128x32xf32>, vector<32x32xf32> -> vector<32x32xf32>
    %c0_116 = arith.constant 0 : index
    %c0_117 = arith.constant 0 : index
    %c0_118 = arith.constant 0 : index
    %143 = vector.load %arg35[%c0_116, %c0_117, %c0_118] : memref<1x1x32xf32, #tpu.memory_space<vmem>>, vector<1x1x32xf32>
    %144 = vector.shape_cast %143 : vector<1x1x32xf32> to vector<1x32xf32>
    %145 = vector.broadcast %144 : vector<1x32xf32> to vector<32x32xf32>
    %146 = arith.addf %142, %145 : vector<32x32xf32>
    %cst_119 = arith.constant 0.000000e+00 : f32
    %147 = vector.broadcast %cst_119 : f32 to vector<32x32xf32>
    %148 = arith.maximumf %146, %147 : vector<32x32xf32>
    %c0_120 = arith.constant 0 : index
    %c0_121 = arith.constant 0 : index
    %c0_122 = arith.constant 0 : index
    %149 = vector.load %arg36[%c0_120, %c0_121, %c0_122] : memref<1x32x16xf32, #tpu.memory_space<vmem>>, vector<1x32x16xf32>
    %150 = vector.shape_cast %149 : vector<1x32x16xf32> to vector<32x16xf32>
    %cst_123 = arith.constant dense<0.000000e+00> : vector<32x16xf32>
    %151 = tpu.matmul %148, %150, %cst_123 {dimension_numbers = #tpu.dot_dimension_numbers<[1], [0], [0], [1], [0, 0, 1, 1], [], []>} : vector<32x32xf32>, vector<32x16xf32>, vector<32x16xf32> -> vector<32x16xf32>
    %c0_124 = arith.constant 0 : index
    %c0_125 = arith.constant 0 : index
    %c0_126 = arith.constant 0 : index
    %152 = vector.load %arg37[%c0_124, %c0_125, %c0_126] : memref<1x1x16xf32, #tpu.memory_space<vmem>>, vector<1x1x16xf32>
    %153 = vector.shape_cast %152 : vector<1x1x16xf32> to vector<1x16xf32>
    %154 = vector.broadcast %153 : vector<1x16xf32> to vector<32x16xf32>
    %155 = arith.addf %151, %154 : vector<32x16xf32>
    %c0_127 = arith.constant 0 : index
    %c0_128 = arith.constant 0 : index
    %c0_129 = arith.constant 0 : index
    %156 = vector.load %arg38[%c0_127, %c0_128, %c0_129] : memref<1x32x16xf32, #tpu.memory_space<vmem>>, vector<1x32x16xf32>
    %157 = vector.shape_cast %156 : vector<1x32x16xf32> to vector<32x16xf32>
    %158 = vector.shape_cast %155 : vector<32x16xf32> to vector<1x32x16xf32>
    tpu.vector_store %arg38[%c0_127, %c0_128, %c0_129], %158 {strides = array<i32>} : memref<1x32x16xf32, #tpu.memory_space<vmem>>, vector<1x32x16xf32>,
    return
  }
  func.func @transform_0(%arg0: i32) -> (i32, i32) {
    %c0_i32 = arith.constant 0 : i32
    %c0_i32_0 = arith.constant 0 : i32
    %c0_i32_1 = arith.constant 0 : i32
    return %c0_i32, %c0_i32_0 : i32, i32
  }
  func.func @transform_1(%arg0: i32) -> (i32, i32) {
    %c0_i32 = arith.constant 0 : i32
    %c0_i32_0 = arith.constant 0 : i32
    %c0_i32_1 = arith.constant 0 : i32
    return %c0_i32, %c0_i32_0 : i32, i32
  }
  func.func @transform_2(%arg0: i32) -> (i32, i32) {
    %c0_i32 = arith.constant 0 : i32
    %c0_i32_0 = arith.constant 0 : i32
    %c0_i32_1 = arith.constant 0 : i32
    return %c0_i32, %c0_i32_0 : i32, i32
  }
  func.func @transform_3(%arg0: i32) -> (i32, i32) {
    %c0_i32 = arith.constant 0 : i32
    %c0_i32_0 = arith.constant 0 : i32
    %c0_i32_1 = arith.constant 0 : i32
    return %c0_i32, %c0_i32_0 : i32, i32
  }
  func.func @transform_4(%arg0: i32) -> (i32, i32) {
    %c0_i32 = arith.constant 0 : i32
    %c0_i32_0 = arith.constant 0 : i32
    %c0_i32_1 = arith.constant 0 : i32
    return %c0_i32, %c0_i32_0 : i32, i32
  }
  func.func @transform_5(%arg0: i32) -> (i32, i32) {
    %c0_i32 = arith.constant 0 : i32
    %c0_i32_0 = arith.constant 0 : i32
    %c0_i32_1 = arith.constant 0 : i32
    return %c0_i32, %c0_i32_0 : i32, i32
  }
  func.func @transform_6(%arg0: i32) -> (i32, i32) {
    %c0_i32 = arith.constant 0 : i32
    %c0_i32_0 = arith.constant 0 : i32
    %c0_i32_1 = arith.constant 0 : i32
    return %c0_i32, %c0_i32_0 : i32, i32
  }
  func.func @transform_7(%arg0: i32) -> (i32, i32) {
    %c0_i32 = arith.constant 0 : i32
    %c0_i32_0 = arith.constant 0 : i32
    %c0_i32_1 = arith.constant 0 : i32
    return %c0_i32, %c0_i32_0 : i32, i32
  }
  func.func @transform_8(%arg0: i32) -> (i32, i32) {
    %c0_i32 = arith.constant 0 : i32
    %c0_i32_0 = arith.constant 0 : i32
    %c0_i32_1 = arith.constant 0 : i32
    return %c0_i32, %c0_i32_0 : i32, i32
  }
  func.func @transform_9(%arg0: i32) -> (i32, i32) {
    %c0_i32 = arith.constant 0 : i32
    %c0_i32_0 = arith.constant 0 : i32
    %c0_i32_1 = arith.constant 0 : i32
    return %c0_i32, %c0_i32_0 : i32, i32
  }
  func.func @transform_10(%arg0: i32) -> (i32, i32) {
    %c0_i32 = arith.constant 0 : i32
    %c0_i32_0 = arith.constant 0 : i32
    %c0_i32_1 = arith.constant 0 : i32
    return %c0_i32, %c0_i32_0 : i32, i32
  }
  func.func @transform_11(%arg0: i32) -> (i32, i32) {
    %c0_i32 = arith.constant 0 : i32
    %c0_i32_0 = arith.constant 0 : i32
    %c0_i32_1 = arith.constant 0 : i32
    return %c0_i32, %c0_i32_0 : i32, i32
  }
  func.func @transform_12(%arg0: i32) -> (i32, i32) {
    %c0_i32 = arith.constant 0 : i32
    %c0_i32_0 = arith.constant 0 : i32
    %c0_i32_1 = arith.constant 0 : i32
    return %c0_i32, %c0_i32_0 : i32, i32
  }
  func.func @transform_13(%arg0: i32) -> (i32, i32) {
    %c0_i32 = arith.constant 0 : i32
    %c0_i32_0 = arith.constant 0 : i32
    %c0_i32_1 = arith.constant 0 : i32
    return %c0_i32, %c0_i32_0 : i32, i32
  }
  func.func @transform_14(%arg0: i32) -> (i32, i32, i32) {
    %c0_i32 = arith.constant 0 : i32
    %c0_i32_0 = arith.constant 0 : i32
    %c0_i32_1 = arith.constant 0 : i32
    return %arg0, %c0_i32, %c0_i32_0 : i32, i32, i32
  }
  func.func @transform_15(%arg0: i32) -> (i32, i32, i32) {
    %c0_i32 = arith.constant 0 : i32
    %c0_i32_0 = arith.constant 0 : i32
    %c0_i32_1 = arith.constant 0 : i32
    return %arg0, %c0_i32, %c0_i32_0 : i32, i32, i32
  }
  func.func @transform_16(%arg0: i32) -> (i32, i32, i32) {
    %c0_i32 = arith.constant 0 : i32
    %c0_i32_0 = arith.constant 0 : i32
    %c0_i32_1 = arith.constant 0 : i32
    return %arg0, %c0_i32, %c0_i32_0 : i32, i32, i32
  }
  func.func @transform_17(%arg0: i32) -> (i32, i32, i32) {
    %c0_i32 = arith.constant 0 : i32
    %c0_i32_0 = arith.constant 0 : i32
    %c0_i32_1 = arith.constant 0 : i32
    return %arg0, %c0_i32, %c0_i32_0 : i32, i32, i32
  }
  func.func @transform_18(%arg0: i32) -> (i32, i32, i32) {
    %c0_i32 = arith.constant 0 : i32
    %c0_i32_0 = arith.constant 0 : i32
    %c0_i32_1 = arith.constant 0 : i32
    return %arg0, %c0_i32, %c0_i32_0 : i32, i32, i32
  }
  func.func @transform_19(%arg0: i32) -> (i32, i32, i32) {
    %c0_i32 = arith.constant 0 : i32
    %c0_i32_0 = arith.constant 0 : i32
    %c0_i32_1 = arith.constant 0 : i32
    return %arg0, %c0_i32, %c0_i32_0 : i32, i32, i32
  }
  func.func @transform_20(%arg0: i32) -> (i32, i32, i32) {
    %c0_i32 = arith.constant 0 : i32
    %c0_i32_0 = arith.constant 0 : i32
    %c0_i32_1 = arith.constant 0 : i32
    return %arg0, %c0_i32, %c0_i32_0 : i32, i32, i32
  }
  func.func @transform_21(%arg0: i32) -> (i32, i32, i32) {
    %c0_i32 = arith.constant 0 : i32
    %c0_i32_0 = arith.constant 0 : i32
    %c0_i32_1 = arith.constant 0 : i32
    return %arg0, %c0_i32, %c0_i32_0 : i32, i32, i32
  }
  func.func @transform_22(%arg0: i32) -> (i32, i32, i32) {
    %c0_i32 = arith.constant 0 : i32
    %c0_i32_0 = arith.constant 0 : i32
    %c0_i32_1 = arith.constant 0 : i32
    return %arg0, %c0_i32, %c0_i32_0 : i32, i32, i32
  }
  func.func @transform_23(%arg0: i32) -> (i32, i32, i32) {
    %c0_i32 = arith.constant 0 : i32
    %c0_i32_0 = arith.constant 0 : i32
    %c0_i32_1 = arith.constant 0 : i32
    return %arg0, %c0_i32, %c0_i32_0 : i32, i32, i32
  }
  func.func @transform_24(%arg0: i32) -> (i32, i32, i32) {
    %c0_i32 = arith.constant 0 : i32
    %c0_i32_0 = arith.constant 0 : i32
    %c0_i32_1 = arith.constant 0 : i32
    return %arg0, %c0_i32, %c0_i32_0 : i32, i32, i32
  }
  func.func @transform_25(%arg0: i32) -> (i32, i32, i32) {
    %c0_i32 = arith.constant 0 : i32
    %c0_i32_0 = arith.constant 0 : i32
    %c0_i32_1 = arith.constant 0 : i32
    return %arg0, %c0_i32, %c0_i32_0 : i32, i32, i32
  }
  func.func @transform_26(%arg0: i32) -> (i32, i32, i32) {
    %c0_i32 = arith.constant 0 : i32
    %c0_i32_0 = arith.constant 0 : i32
    %c0_i32_1 = arith.constant 0 : i32
    return %arg0, %c0_i32, %c0_i32_0 : i32, i32, i32
  }
  func.func @transform_27(%arg0: i32) -> (i32, i32, i32) {
    %c0_i32 = arith.constant 0 : i32
    %c0_i32_0 = arith.constant 0 : i32
    %c0_i32_1 = arith.constant 0 : i32
    return %arg0, %c0_i32, %c0_i32_0 : i32, i32, i32
  }
  func.func @transform_28(%arg0: i32) -> (i32, i32, i32) {
    %c0_i32 = arith.constant 0 : i32
    %c0_i32_0 = arith.constant 0 : i32
    %c0_i32_1 = arith.constant 0 : i32
    return %arg0, %c0_i32, %c0_i32_0 : i32, i32, i32
  }
  func.func @transform_29(%arg0: i32) -> (i32, i32, i32) {
    %c0_i32 = arith.constant 0 : i32
    %c0_i32_0 = arith.constant 0 : i32
    %c0_i32_1 = arith.constant 0 : i32
    return %arg0, %c0_i32, %c0_i32_0 : i32, i32, i32
  }
  func.func @transform_30(%arg0: i32) -> (i32, i32, i32) {
    %c0_i32 = arith.constant 0 : i32
    %c0_i32_0 = arith.constant 0 : i32
    %c0_i32_1 = arith.constant 0 : i32
    return %arg0, %c0_i32, %c0_i32_0 : i32, i32, i32
  }
  func.func @transform_31(%arg0: i32) -> (i32, i32, i32) {
    %c0_i32 = arith.constant 0 : i32
    %c0_i32_0 = arith.constant 0 : i32
    %c0_i32_1 = arith.constant 0 : i32
    return %arg0, %c0_i32, %c0_i32_0 : i32, i32, i32
  }
  func.func @transform_32(%arg0: i32) -> (i32, i32, i32) {
    %c0_i32 = arith.constant 0 : i32
    %c0_i32_0 = arith.constant 0 : i32
    %c0_i32_1 = arith.constant 0 : i32
    return %arg0, %c0_i32, %c0_i32_0 : i32, i32, i32
  }
  func.func @transform_33(%arg0: i32) -> (i32, i32, i32) {
    %c0_i32 = arith.constant 0 : i32
    %c0_i32_0 = arith.constant 0 : i32
    %c0_i32_1 = arith.constant 0 : i32
    return %arg0, %c0_i32, %c0_i32_0 : i32, i32, i32
  }
  func.func @transform_34(%arg0: i32) -> (i32, i32, i32) {
    %c0_i32 = arith.constant 0 : i32
    %c0_i32_0 = arith.constant 0 : i32
    %c0_i32_1 = arith.constant 0 : i32
    return %arg0, %c0_i32, %c0_i32_0 : i32, i32, i32
  }
  func.func @transform_35(%arg0: i32) -> (i32, i32, i32) {
    %c0_i32 = arith.constant 0 : i32
    %c0_i32_0 = arith.constant 0 : i32
    %c0_i32_1 = arith.constant 0 : i32
    return %arg0, %c0_i32, %c0_i32_0 : i32, i32, i32
  }
  func.func @transform_36(%arg0: i32) -> (i32, i32, i32) {
    %c0_i32 = arith.constant 0 : i32
    %c0_i32_0 = arith.constant 0 : i32
    %c0_i32_1 = arith.constant 0 : i32
    return %arg0, %c0_i32, %c0_i32_0 : i32, i32, i32
  }
  func.func @transform_37(%arg0: i32) -> (i32, i32, i32) {
    %c0_i32 = arith.constant 0 : i32
    %c0_i32_0 = arith.constant 0 : i32
    %c0_i32_1 = arith.constant 0 : i32
    return %arg0, %c0_i32, %c0_i32_0 : i32, i32, i32
  }
}

module attributes {stable_mosaic.version = 11 : i64} {
  func.func @_matmul_kernel(%arg0: memref<32x4xf32, #tpu.memory_space<vmem>>, %arg1: memref<4x384xf32, #tpu.memory_space<vmem>>, %arg2: memref<32x384xf32, #tpu.memory_space<vmem>>) attributes {dimension_semantics = [], scalar_prefetch = 0 : i64, scratch_operands = 0 : i64, tpu.core_type = #tpu.core_type<tc>} {
    %c0 = arith.constant 0 : index
    %c0_0 = arith.constant 0 : index
    %0 = vector.load %arg0[%c0, %c0_0] : memref<32x4xf32, #tpu.memory_space<vmem>>, vector<32x4xf32>
    %c0_1 = arith.constant 0 : index
    %c0_2 = arith.constant 0 : index
    %1 = vector.load %arg1[%c0_1, %c0_2] : memref<4x384xf32, #tpu.memory_space<vmem>>, vector<4x384xf32>
    %cst = arith.constant dense<0.000000e+00> : vector<32x384xf32>
    %2 = tpu.matmul %0, %1, %cst {dimension_numbers = #tpu.dot_dimension_numbers<[1], [0], [0], [1], [0, 0, 1, 1], [], []>} : vector<32x4xf32>, vector<4x384xf32>, vector<32x384xf32> -> vector<32x384xf32>
    %c0_3 = arith.constant 0 : index
    %c0_4 = arith.constant 0 : index
    %3 = vector.load %arg2[%c0_3, %c0_4] : memref<32x384xf32, #tpu.memory_space<vmem>>, vector<32x384xf32>
    tpu.vector_store %arg2[%c0_3, %c0_4], %2 {strides = array<i32>} : memref<32x384xf32, #tpu.memory_space<vmem>>, vector<32x384xf32>,
    return
  }
}

module attributes {stable_mosaic.version = 11 : i64} {
  func.func @_matmul_kernel(%arg0: memref<32x4xf32, #tpu.memory_space<vmem>>, %arg1: memref<4x3072xf32, #tpu.memory_space<vmem>>, %arg2: memref<32x3072xf32, #tpu.memory_space<vmem>>) attributes {dimension_semantics = [], scalar_prefetch = 0 : i64, scratch_operands = 0 : i64, tpu.core_type = #tpu.core_type<tc>} {
    %c0 = arith.constant 0 : index
    %c0_0 = arith.constant 0 : index
    %0 = vector.load %arg0[%c0, %c0_0] : memref<32x4xf32, #tpu.memory_space<vmem>>, vector<32x4xf32>
    %c0_1 = arith.constant 0 : index
    %c0_2 = arith.constant 0 : index
    %1 = vector.load %arg1[%c0_1, %c0_2] : memref<4x3072xf32, #tpu.memory_space<vmem>>, vector<4x3072xf32>
    %cst = arith.constant dense<0.000000e+00> : vector<32x3072xf32>
    %2 = tpu.matmul %0, %1, %cst {dimension_numbers = #tpu.dot_dimension_numbers<[1], [0], [0], [1], [0, 0, 1, 1], [], []>} : vector<32x4xf32>, vector<4x3072xf32>, vector<32x3072xf32> -> vector<32x3072xf32>
    %c0_3 = arith.constant 0 : index
    %c0_4 = arith.constant 0 : index
    %3 = vector.load %arg2[%c0_3, %c0_4] : memref<32x3072xf32, #tpu.memory_space<vmem>>, vector<32x3072xf32>
    tpu.vector_store %arg2[%c0_3, %c0_4], %2 {strides = array<i32>} : memref<32x3072xf32, #tpu.memory_space<vmem>>, vector<32x3072xf32>,
    return
  }
}

module attributes {stable_mosaic.version = 11 : i64} {
  func.func @_l2norm_kernel(%arg0: memref<2x3x1024xf32, #tpu.memory_space<vmem>>, %arg1: memref<2x3x1024xf32, #tpu.memory_space<vmem>>) attributes {dimension_semantics = [], scalar_prefetch = 0 : i64, scratch_operands = 0 : i64, tpu.core_type = #tpu.core_type<tc>} {
    %c0 = arith.constant 0 : index
    %c0_0 = arith.constant 0 : index
    %c0_1 = arith.constant 0 : index
    %0 = vector.load %arg0[%c0, %c0_0, %c0_1] : memref<2x3x1024xf32, #tpu.memory_space<vmem>>, vector<2x3x1024xf32>
    %1 = arith.mulf %0, %0 : vector<2x3x1024xf32>
    %cst = arith.constant dense<0.000000e+00> : vector<2x1024xf32>
    %2 = vector.multi_reduction <add>, %1, %cst [1] : vector<2x3x1024xf32> to vector<2x1024xf32>
    %3 = vector.shape_cast %2 : vector<2x1024xf32> to vector<2x1x1024xf32>
    %cst_2 = arith.constant 9.99999996E-13 : f32
    %4 = vector.broadcast %cst_2 : f32 to vector<2x1x1024xf32>
    %5 = arith.addf %3, %4 : vector<2x1x1024xf32>
    %6 = math.rsqrt %5 : vector<2x1x1024xf32>
    %7 = vector.broadcast %6 : vector<2x1x1024xf32> to vector<2x3x1024xf32>
    %8 = arith.mulf %0, %7 : vector<2x3x1024xf32>
    %c0_3 = arith.constant 0 : index
    %c0_4 = arith.constant 0 : index
    %c0_5 = arith.constant 0 : index
    %9 = vector.load %arg1[%c0_3, %c0_4, %c0_5] : memref<2x3x1024xf32, #tpu.memory_space<vmem>>, vector<2x3x1024xf32>
    tpu.vector_store %arg1[%c0_3, %c0_4, %c0_5], %8 {strides = array<i32>} : memref<2x3x1024xf32, #tpu.memory_space<vmem>>, vector<2x3x1024xf32>,
    return
  }
}

</mosaic_0001>

<bundles_post_ra>
// kernel: forward.5
= control target key start
LH: loop header
LB: loop body
LE: loop exit
PB: predicated region body
PF: predicated region fallthrough
CT: control target
= control target key end

     0   :  { %s4159_s0 = inlined_call_operand.vmem [shape: f32[512,27], index: 0, kind: input, shape index: {}]   ;;  %s4160_s1 = inlined_call_operand.vmem [shape: f32[27,16], index: 1, kind: input, shape index: {}]   ;;  %s4161_s2 = inlined_call_operand.vmem [shape: f32[1,16], index: 2, kind: input, shape index: {}]   ;;  %s4162_s3 = inlined_call_operand.vmem [shape: f32[16,16], index: 3, kind: input, shape index: {}]   ;;  %s4163_s4 = inlined_call_operand.hbm [shape: f32[1,16], index: 4, kind: input, shape index: {}]   ;;  %s4164_s5 = inlined_call_operand.vmem [shape: f32[16,16], index: 5, kind: input, shape index: {}]   ;;  %s4165_s6 = inlined_call_operand.hbm [shape: f32[1,16], index: 6, kind: input, shape index: {}]   ;;  %s4166_s7 = inlined_call_operand.vmem [shape: f32[16,32], index: 7, kind: input, shape index: {}]   ;;  %s4167_s8 = inlined_call_operand.hbm [shape: f32[1,32], index: 8, kind: input, shape index: {}]   ;;  %s4168_s9 = inlined_call_operand.vmem [shape: f32[32,32], index: 9, kind: input, shape index: {}]   ;;  %s4169_s10 = inlined_call_operand.hbm [shape: f32[1,32], index: 10, kind: input, shape index: {}]   ;;  %s4170_s11 = inlined_call_operand.vmem [shape: f32[32,64], index: 11, kind: input, shape index: {}]   ;;  %s4171_s12 = inlined_call_operand.hbm [shape: f32[1,64], index: 12, kind: input, shape index: {}]   ;;  %s4172_s13 = inlined_call_operand.vmem [shape: f32[64,64], index: 13, kind: input, shape index: {}]   ;;  %s4173_s14 = inlined_call_operand.hbm [shape: f32[1,64], index: 14, kind: input, shape index: {}]   ;;  %s4174_s15 = inlined_call_operand.vmem [shape: f32[64,128], index: 15, kind: input, shape index: {}]   ;;  %s4175_s16 = inlined_call_operand.hbm [shape: f32[1,128], index: 16, kind: input, shape index: {}]   ;;  %s4176_s17 = inlined_call_operand.vmem [shape: f32[128,128], index: 17, kind: input, shape index: {}]   ;;  %s4177_s18 = inlined_call_operand.hbm [shape: f32[1,128], index: 18, kind: input, shape index: {}]   ;;  %s4178_s19 = inlined_call_operand.vmem [shape: f32[128,16], index: 19, kind: output, shape index: {0}]   ;;  %s4179_s20 = inlined_call_operand.vmem [shape: f32[128,16], index: 20, kind: output, shape index: {1}]   ;;  %s4180_s21 = inlined_call_operand.vmem [shape: f32[32,32], index: 21, kind: output, shape index: {2}]   ;;  %s4181_s22 = inlined_call_operand.vmem [shape: f32[32,32], index: 22, kind: output, shape index: {3}]   ;;  %s4182_s23 = inlined_call_operand.vmem [shape: f32[32,64], index: 23, kind: output, shape index: {4}]   ;;  %s4183_s24 = inlined_call_operand.vmem [shape: f32[32,64], index: 24, kind: output, shape index: {5}]   ;;  %s4184_s25 = inlined_call_operand.vmem [shape: f32[32,128], index: 25, kind: output, shape index: {6}]   ;;  %s4185_s26 = inlined_call_operand.vmem [shape: f32[32,128], index: 26, kind: output, shape index: {7}]  }
   0x1   :  { %4196 = sst [smem:[#allocation20_spill]] %s4159_s0 }
   0x2   :  { %4197 = sst [smem:[#allocation21_spill]] %s4160_s1 }
   0x3   :  { %4198 = sst [smem:[#allocation22_spill]] %s4161_s2 }
   0x4   :  { %4199 = sst [smem:[#allocation23_spill]] %s4162_s3 }
   0x5   :  { %4200 = sst [smem:[#allocation24_spill]] %s4163_s4 }
   0x6   :  { %4201 = sst [smem:[#allocation25_spill]] %s4164_s5 }
   0x7   :  { %4202 = sst [smem:[#allocation26_spill]] %s4165_s6 }
   0x8   :  { %4203 = sst [smem:[#allocation27_spill]] %s4166_s7 }
   0x9   :  { %4204 = sst [smem:[#allocation28_spill]] %s4167_s8 }
   0xa   :  { %4205 = sst [smem:[#allocation29_spill]] %s4168_s9 }
   0xb   :  { %4206 = sst [smem:[#allocation30_spill]] %s4169_s10 }
   0xc   :  { %32 = vsyncpa [#allocation3], 0 }
   0xd   :  { %33 = vsyncpa [#allocation5], 0 }
   0xe   :  { %34 = vsyncpa [#allocation8], 0 }
   0xf   :  { %35 = vsyncpa [#allocation11], 0 }
  0x10   :  { %36 = vsyncpa [#allocation14], 0  ;;  %s3019_s27 = smov [#allocation4]   ;;  %s3020_s7 = smov [#allocation7]  }
  0x11   :  { %s63_s3 = sshll.u32 %s3019_s27, 4  ;;  %s87_s28 = sshll.u32 %s3020_s7, 4  ;;  %s64_s3 = int_to_ptr.vmem [resolvable:$true] %s63_s3  ;;  %s88_s28 = int_to_ptr.vmem [resolvable:$true] %s87_s28 }
  0x12   :  { %s4207_s29 = sld [smem:[#allocation26_spill]] }
  0x18   :  { %s2833_s0 = scalar_lea.hbm %s4207_s29, 16 }
  0x19   :  { %p2834_p0 = scmp.ne.s32.totalorder %s4207_s29, %s2833_s0  ;;  %p2837_p1 = scmp.lt.u32.totalorder %s2833_s0, %s4207_s29 }
  0x1b   :  { %p2839_p2 = pnand %p2837_p1, %p2834_p0 }
  0x1d   :  { %2842 = shalt.err (!%p2839_p2)
}
  0x1e   :  { %s2843_s10 = scalar_lea.vmem %s64_s3, 16  ;;  %s2847_s6 = scalar_lea.vmem %s64_s3, 32 }
  0x1f   :  { %p2844_p3 = scmp.ne.s32.totalorder %s64_s3, %s2843_s10  ;;  %p2848_p4 = scmp.lt.s32.totalorder %s64_s3, %s64_s3 }
  0x20   :  { %p2849_p5 = scmp.lt.s32.totalorder %s2847_s6, %s2843_s10 }
  0x22   :  { %p2850_p6 = por %p2849_p5, %p2848_p4 }
  0x24   :  { %p2851_p7 = pnand %p2850_p6, %p2844_p3 }
  0x26   :  { %2854 = shalt.err (!%p2851_p7)
}
  0x27   :  { %66 = dma.hbm_to_vmem [thread:$0]  %s4207_s29, 16, %s64_s3, [#allocation5]  }
  0x28   :  { %s4208_s4 = sld [smem:[#allocation30_spill]] }
  0x2e   :  { %s2855_s9 = scalar_lea.hbm %s4208_s4, 16 }
  0x2f   :  { %p2856_p8 = scmp.ne.s32.totalorder %s4208_s4, %s2855_s9  ;;  %p2859_p9 = scmp.lt.u32.totalorder %s2855_s9, %s4208_s4 }
  0x31   :  { %p2861_p10 = pnand %p2859_p9, %p2856_p8 }
  0x33   :  { %2864 = shalt.err (!%p2861_p10)
}
  0x34   :  { %s2865_s10 = scalar_lea.vmem %s88_s28, 16  ;;  %s2869_s6 = scalar_lea.vmem %s88_s28, 32 }
  0x35   :  { %p2866_p11 = scmp.ne.s32.totalorder %s88_s28, %s2865_s10  ;;  %p2870_p12 = scmp.lt.s32.totalorder %s88_s28, %s88_s28 }
  0x36   :  { %p2871_p13 = scmp.lt.s32.totalorder %s2869_s6, %s2865_s10 }
  0x38   :  { %p2872_p0 = por %p2871_p13, %p2870_p12 }
  0x3a   :  { %p2873_p1 = pnand %p2872_p0, %p2866_p11 }
  0x3c   :  { %2876 = shalt.err (!%p2873_p1)
}
  0x3d   :  { %90 = dma.hbm_to_vmem [thread:$0]  %s4208_s4, 16, %s88_s28, [#allocation8]  }
  0x3e   :  { %s3021_s1 = smov [#allocation10]   ;;  %s3022_s7 = smov [#allocation2]  }
  0x3f   :  { %s111_s27 = sshll.u32 %s3021_s1, 4  ;;  %s51_s8 = sshll.u32 %s3022_s7, 4  ;;  %s112_s27 = int_to_ptr.vmem [resolvable:$true] %s111_s27  ;;  %s52_s8 = int_to_ptr.vmem [resolvable:$true] %s51_s8 }
  0x40   :  { %s2877_s0 = scalar_lea.hbm %s4173_s14, 16 }
  0x41   :  { %p2878_p2 = scmp.ne.s32.totalorder %s4173_s14, %s2877_s0  ;;  %p2881_p3 = scmp.lt.u32.totalorder %s2877_s0, %s4173_s14 }
  0x43   :  { %p2883_p4 = pnand %p2881_p3, %p2878_p2 }
  0x45   :  { %2886 = shalt.err (!%p2883_p4)
}
  0x46   :  { %s2887_s28 = scalar_lea.vmem %s112_s27, 16  ;;  %s2891_s4 = scalar_lea.vmem %s112_s27, 32 }
  0x47   :  { %p2888_p5 = scmp.ne.s32.totalorder %s112_s27, %s2887_s28  ;;  %p2892_p6 = scmp.lt.s32.totalorder %s112_s27, %s112_s27 }
  0x48   :  { %p2893_p7 = scmp.lt.s32.totalorder %s2891_s4, %s2887_s28 }
  0x4a   :  { %p2894_p8 = por %p2893_p7, %p2892_p6 }
  0x4c   :  { %p2895_p9 = pnand %p2894_p8, %p2888_p5 }
  0x4e   :  { %2898 = shalt.err (!%p2895_p9)
}
  0x4f   :  { %114 = dma.hbm_to_vmem [thread:$0]  %s4173_s14, 16, %s112_s27, [#allocation11]  }
  0x50   :  { %s4209_s9 = sld [smem:[#allocation24_spill]] }
  0x56   :  { %s2899_s30 = scalar_lea.hbm %s4209_s9, 16 }
  0x57   :  { %p2900_p10 = scmp.ne.s32.totalorder %s4209_s9, %s2899_s30  ;;  %p2903_p11 = scmp.lt.u32.totalorder %s2899_s30, %s4209_s9 }
  0x59   :  { %p2905_p12 = pnand %p2903_p11, %p2900_p10 }
  0x5b   :  { %2908 = shalt.err (!%p2905_p12)
}
  0x5c   :  { %s2909_s6 = scalar_lea.vmem %s52_s8, 16  ;;  %s2913_s28 = scalar_lea.vmem %s52_s8, 32 }
  0x5d   :  { %p2910_p13 = scmp.ne.s32.totalorder %s52_s8, %s2909_s6  ;;  %p2914_p0 = scmp.lt.s32.totalorder %s52_s8, %s52_s8 }
  0x5e   :  { %p2915_p1 = scmp.lt.s32.totalorder %s2913_s28, %s2909_s6 }
  0x60   :  { %p2916_p2 = por %p2915_p1, %p2914_p0 }
  0x62   :  { %p2917_p3 = pnand %p2916_p2, %p2910_p13 }
  0x64   :  { %2920 = shalt.err (!%p2917_p3)
}
  0x65   :  { %54 = dma.hbm_to_vmem [thread:$0]  %s4209_s9, 16, %s52_s8, [#allocation3]  }
  0x66   :  { %s3023_s4 = smov [#allocation6]   ;;  %s3024_s29 = smov [#allocation9]  }
  0x67   :  { %s75_s3 = sshll.u32 %s3023_s4, 4  ;;  %s99_s1 = sshll.u32 %s3024_s29, 4  ;;  %s76_s3 = int_to_ptr.vmem [resolvable:$true] %s75_s3  ;;  %s100_s1 = int_to_ptr.vmem [resolvable:$true] %s99_s1 }
  0x68   :  { %s4210_s2 = sld [smem:[#allocation28_spill]] }
  0x6e   :  { %s2921_s0 = scalar_lea.hbm %s4210_s2, 16 }
  0x6f   :  { %p2922_p4 = scmp.ne.s32.totalorder %s4210_s2, %s2921_s0  ;;  %p2925_p5 = scmp.lt.u32.totalorder %s2921_s0, %s4210_s2 }
  0x71   :  { %p2927_p6 = pnand %p2925_p5, %p2922_p4 }
  0x73   :  { %2930 = shalt.err (!%p2927_p6)
}
  0x74   :  { %s2931_s8 = scalar_lea.vmem %s76_s3, 16  ;;  %s2935_s9 = scalar_lea.vmem %s76_s3, 32 }
  0x75   :  { %p2932_p7 = scmp.ne.s32.totalorder %s76_s3, %s2931_s8  ;;  %p2936_p8 = scmp.lt.s32.totalorder %s76_s3, %s76_s3 }
  0x76   :  { %p2937_p9 = scmp.lt.s32.totalorder %s2935_s9, %s2931_s8 }
  0x78   :  { %p2938_p10 = por %p2937_p9, %p2936_p8 }
  0x7a   :  { %p2939_p11 = pnand %p2938_p10, %p2932_p7 }
  0x7c   :  { %2942 = shalt.err (!%p2939_p11)
}
  0x7d   :  { %78 = dma.hbm_to_vmem [thread:$0]  %s4210_s2, 16, %s76_s3, [#allocation5]  }
  0x7e   :  { %s2943_s7 = scalar_lea.hbm %s4171_s12, 16 }
  0x7f   :  { %p2944_p12 = scmp.ne.s32.totalorder %s4171_s12, %s2943_s7  ;;  %p2947_p13 = scmp.lt.u32.totalorder %s2943_s7, %s4171_s12 }
  0x81   :  { %p2949_p0 = pnand %p2947_p13, %p2944_p12 }
  0x83   :  { %2952 = shalt.err (!%p2949_p0)
}
  0x84   :  { %s2953_s6 = scalar_lea.vmem %s100_s1, 16  ;;  %s2957_s28 = scalar_lea.vmem %s100_s1, 32 }
  0x85   :  { %p2954_p1 = scmp.ne.s32.totalorder %s100_s1, %s2953_s6  ;;  %p2958_p2 = scmp.lt.s32.totalorder %s100_s1, %s100_s1 }
  0x86   :  { %p2959_p3 = scmp.lt.s32.totalorder %s2957_s28, %s2953_s6 }
  0x88   :  { %p2960_p4 = por %p2959_p3, %p2958_p2 }
  0x8a   :  { %p2961_p5 = pnand %p2960_p4, %p2954_p1 }
  0x8c   :  { %2964 = shalt.err (!%p2961_p5)
}
  0x8d   :  { %102 = dma.hbm_to_vmem [thread:$0]  %s4171_s12, 16, %s100_s1, [#allocation8]  }
  0x8e   :  { %s3025_s8 = smov [#allocation12]   ;;  %s3026_s14 = smov [#allocation13]  }
  0x8f   :  { %s123_s9 = sshll.u32 %s3025_s8, 4  ;;  %s135_s27 = sshll.u32 %s3026_s14, 4  ;;  %s124_s9 = int_to_ptr.vmem [resolvable:$true] %s123_s9  ;;  %s136_s27 = int_to_ptr.vmem [resolvable:$true] %s135_s27 }
  0x90   :  { %s2965_s7 = scalar_lea.hbm %s4175_s16, 16 }
  0x91   :  { %p2966_p6 = scmp.ne.s32.totalorder %s4175_s16, %s2965_s7  ;;  %p2969_p7 = scmp.lt.u32.totalorder %s2965_s7, %s4175_s16 }
  0x93   :  { %p2971_p8 = pnand %p2969_p7, %p2966_p6 }
  0x95   :  { %2974 = shalt.err (!%p2971_p8)
}
  0x96   :  { %s2975_s12 = scalar_lea.vmem %s124_s9, 16  ;;  %s2979_s1 = scalar_lea.vmem %s124_s9, 32 }
  0x97   :  { %p2976_p9 = scmp.ne.s32.totalorder %s124_s9, %s2975_s12  ;;  %p2980_p10 = scmp.lt.s32.totalorder %s124_s9, %s124_s9 }
  0x98   :  { %p2981_p11 = scmp.lt.s32.totalorder %s2979_s1, %s2975_s12 }
  0x9a   :  { %p2982_p12 = por %p2981_p11, %p2980_p10 }
  0x9c   :  { %p2983_p13 = pnand %p2982_p12, %p2976_p9 }
  0x9e   :  { %2986 = shalt.err (!%p2983_p13)
}
  0x9f   :  { %126 = dma.hbm_to_vmem [thread:$0]  %s4175_s16, 16, %s124_s9, [#allocation11]  }
  0xa0   :  { %s2987_s8 = scalar_lea.hbm %s4177_s18, 16 }
  0xa1   :  { %p2988_p0 = scmp.ne.s32.totalorder %s4177_s18, %s2987_s8  ;;  %p2991_p1 = scmp.lt.u32.totalorder %s2987_s8, %s4177_s18 }
  0xa3   :  { %p2993_p2 = pnand %p2991_p1, %p2988_p0 }
  0xa5   :  { %2996 = shalt.err (!%p2993_p2)
}
  0xa6   :  { %s2997_s30 = scalar_lea.vmem %s136_s27, 16  ;;  %s3001_s0 = scalar_lea.vmem %s136_s27, 32 }
  0xa7   :  { %p2998_p3 = scmp.ne.s32.totalorder %s136_s27, %s2997_s30  ;;  %p3002_p4 = scmp.lt.s32.totalorder %s136_s27, %s136_s27 }
  0xa8   :  { %p3003_p5 = scmp.lt.s32.totalorder %s3001_s0, %s2997_s30 }
  0xaa   :  { %p3004_p6 = por %p3003_p5, %p3002_p4 }
  0xac   :  { %p3005_p7 = pnand %p3004_p6, %p2998_p3 }
  0xae   :  { %3008 = shalt.err (!%p3005_p7)
}
  0xaf   :  { %138 = dma.hbm_to_vmem [thread:$0]  %s4177_s18, 16, %s136_s27, [#allocation14]  }
  0xb0   :  { %3009 = dma.done.wait [#allocation3], 16  }
  0xb1   :  { %3010 = vsyncadd [#allocation3], 4294967280 }
  0xb2   :  { %3011 = dma.done.wait [#allocation5], 32  }
  0xb3   :  { %3012 = vsyncadd [#allocation5], 4294967264 }
  0xb4   :  { %3013 = dma.done.wait [#allocation8], 32  }
  0xb5   :  { %3014 = vsyncadd [#allocation8], 4294967264 }
  0xb6   :  { %3015 = dma.done.wait [#allocation11], 32  }
  0xb7   :  { %3016 = vsyncadd [#allocation11], 4294967264 }
  0xb8   :  { %3017 = dma.done.wait [#allocation14], 16  }
  0xb9   :  { %3018 = vsyncadd [#allocation14], 4294967280  ;;  %vm431_vm0 = vcmask 1042432   ;;  %vm238_vm1 = vcmask 220160   ;;  %s4211_s12 = sld [smem:[#allocation21_spill]]  ;;  %s4212_s14 = sld [smem:[#allocation20_spill]] }
  0xba   :  { %vm3027_vm2 = vmmov 1   ;;  %s4213_s7 = sld [smem:[#allocation23_spill]]  ;;  %s4214_s9 = sld [smem:[#allocation25_spill]]  ;;  %vm941_vm4 = vcmask 130048   ;;  %vm1490_vm5 = vcmask 261120   ;;  %vm1719_vm6 = vcmask 523264  }
  0xbb   :  { %vm2723_vm3 = vmpackc.low %vm431_vm0, %vm3027_vm2  ;;  %s4215_s6 = sld [smem:[#allocation22_spill]]  ;;  %s4216_s28 = sld [smem:[#allocation27_spill]] }
  0xbc   :  { %s4217_s27 = sld [smem:[#allocation29_spill]] }
  0xbf   :  { %v227_v0 = vld [vmem:[%s4211_s12] sm:$0xff]  ;;  %v228_v1 = vld [vmem:[%s4211_s12 + $0x8] sm:$0xff]  ;;  %v229_v2 = vld [vmem:[%s4211_s12 + $0x10] sm:$0xff] }
  0xc0   :  { %v2718_v3 = vpack.c.bf16 %v228_v1, %v227_v0  ;;  %v230_v4 = vld [vmem:[%s4211_s12 + $0x18] sm:$0x7]  ;;  %v163_v5 = vld [vmem:[%s4212_s14] sm:$0xff]  ;;  %v164_v7 = vld [vmem:[%s4212_s14 + $0x8] sm:$0xff] }
  0xc1   :  { %v2722_v6 = vpack.c.bf16 %v230_v4, %v229_v2  ;;  %2446 = vmatprep.mubr.msk.f32.mxu0 %vm238_vm1, %v163_v5  ;;  %v165_v8 = vld [vmem:[%s4212_s14 + $0x10] sm:$0xff]  ;;  %v166_v9 = vld [vmem:[%s4212_s14 + $0x18] sm:$0xff]  ;;  %v167_v10 = vld [vmem:[%s4212_s14 + $0x20] sm:$0xff] }
  0xc2   :  { %2719 = vmatprep.subr.bf16.mxu0 %v2718_v3  ;;  %2820 = vmatprep.subr.bf16.mxu1 %v2718_v3  ;;  %v168_v11 = vld [vmem:[%s4212_s14 + $0x28] sm:$0xff]  ;;  %v223_v12 = vld [vmem:[%s4212_s14 + $0x1e0] sm:$0xff]  ;;  %v169_v13 = vld [vmem:[%s4212_s14 + $0x30] sm:$0xff] }
  0xc3   :  { %2721 = vmatpush3.bf16.msra.mxu0 %v2718_v3  ;;  %2822 = vmatpush3.bf16.msra.mxu1 %v2718_v3  ;;  %v224_v14 = vld [vmem:[%s4212_s14 + $0x1e8] sm:$0xff]  ;;  %v225_v15 = vld [vmem:[%s4212_s14 + $0x1f0] sm:$0xff]  ;;  %v226_v16 = vld [vmem:[%s4212_s14 + $0x1f8] sm:$0xff] }
  0xc4   :  { %2724 = vmatprep.subr.msk.bf16.mxu0 %vm2723_vm3, %v2722_v6  ;;  %2821 = vmatprep.subr.msk.bf16.mxu1 %vm2723_vm3, %v2722_v6  ;;  %v170_v17 = vld [vmem:[%s4212_s14 + $0x38] sm:$0xff]  ;;  %v171_v18 = vld [vmem:[%s4212_s14 + $0x40] sm:$0xff]  ;;  %v172_v19 = vld [vmem:[%s4212_s14 + $0x48] sm:$0xff] }
  0xc5   :  { %2536 = vmatprep.mubr.msk.f32.mxu1 %vm238_vm1, %v223_v12  ;;  %v173_v20 = vld [vmem:[%s4212_s14 + $0x50] sm:$0xff]  ;;  %v174_v21 = vld [vmem:[%s4212_s14 + $0x58] sm:$0xff]  ;;  %v175_v22 = vld [vmem:[%s4212_s14 + $0x60] sm:$0xff] }
  0xc6   :  { %v176_v23 = vld [vmem:[%s4212_s14 + $0x68] sm:$0xff]  ;;  %v177_v24 = vld [vmem:[%s4212_s14 + $0x70] sm:$0xff]  ;;  %v178_v25 = vld [vmem:[%s4212_s14 + $0x78] sm:$0xff] }
  0xc7   :  { %2727 = vmatpush3.bf16.msk.msra.mxu0 %vm2723_vm3, %v2722_v6  ;;  %2823 = vmatpush3.bf16.msk.msra.mxu1 %vm2723_vm3, %v2722_v6  ;;  %v179_v26 = vld [vmem:[%s4212_s14 + $0x80] sm:$0xff]  ;;  %v180_v27 = vld [vmem:[%s4212_s14 + $0x88] sm:$0xff]  ;;  %v181_v28 = vld [vmem:[%s4212_s14 + $0x90] sm:$0xff] }
  0xc8   :  { %v182_v29 = vld [vmem:[%s4212_s14 + $0x98] sm:$0xff]  ;;  %v183_v30 = vld [vmem:[%s4212_s14 + $0xa0] sm:$0xff]  ;;  %v184_v31 = vld [vmem:[%s4212_s14 + $0xa8] sm:$0xff] }
  0xc9   :  { %v185_v32 = vld [vmem:[%s4212_s14 + $0xb0] sm:$0xff]  ;;  %v186_v33 = vld [vmem:[%s4212_s14 + $0xb8] sm:$0xff]  ;;  %v187_v34 = vld [vmem:[%s4212_s14 + $0xc0] sm:$0xff] }
  0xca   :  { %2447 = vmatmul.mubr.msk.f32.vlgmr.msra.gmra.mrb[0].mxu0 %vm238_vm1, %v164_v7  ;;  %2537 = vmatmul.mubr.msk.f32.vlgmr.msra.gmra.mrb[0].mxu1 %vm238_vm1, %v224_v14  ;;  %v188_v35 = vld [vmem:[%s4212_s14 + $0xc8] sm:$0xff]  ;;  %v189_v36 = vld [vmem:[%s4212_s14 + $0xd0] sm:$0xff]  ;;  %v190_v37 = vld [vmem:[%s4212_s14 + $0xd8] sm:$0xff] }
  0xcb   :  { %2449 = vmatprep.mubr.msk.f32.mxu0 %vm238_vm1, %v165_v8  ;;  %2539 = vmatprep.mubr.msk.f32.mxu1 %vm238_vm1, %v225_v15  ;;  %v191_v38 = vld [vmem:[%s4212_s14 + $0xe0] sm:$0xff]  ;;  %v192_v39 = vld [vmem:[%s4212_s14 + $0xe8] sm:$0xff]  ;;  %v193_v40 = vld [vmem:[%s4212_s14 + $0xf0] sm:$0xff] }
  0xcc   :  { %v194_v41 = vld [vmem:[%s4212_s14 + $0xf8] sm:$0xff]  ;;  %v195_v42 = vld [vmem:[%s4212_s14 + $0x100] sm:$0xff]  ;;  %v196_v43 = vld [vmem:[%s4212_s14 + $0x108] sm:$0xff] }
  0xcd   :  { %v197_v44 = vld [vmem:[%s4212_s14 + $0x110] sm:$0xff]  ;;  %v198_v45 = vld [vmem:[%s4212_s14 + $0x118] sm:$0xff]  ;;  %v199_v46 = vld [vmem:[%s4212_s14 + $0x120] sm:$0xff] }
  0xce   :  { %2450 = vmatmul.mubr.msk.f32.gmra.mrb[2].mxu0 %vm238_vm1, %v166_v9  ;;  %2540 = vmatmul.mubr.msk.f32.gmra.mrb[2].mxu1 %vm238_vm1, %v226_v16  ;;  %v200_v47 = vld [vmem:[%s4212_s14 + $0x128] sm:$0xff]  ;;  %v201_v48 = vld [vmem:[%s4212_s14 + $0x130] sm:$0xff]  ;;  %v202_v49 = vld [vmem:[%s4212_s14 + $0x138] sm:$0xff] }
  0xcf   :  { %2452 = vmatprep.mubr.msk.f32.mxu0 %vm238_vm1, %v167_v10  ;;  %v203_v50 = vld [vmem:[%s4212_s14 + $0x140] sm:$0xff]  ;;  %v204_v51 = vld [vmem:[%s4212_s14 + $0x148] sm:$0xff]  ;;  %v205_v52 = vld [vmem:[%s4212_s14 + $0x150] sm:$0xff] }
  0xd0   :  { %v206_v53 = vld [vmem:[%s4212_s14 + $0x158] sm:$0xff]  ;;  %v207_v54 = vld [vmem:[%s4212_s14 + $0x160] sm:$0xff]  ;;  %v208_v55 = vld [vmem:[%s4212_s14 + $0x168] sm:$0xff] }
  0xd1   :  { %v209_v56 = vld [vmem:[%s4212_s14 + $0x170] sm:$0xff]  ;;  %v210_v57 = vld [vmem:[%s4212_s14 + $0x178] sm:$0xff]  ;;  %v211_v58 = vld [vmem:[%s4212_s14 + $0x180] sm:$0xff] }
  0xd2   :  { %2453 = vmatmul.mubr.msk.f32.gmra.mrb[4].mxu0 %vm238_vm1, %v168_v11  ;;  %v212_v59 = vld [vmem:[%s4212_s14 + $0x188] sm:$0xff]  ;;  %v213_v60 = vld [vmem:[%s4212_s14 + $0x190] sm:$0xff]  ;;  %v214_v61 = vld [vmem:[%s4212_s14 + $0x198] sm:$0xff] }
  0xd3   :  { %2455 = vmatprep.mubr.msk.f32.mxu0 %vm238_vm1, %v169_v13  ;;  %v215_v62 = vld [vmem:[%s4212_s14 + $0x1a0] sm:$0xff]  ;;  %v216_v63 = vld [vmem:[%s4212_s14 + $0x1a8] sm:$0xff]  ;;  %v217_v0 = vld [vmem:[%s4212_s14 + $0x1b0] sm:$0xff] }
  0xd4   :  { %v218_v1 = vld [vmem:[%s4212_s14 + $0x1b8] sm:$0xff]  ;;  %v219_v2 = vld [vmem:[%s4212_s14 + $0x1c0] sm:$0xff]  ;;  %v220_v3 = vld [vmem:[%s4212_s14 + $0x1c8] sm:$0xff] }
  0xd5   :  { %v221_v4 = vld [vmem:[%s4212_s14 + $0x1d0] sm:$0xff]  ;;  %v222_v5 = vld [vmem:[%s4212_s14 + $0x1d8] sm:$0xff]  ;;  %v932_v6 = vld [vmem:[%s4213_s7] sm:$0xff] }
  0xd6   :  { %2456 = vmatmul.mubr.msk.f32.gmra.mrb[6].mxu0 %vm238_vm1, %v170_v17  ;;  %v933_v7 = vld [vmem:[%s4213_s7 + $0x8] sm:$0xff]  ;;  %v1151_v14 = vld [vmem:[%s4214_s9] sm:$0xff] }
  0xd7   :  { %2458 = vmatprep.mubr.msk.f32.mxu0 %vm238_vm1, %v171_v18  ;;  %v2728_v8 = vpack.c.bf16 %v933_v7, %v932_v6  ;;  %v1152_v15 = vld [vmem:[%s4214_s9 + $0x8] sm:$0xff] }
  0xd8   :  { %v3543_v18 = vpack.c.bf16 %v1152_v15, %v1151_v14 }
  0xd9   :  { %2729 = vmatprep.subr.bf16.mxu1 %v2728_v8 }
  0xda   :  { %2459 = vmatmul.mubr.msk.f32.gmra.mrb[8].mxu0 %vm238_vm1, %v172_v19  ;;  %2731 = vmatpush3.bf16.msra.mxu1 %v2728_v8 }
  0xdb   :  { %2461 = vmatprep.mubr.msk.f32.mxu0 %vm238_vm1, %v173_v20  ;;  %2733 = vmatprep.subr.bf16.mxu1 %v3543_v18 }
  0xde   :  { %2462 = vmatmul.mubr.msk.f32.gmra.mrb[10].mxu0 %vm238_vm1, %v174_v21 }
  0xdf   :  { %2464 = vmatprep.mubr.msk.f32.mxu0 %vm238_vm1, %v175_v22 }
  0xe2   :  { %2465 = vmatmul.mubr.msk.f32.gmra.mrb[12].mxu0 %vm238_vm1, %v176_v23 }
  0xe3   :  { %2467 = vmatprep.mubr.msk.f32.mxu0 %vm238_vm1, %v177_v24 }
  0xe6   :  { %2468 = vmatmul.mubr.msk.f32.gmra.mrb[14].mxu0 %vm238_vm1, %v178_v25 }
  0xe7   :  { %2470 = vmatprep.mubr.msk.f32.mxu0 %vm238_vm1, %v179_v26 }
  0xea   :  { %2471 = vmatmul.mubr.msk.f32.gmra.mrb[16].mxu0 %vm238_vm1, %v180_v27 }
  0xeb   :  { %2473 = vmatprep.mubr.msk.f32.mxu0 %vm238_vm1, %v181_v28 }
  0xee   :  { %2474 = vmatmul.mubr.msk.f32.gmra.mrb[18].mxu0 %vm238_vm1, %v182_v29 }
  0xef   :  { %2476 = vmatprep.mubr.msk.f32.mxu0 %vm238_vm1, %v183_v30  ;;  %v3559_v30 = vld [vmem:[%s4215_s6] ss:$0 sm:$0xff] }
  0xf2   :  { %2477 = vmatmul.mubr.msk.f32.gmra.mrb[20].mxu0 %vm238_vm1, %v184_v31 }
  0xf3   :  { %2479 = vmatprep.mubr.msk.f32.mxu0 %vm238_vm1, %v185_v32 }
  0xf6   :  { %2480 = vmatmul.mubr.msk.f32.gmra.mrb[22].mxu0 %vm238_vm1, %v186_v33 }
  0xf7   :  { %2482 = vmatprep.mubr.msk.f32.mxu0 %vm238_vm1, %v187_v34 }
  0xfa   :  { %2483 = vmatmul.mubr.msk.f32.gmra.mrb[24].mxu0 %vm238_vm1, %v188_v35 }
  0xfb   :  { %2485 = vmatprep.mubr.msk.f32.mxu0 %vm238_vm1, %v189_v36 }
  0xfe   :  { %2486 = vmatmul.mubr.msk.f32.gmra.mrb[26].mxu0 %vm238_vm1, %v190_v37 }
  0xff   :  { %2488 = vmatprep.mubr.msk.f32.mxu0 %vm238_vm1, %v191_v38 }
 0x102   :  { %2489 = vmatmul.mubr.msk.f32.gmra.mrb[28].mxu0 %vm238_vm1, %v192_v39 }
 0x103   :  { %2491 = vmatprep.mubr.msk.f32.mxu0 %vm238_vm1, %v193_v40 }
 0x106   :  { %2492 = vmatmul.mubr.msk.f32.gmra.mrb[30].mxu0 %vm238_vm1, %v194_v41 }
 0x107   :  { %2494 = vmatprep.mubr.msk.f32.mxu0 %vm238_vm1, %v195_v42 }
 0x10a   :  { %2495 = vmatmul.mubr.msk.f32.gmra.mrb[32].mxu0 %vm238_vm1, %v196_v43 }
 0x10b   :  { %2497 = vmatprep.mubr.msk.f32.mxu0 %vm238_vm1, %v197_v44 }
 0x10e   :  { %2498 = vmatmul.mubr.msk.f32.gmra.mrb[34].mxu0 %vm238_vm1, %v198_v45 }
 0x10f   :  { %2500 = vmatprep.mubr.msk.f32.mxu0 %vm238_vm1, %v199_v46 }
 0x112   :  { %2501 = vmatmul.mubr.msk.f32.gmra.mrb[36].mxu0 %vm238_vm1, %v200_v47 }
 0x113   :  { %2503 = vmatprep.mubr.msk.f32.mxu0 %vm238_vm1, %v201_v48 }
 0x116   :  { %2504 = vmatmul.mubr.msk.f32.gmra.mrb[38].mxu0 %vm238_vm1, %v202_v49 }
 0x117   :  { %2506 = vmatprep.mubr.msk.f32.mxu0 %vm238_vm1, %v203_v50 }
 0x11a   :  { %2507 = vmatmul.mubr.msk.f32.gmra.mrb[40].mxu0 %vm238_vm1, %v204_v51 }
 0x11b   :  { %2509 = vmatprep.mubr.msk.f32.mxu0 %vm238_vm1, %v205_v52 }
 0x11e   :  { %2510 = vmatmul.mubr.msk.f32.gmra.mrb[42].mxu0 %vm238_vm1, %v206_v53 }
 0x11f   :  { %2512 = vmatprep.mubr.msk.f32.mxu0 %vm238_vm1, %v207_v54 }
 0x122   :  { %2513 = vmatmul.mubr.msk.f32.gmra.mrb[44].mxu0 %vm238_vm1, %v208_v55 }
 0x123   :  { %2515 = vmatprep.mubr.msk.f32.mxu0 %vm238_vm1, %v209_v56 }
 0x126   :  { %2516 = vmatmul.mubr.msk.f32.gmra.mrb[46].mxu0 %vm238_vm1, %v210_v57 }
 0x127   :  { %2518 = vmatprep.mubr.msk.f32.mxu0 %vm238_vm1, %v211_v58 }
 0x12a   :  { %2519 = vmatmul.mubr.msk.f32.gmra.mrb[48].mxu0 %vm238_vm1, %v212_v59 }
 0x12b   :  { %2521 = vmatprep.mubr.msk.f32.mxu0 %vm238_vm1, %v213_v60 }
 0x12e   :  { %2522 = vmatmul.mubr.msk.f32.gmra.mrb[50].mxu0 %vm238_vm1, %v214_v61 }
 0x12f   :  { %2524 = vmatprep.mubr.msk.f32.mxu0 %vm238_vm1, %v215_v62 }
 0x132   :  { %2525 = vmatmul.mubr.msk.f32.gmra.mrb[52].mxu0 %vm238_vm1, %v216_v63 }
 0x133   :  { %2527 = vmatprep.mubr.msk.f32.mxu0 %vm238_vm1, %v217_v0 }
 0x136   :  { %2528 = vmatmul.mubr.msk.f32.gmra.mrb[54].mxu0 %vm238_vm1, %v218_v1 }
 0x137   :  { %2530 = vmatprep.mubr.msk.f32.mxu0 %vm238_vm1, %v219_v2 }
 0x13a   :  { %2531 = vmatmul.mubr.msk.f32.gmra.mrb[56].mxu0 %vm238_vm1, %v220_v3 }
 0x13b   :  { %2533 = vmatprep.mubr.msk.f32.mxu0 %vm238_vm1, %v221_v4 }
 0x13e   :  { %2534 = vmatmul.mubr.msk.f32.gmra.mrb[58].mxu0 %vm238_vm1, %v222_v5 }
 0x19d   :  { %v2448_v9 = vpop.f32.mrb[0].mxu0  ;;  %v3533_v13 = vpop.f32.mrb[0].mxu1 }
 0x19e   :  { %v501_v10 = vpop.f32.mrb[1].mxu0  ;;  %v3541_v17 = vpop.f32.mrb[1].mxu1  ;;  %v507_v33 = vadd.f32 %v2448_v9, %v3559_v30 }
 0x19f   :  { %v502_v34 = vadd.f32 %v3559_v30, %v501_v10 }
 0x1a0   :  { %v821_v39 = vmax.f32 %v507_v33, 0.0 }
 0x1a1   :  { %v2451_v11 = vpop.f32.mrb[2].mxu0  ;;  %v3546_v20 = vpop.f32.mrb[2].mxu1  ;;  %v820_v42 = vmax.f32 %v502_v34, 0.0 }
 0x1a2   :  { %v511_v12 = vpop.f32.mrb[3].mxu0  ;;  %v3548_v22 = vpop.f32.mrb[3].mxu1  ;;  %v517_v40 = vadd.f32 %v2451_v11, %v3559_v30 }
 0x1a3   :  { %v512_v43 = vadd.f32 %v3559_v30, %v511_v12 }
 0x1a4   :  { %v823_v51 = vmax.f32 %v517_v40, 0.0 }
 0x1a5   :  { %v2454_v16 = vpop.f32.mrb[4].mxu0  ;;  %v822_v54 = vmax.f32 %v512_v43, 0.0 }
 0x1a6   :  { %v521_v19 = vpop.f32.mrb[5].mxu0  ;;  %v527_v52 = vadd.f32 %v2454_v16, %v3559_v30 }
 0x1a7   :  { %v522_v55 = vadd.f32 %v3559_v30, %v521_v19 }
 0x1a8   :  { %v825_v63 = vmax.f32 %v527_v52, 0.0 }
 0x1a9   :  { %v2457_v21 = vpop.f32.mrb[6].mxu0  ;;  %v824_v2 = vmax.f32 %v522_v55, 0.0 }
 0x1aa   :  { %v531_v23 = vpop.f32.mrb[7].mxu0  ;;  %v537_v0 = vadd.f32 %v2457_v21, %v3559_v30 }
 0x1ab   :  { %v532_v3 = vadd.f32 %v3559_v30, %v531_v23 }
 0x1ac   :  { %v827_v11 = vmax.f32 %v537_v0, 0.0 }
 0x1ad   :  { %v2460_v24 = vpop.f32.mrb[8].mxu0  ;;  %v826_v15 = vmax.f32 %v532_v3, 0.0 }
 0x1ae   :  { %v541_v25 = vpop.f32.mrb[9].mxu0  ;;  %v547_v12 = vadd.f32 %v2460_v24, %v3559_v30 }
 0x1af   :  { %v542_v16 = vadd.f32 %v3559_v30, %v541_v25 }
 0x1b1   :  { %v2463_v26 = vpop.f32.mrb[10].mxu0  ;;  %v828_v24 = vmax.f32 %v542_v16, 0.0 }
 0x1b2   :  { %v3550_v27 = vpop.f32.mrb[11].mxu0 }
 0x1b3   :  { %v552_v40 = vadd.f32 %v3559_v30, %v3550_v27 }
 0x1b5   :  { %v3552_v28 = vpop.f32.mrb[12].mxu0 }
 0x1b6   :  { %v3554_v29 = vpop.f32.mrb[13].mxu0 }
 0x1b7   :  { %v562_v27 = vadd.f32 %v3559_v30, %v3554_v29 }
 0x1b9   :  { %v3561_v31 = vpop.f32.mrb[14].mxu0 }
 0x1ba   :  { %v3563_v32 = vpop.f32.mrb[15].mxu0 }
 0x1bb   :  { %v572_v29 = vadd.f32 %v3559_v30, %v3563_v32 }
 0x1bd   :  { %v2472_v35 = vpop.f32.mrb[16].mxu0 }
 0x1be   :  { %v587_v36 = vadd.f32 %v2472_v35, %v3559_v30  ;;  %v581_v37 = vpop.f32.mrb[17].mxu0 }
 0x1bf   :  { %v582_v38 = vadd.f32 %v3559_v30, %v581_v37  ;;  %v829_v37 = vmax.f32 %v547_v12, 0.0 }
 0x1c0   :  { %v837_v41 = vmax.f32 %v587_v36, 0.0 }
 0x1c1   :  { %v836_v44 = vmax.f32 %v582_v38, 0.0  ;;  %v2475_v45 = vpop.f32.mrb[18].mxu0  ;;  %v557_v38 = vadd.f32 %v2463_v26, %v3559_v30  ;;  %v567_v26 = vadd.f32 %v3552_v28, %v3559_v30  ;;  %v577_v28 = vadd.f32 %v3561_v31, %v3559_v30 }
 0x1c2   :  { %v3571_v46 = vmax.f32 %v821_v39, %v837_v41  ;;  %v597_v47 = vadd.f32 %v2475_v45, %v3559_v30  ;;  %v591_v48 = vpop.f32.mrb[19].mxu0 }
 0x1c3   :  { %v3574_v49 = vmax.f32 %v820_v42, %v836_v44  ;;  %v592_v50 = vadd.f32 %v3559_v30, %v591_v48  ;;  %v831_v48 = vmax.f32 %v557_v38, 0.0 }
 0x1c4   :  { %v839_v53 = vmax.f32 %v597_v47, 0.0 }
 0x1c5   :  { %v838_v56 = vmax.f32 %v592_v50, 0.0  ;;  %v2478_v57 = vpop.f32.mrb[20].mxu0 }
 0x1c6   :  { %v3579_v58 = vmax.f32 %v823_v51, %v839_v53  ;;  %v607_v59 = vadd.f32 %v2478_v57, %v3559_v30  ;;  %v601_v60 = vpop.f32.mrb[21].mxu0  ;;  %v830_v51 = vmax.f32 %v552_v40, 0.0  ;;  %v807_v40 = vadd.f32 %v3533_v13, %v3559_v30 }
 0x1c7   :  { %v3582_v61 = vmax.f32 %v822_v54, %v838_v56  ;;  %v602_v62 = vadd.f32 %v3559_v30, %v601_v60  ;;  %v833_v60 = vmax.f32 %v567_v26, 0.0 }
 0x1c8   :  { %v841_v1 = vmax.f32 %v607_v59, 0.0 }
 0x1c9   :  { %v840_v4 = vmax.f32 %v602_v62, 0.0  ;;  %v2481_v5 = vpop.f32.mrb[22].mxu0 }
 0x1ca   :  { %v3587_v6 = vmax.f32 %v825_v63, %v841_v1  ;;  %v617_v7 = vadd.f32 %v2481_v5, %v3559_v30  ;;  %v611_v8 = vpop.f32.mrb[23].mxu0  ;;  %v832_v63 = vmax.f32 %v562_v27, 0.0 }
 0x1cb   :  { %v3590_v9 = vmax.f32 %v824_v2, %v840_v4  ;;  %v612_v10 = vadd.f32 %v3559_v30, %v611_v8  ;;  %v835_v8 = vmax.f32 %v577_v28, 0.0 }
 0x1cc   :  { %v843_v14 = vmax.f32 %v617_v7, 0.0 }
 0x1cd   :  { %v842_v19 = vmax.f32 %v612_v10, 0.0  ;;  %v2484_v21 = vpop.f32.mrb[24].mxu0 }
 0x1ce   :  { %v3595_v23 = vmax.f32 %v827_v11, %v843_v14  ;;  %v627_v33 = vadd.f32 %v2484_v21, %v3559_v30  ;;  %v621_v34 = vpop.f32.mrb[25].mxu0  ;;  %v834_v11 = vmax.f32 %v572_v29, 0.0 }
 0x1cf   :  { %v3598_v35 = vmax.f32 %v826_v15, %v842_v19  ;;  %v622_v36 = vadd.f32 %v3559_v30, %v621_v34 }
 0x1d0   :  { %v845_v39 = vmax.f32 %v627_v33, 0.0 }
 0x1d1   :  { %v844_v25 = vmax.f32 %v622_v36, 0.0  ;;  %v2487_v41 = vpop.f32.mrb[26].mxu0 }
 0x1d2   :  { %v3604_v42 = vmax.f32 %v829_v37, %v845_v39  ;;  %v637_v43 = vadd.f32 %v2487_v41, %v3559_v30  ;;  %v631_v44 = vpop.f32.mrb[27].mxu0 }
 0x1d3   :  { %v3607_v45 = vmax.f32 %v828_v24, %v844_v25  ;;  %v632_v47 = vadd.f32 %v3559_v30, %v631_v44  ;;  %v802_v25 = vadd.f32 %v3559_v30, %v3541_v17  ;;  %v881_v44 = vmax.f32 %v807_v40, 0.0 }
 0x1d4   :  { %v847_v50 = vmax.f32 %v637_v43, 0.0 }
 0x1d5   :  { %v846_v52 = vmax.f32 %v632_v47, 0.0  ;;  %v2490_v53 = vpop.f32.mrb[28].mxu0 }
 0x1d6   :  { %v3614_v54 = vmax.f32 %v831_v48, %v847_v50  ;;  %v647_v55 = vadd.f32 %v2490_v53, %v3559_v30  ;;  %v641_v56 = vpop.f32.mrb[29].mxu0  ;;  %v817_v48 = vadd.f32 %v3546_v20, %v3559_v30  ;;  %v880_v50 = vmax.f32 %v802_v25, 0.0 }
 0x1d7   :  { %v3617_v57 = vmax.f32 %v830_v51, %v846_v52  ;;  %v642_v59 = vadd.f32 %v3559_v30, %v641_v56  ;;  %v812_v51 = vadd.f32 %v3559_v30, %v3548_v22 }
 0x1d8   :  { %v849_v62 = vmax.f32 %v647_v55, 0.0  ;;  %v883_v55 = vmax.f32 %v817_v48, 0.0 }
 0x1d9   :  { %v848_v0 = vmax.f32 %v642_v59, 0.0  ;;  %v2493_v1 = vpop.f32.mrb[30].mxu0  ;;  %v882_v20 = vmax.f32 %v812_v51, 0.0 }
 0x1da   :  { %v3624_v2 = vmax.f32 %v833_v60, %v849_v62  ;;  %v657_v3 = vadd.f32 %v2493_v1, %v3559_v30  ;;  %v651_v4 = vpop.f32.mrb[31].mxu0 }
 0x1db   :  { %v3627_v5 = vmax.f32 %v832_v63, %v848_v0  ;;  %v652_v7 = vadd.f32 %v3559_v30, %v651_v4 }
 0x1dc   :  { %v851_v10 = vmax.f32 %v657_v3, 0.0 }
 0x1dd   :  { %v850_v31 = vmax.f32 %v652_v7, 0.0  ;;  %v2496_v12 = vpop.f32.mrb[32].mxu0 }
 0x1de   :  { %v3630_v14 = vmax.f32 %v835_v8, %v851_v10  ;;  %v661_v15 = vpop.f32.mrb[33].mxu0  ;;  %v667_v28 = vadd.f32 %v2496_v12, %v3559_v30 }
 0x1df   :  { %v3632_v32 = vmax.f32 %v834_v11, %v850_v31  ;;  %v662_v63 = vadd.f32 %v3559_v30, %v661_v15 }
 0x1e0   :  { %v853_v11 = vmax.f32 %v667_v28, 0.0 }
 0x1e1   :  { %v2499_v16 = vpop.f32.mrb[34].mxu0  ;;  %v852_v40 = vmax.f32 %v662_v63, 0.0 }
 0x1e2   :  { %v671_v19 = vpop.f32.mrb[35].mxu0  ;;  %v677_v31 = vadd.f32 %v2499_v16, %v3559_v30 }
 0x1e3   :  { %v672_v25 = vadd.f32 %v3559_v30, %v671_v19 }
 0x1e4   :  { %v855_v16 = vmax.f32 %v677_v31, 0.0 }
 0x1e5   :  { %v2502_v21 = vpop.f32.mrb[36].mxu0  ;;  %v854_v19 = vmax.f32 %v672_v25, 0.0 }
 0x1e6   :  { %v681_v33 = vpop.f32.mrb[37].mxu0 }
 0x1e9   :  { %v3634_v34 = vpop.f32.mrb[38].mxu0 }
 0x1ea   :  { %v3636_v36 = vpop.f32.mrb[39].mxu0 }
 0x1ed   :  { %v3638_v37 = vpop.f32.mrb[40].mxu0 }
 0x1ee   :  { %v3640_v38 = vpop.f32.mrb[41].mxu0 }
 0x1f1   :  { %v3642_v39 = vpop.f32.mrb[42].mxu0 }
 0x1f2   :  { %v3644_v24 = vpop.f32.mrb[43].mxu0 }
 0x1f5   :  { %v2514_v41 = vpop.f32.mrb[44].mxu0 }
 0x1f6   :  { %v727_v43 = vadd.f32 %v2514_v41, %v3559_v30  ;;  %v721_v47 = vpop.f32.mrb[45].mxu0 }
 0x1f7   :  { %v722_v26 = vadd.f32 %v3559_v30, %v721_v47 }
 0x1f8   :  { %v865_v27 = vmax.f32 %v727_v43, 0.0 }
 0x1f9   :  { %v864_v52 = vmax.f32 %v722_v26, 0.0  ;;  %v2517_v13 = vpop.f32.mrb[46].mxu0 }
 0x1fa   :  { %v3656_v53 = vmax.f32 %v865_v27, %v881_v44  ;;  %v737_v17 = vadd.f32 %v2517_v13, %v3559_v30  ;;  %v731_v56 = vpop.f32.mrb[47].mxu0  ;;  %v687_v27 = vadd.f32 %v2502_v21, %v3559_v30 }
 0x1fb   :  { %v3659_v59 = vmax.f32 %v864_v52, %v880_v50  ;;  %v732_v60 = vadd.f32 %v3559_v30, %v731_v56 }
 0x1fc   :  { %v929_v62 = vmax.f32 %v3624_v2, %v3656_v53  ;;  %v867_v22 = vmax.f32 %v737_v17, 0.0  ;;  %v682_v17 = vadd.f32 %v3559_v30, %v681_v33  ;;  %v857_v21 = vmax.f32 %v687_v27, 0.0 }
 0x1fd   :  { %v928_v29 = vmax.f32 %v3627_v5, %v3659_v59  ;;  %v866_v0 = vmax.f32 %v732_v60, 0.0  ;;  %v2520_v1 = vpop.f32.mrb[48].mxu0 }
 0x1fe   :  { %v3668_v3 = vmax.f32 %v867_v22, %v883_v55  ;;  %v747_v4 = vadd.f32 %v2520_v1, %v3559_v30  ;;  %v741_v7 = vpop.f32.mrb[49].mxu0 }
 0x1ff   :  { %v3671_v8 = vmax.f32 %v866_v0, %v882_v20  ;;  %v742_v10 = vadd.f32 %v3559_v30, %v741_v7 }
 0x200   :  { %v931_v12 = vmax.f32 %v3630_v14, %v3668_v3  ;;  %v869_v15 = vmax.f32 %v747_v4, 0.0  ;;  %v692_v4 = vadd.f32 %v3559_v30, %v3636_v36 }
 0x201   :  { %v930_v41 = vmax.f32 %v3632_v32, %v3671_v8  ;;  %v868_v43 = vmax.f32 %v742_v10, 0.0  ;;  %v2523_v44 = vpop.f32.mrb[50].mxu0 }
 0x202   :  { %v901_v47 = vmax.f32 %v853_v11, %v869_v15  ;;  %v757_v48 = vadd.f32 %v2523_v44, %v3559_v30  ;;  %v751_v26 = vpop.f32.mrb[51].mxu0  ;;  %v858_v44 = vmax.f32 %v692_v4, 0.0 }
 0x203   :  { %v900_v50 = vmax.f32 %v852_v40, %v868_v43  ;;  %v752_v51 = vadd.f32 %v3559_v30, %v751_v26  ;;  %v707_v43 = vadd.f32 %v3638_v37, %v3559_v30 }
 0x204   :  { %v917_v52 = vmax.f32 %v3571_v46, %v901_v47  ;;  %v871_v13 = vmax.f32 %v757_v48, 0.0  ;;  %v697_v46 = vadd.f32 %v3634_v34, %v3559_v30 }
 0x205   :  { %v916_v55 = vmax.f32 %v3574_v49, %v900_v50  ;;  %v870_v56 = vmax.f32 %v752_v51, 0.0  ;;  %v2526_v60 = vpop.f32.mrb[52].mxu0  ;;  %v856_v49 = vmax.f32 %v682_v17, 0.0 }
 0x206   :  { %v903_v20 = vmax.f32 %v855_v16, %v871_v13  ;;  %v767_v28 = vadd.f32 %v2526_v60, %v3559_v30  ;;  %v761_v22 = vpop.f32.mrb[53].mxu0  ;;  %v859_v25 = vmax.f32 %v697_v46, 0.0 }
 0x207   :  { %v902_v63 = vmax.f32 %v854_v19, %v870_v56  ;;  %v762_v0 = vadd.f32 %v3559_v30, %v761_v22  ;;  %2546 = vmatprep.mubr.msk.f32.mxu1 %vm941_vm4, %v916_v55  ;;  %v712_v19 = vadd.f32 %v3559_v30, %v3644_v24 }
 0x208   :  { %v919_v1 = vmax.f32 %v3579_v58, %v903_v20  ;;  %v873_v33 = vmax.f32 %v767_v28, 0.0  ;;  %2547 = vmatmul.mubr.msk.f32.vlgmr.msra.gmra.mrb[4].mxu1 %vm941_vm4, %v917_v52  ;;  %v717_v52 = vadd.f32 %v3642_v39, %v3559_v30 }
 0x209   :  { %v918_v7 = vmax.f32 %v3582_v61, %v902_v63  ;;  %v872_v10 = vmax.f32 %v762_v0, 0.0  ;;  %v2529_v11 = vpop.f32.mrb[54].mxu0  ;;  %2735 = vmatpush3.bf16.msra.mxu1 %v3543_v18  ;;  %v702_v18 = vadd.f32 %v3559_v30, %v3640_v38  ;;  %v862_v24 = vmax.f32 %v712_v19, 0.0 }
 0x20a   :  { %v905_v31 = vmax.f32 %v857_v21, %v873_v33  ;;  %v777_v15 = vadd.f32 %v2529_v11, %v3559_v30  ;;  %v771_v40 = vpop.f32.mrb[55].mxu0 }
 0x20b   :  { %v904_v34 = vmax.f32 %v856_v49, %v872_v10  ;;  %v772_v58 = vadd.f32 %v3559_v30, %v771_v40  ;;  %2549 = vmatprep.mubr.msk.f32.mxu1 %vm941_vm4, %v918_v7 }
 0x20c   :  { %v921_v36 = vmax.f32 %v3587_v6, %v905_v31  ;;  %v875_v61 = vmax.f32 %v777_v15, 0.0  ;;  %2550 = vmatmul.mubr.msk.f32.gmra.mrb[6].mxu1 %vm941_vm4, %v919_v1  ;;  %v861_v6 = vmax.f32 %v707_v43, 0.0 }
 0x20d   :  { %v920_v47 = vmax.f32 %v3590_v9, %v904_v34  ;;  %v874_v48 = vmax.f32 %v772_v58, 0.0  ;;  %v2532_v26 = vpop.f32.mrb[56].mxu0  ;;  %v860_v9 = vmax.f32 %v702_v18, 0.0 }
 0x20e   :  { %v907_v50 = vmax.f32 %v859_v25, %v875_v61  ;;  %v787_v51 = vadd.f32 %v2532_v26, %v3559_v30  ;;  %v781_v16 = vpop.f32.mrb[57].mxu0 }
 0x20f   :  { %v906_v27 = vmax.f32 %v858_v44, %v874_v48  ;;  %v782_v37 = vadd.f32 %v3559_v30, %v781_v16  ;;  %2552 = vmatprep.mubr.msk.f32.mxu1 %vm941_vm4, %v920_v47 }
 0x210   :  { %v923_v13 = vmax.f32 %v3595_v23, %v907_v50  ;;  %v877_v38 = vmax.f32 %v787_v51, 0.0  ;;  %2553 = vmatmul.mubr.msk.f32.gmra.mrb[8].mxu1 %vm941_vm4, %v921_v36  ;;  %v863_v23 = vmax.f32 %v717_v52, 0.0 }
 0x211   :  { %v922_v17 = vmax.f32 %v3598_v35, %v906_v27  ;;  %v876_v55 = vmax.f32 %v782_v37, 0.0  ;;  %v2535_v56 = vpop.f32.mrb[58].mxu0 }
 0x212   :  { %v909_v60 = vmax.f32 %v861_v6, %v877_v38  ;;  %v797_v20 = vadd.f32 %v2535_v56, %v3559_v30  ;;  %v791_v28 = vpop.f32.mrb[59].mxu0 }
 0x213   :  { %v908_v22 = vmax.f32 %v860_v9, %v876_v55  ;;  %v792_v39 = vadd.f32 %v3559_v30, %v791_v28  ;;  %2555 = vmatprep.mubr.msk.f32.mxu1 %vm941_vm4, %v922_v17 }
 0x214   :  { %v925_v63 = vmax.f32 %v3604_v42, %v909_v60  ;;  %v879_v0 = vmax.f32 %v797_v20, 0.0  ;;  %2556 = vmatmul.mubr.msk.f32.gmra.mrb[10].mxu1 %vm941_vm4, %v923_v13  ;;  %v1369_v42 = vld [vmem:[%s4216_s28] sm:$0xff] }
 0x215   :  { %v924_v35 = vmax.f32 %v3607_v45, %v908_v22  ;;  %v878_v21 = vmax.f32 %v792_v39, 0.0  ;;  %v1370_v45 = vld [vmem:[%s4216_s28 + $0x8] sm:$0xff]  ;;  %v1479_v22 = vld [vmem:[%s4217_s27] sm:$0xff] }
 0x216   :  { %v911_v46 = vmax.f32 %v863_v23, %v879_v0  ;;  %v1480_v39 = vld [vmem:[%s4217_s27 + $0x8] sm:$0xff] }
 0x217   :  { %v910_v1 = vmax.f32 %v862_v24, %v878_v21  ;;  %2558 = vmatprep.mubr.msk.f32.mxu1 %vm941_vm4, %v924_v35  ;;  %v2740_v23 = vpack.c.bf16 %v1480_v39, %v1479_v22 }
 0x218   :  { %v927_v33 = vmax.f32 %v3614_v54, %v911_v46  ;;  %2559 = vmatmul.mubr.msk.f32.gmra.mrb[12].mxu1 %vm941_vm4, %v925_v63  ;;  %v2736_v54 = vpack.c.bf16 %v1370_v45, %v1369_v42  ;;  %v3855_v63 = vld [vmem:[#allocation4] ss:$0 sm:$0xff] }
 0x219   :  { %v926_v30 = vmax.f32 %v3617_v57, %v910_v1  ;;  %v3751_v57 = vld [vmem:[#allocation2] ss:$0 sm:$0xff] }
 0x21a   :  { %2737 = vmatprep.subr.bf16.mxu1 %v2736_v54 }
 0x21b   :  { %2561 = vmatprep.mubr.msk.f32.mxu1 %vm941_vm4, %v926_v30 }
 0x21c   :  { %2562 = vmatmul.mubr.msk.f32.gmra.mrb[14].mxu1 %vm941_vm4, %v927_v33 }
 0x21d   :  { %2564 = vmatprep.mubr.msk.f32.mxu1 %vm941_vm4, %v928_v29 }
 0x220   :  { %2565 = vmatmul.mubr.msk.f32.gmra.mrb[16].mxu1 %vm941_vm4, %v929_v62 }
 0x221   :  { %2567 = vmatprep.mubr.msk.f32.mxu1 %vm941_vm4, %v930_v41 }
 0x224   :  { %2568 = vmatmul.mubr.msk.f32.gmra.mrb[18].mxu1 %vm941_vm4, %v931_v12 }
 0x2db   :  { %v2548_v2 = vpop.f32.mrb[4].mxu1 }
 0x2dc   :  { %v1062_v5 = vadd.f32 %v2548_v2, %v3751_v57  ;;  %v1056_v32 = vpop.f32.mrb[5].mxu1 }
 0x2dd   :  { %v1057_v14 = vadd.f32 %v3751_v57, %v1056_v32 }
 0x2de   :  { %v1136_v53 = vmax.f32 %v1062_v5, 0.0 }
 0x2df   :  { %v1135_v59 = vmax.f32 %v1057_v14, 0.0  ;;  %v2551_v62 = vpop.f32.mrb[6].mxu1 }
 0x2e0   :  { %2050 = vst.msk [vmem:[%s4178_s19 + $0x8] sm:$0xff] %vm941_vm4, %v1136_v53  ;;  %v1072_v29 = vadd.f32 %v2551_v62, %v3751_v57  ;;  %v1066_v3 = vpop.f32.mrb[7].mxu1 }
 0x2e1   :  { %2049 = vst.msk [vmem:[%s4178_s19] sm:$0xff] %vm941_vm4, %v1135_v59  ;;  %v1067_v8 = vadd.f32 %v3751_v57, %v1066_v3  ;;  %2574 = vmatprep.mubr.msk.f32.mxu1 %vm941_vm4, %v1135_v59 }
 0x2e2   :  { %v1138_v12 = vmax.f32 %v1072_v29, 0.0  ;;  %2575 = vmatmul.mubr.msk.f32.vlgmr.msra.gmra.mrb[20].mxu1 %vm941_vm4, %v1136_v53 }
 0x2e3   :  { %v1137_v41 = vmax.f32 %v1067_v8, 0.0  ;;  %v2554_v49 = vpop.f32.mrb[8].mxu1  ;;  %2739 = vmatpush3.bf16.msra.mxu1 %v2736_v54 }
 0x2e4   :  { %2052 = vst.msk [vmem:[%s4178_s19 + $0x18] sm:$0xff] %vm941_vm4, %v1138_v12  ;;  %v1082_v4 = vadd.f32 %v2554_v49, %v3751_v57  ;;  %v1076_v7 = vpop.f32.mrb[9].mxu1  ;;  %2741 = vmatprep.subr.bf16.mxu1 %v2740_v23 }
 0x2e5   :  { %2051 = vst.msk [vmem:[%s4178_s19 + $0x10] sm:$0xff] %vm941_vm4, %v1137_v41  ;;  %v1077_v10 = vadd.f32 %v3751_v57, %v1076_v7  ;;  %2577 = vmatprep.mubr.msk.f32.mxu1 %vm941_vm4, %v1137_v41 }
 0x2e6   :  { %v1140_v11 = vmax.f32 %v1082_v4, 0.0  ;;  %2578 = vmatmul.mubr.msk.f32.gmra.mrb[22].mxu1 %vm941_vm4, %v1138_v12 }
 0x2e7   :  { %v1139_v31 = vmax.f32 %v1077_v10, 0.0  ;;  %v2557_v15 = vpop.f32.mrb[10].mxu1 }
 0x2e8   :  { %2054 = vst.msk [vmem:[%s4178_s19 + $0x28] sm:$0xff] %vm941_vm4, %v1140_v11  ;;  %v1092_v40 = vadd.f32 %v2557_v15, %v3751_v57  ;;  %v1086_v34 = vpop.f32.mrb[11].mxu1 }
 0x2e9   :  { %2053 = vst.msk [vmem:[%s4178_s19 + $0x20] sm:$0xff] %vm941_vm4, %v1139_v31  ;;  %v1087_v58 = vadd.f32 %v3751_v57, %v1086_v34  ;;  %2580 = vmatprep.mubr.msk.f32.mxu1 %vm941_vm4, %v1139_v31 }
 0x2ea   :  { %v1142_v25 = vmax.f32 %v1092_v40, 0.0  ;;  %2581 = vmatmul.mubr.msk.f32.gmra.mrb[24].mxu1 %vm941_vm4, %v1140_v11 }
 0x2eb   :  { %v1141_v43 = vmax.f32 %v1087_v58, 0.0  ;;  %v2560_v36 = vpop.f32.mrb[12].mxu1 }
 0x2ec   :  { %2056 = vst.msk [vmem:[%s4178_s19 + $0x38] sm:$0xff] %vm941_vm4, %v1142_v25  ;;  %v1102_v61 = vadd.f32 %v2560_v36, %v3751_v57  ;;  %v1096_v44 = vpop.f32.mrb[13].mxu1 }
 0x2ed   :  { %2055 = vst.msk [vmem:[%s4178_s19 + $0x30] sm:$0xff] %vm941_vm4, %v1141_v43  ;;  %v1097_v18 = vadd.f32 %v3751_v57, %v1096_v44  ;;  %2583 = vmatprep.mubr.msk.f32.mxu1 %vm941_vm4, %v1141_v43 }
 0x2ee   :  { %v1144_v47 = vmax.f32 %v1102_v61, 0.0  ;;  %2584 = vmatmul.mubr.msk.f32.gmra.mrb[26].mxu1 %vm941_vm4, %v1142_v25 }
 0x2ef   :  { %v1143_v48 = vmax.f32 %v1097_v18, 0.0  ;;  %v2563_v26 = vpop.f32.mrb[14].mxu1 }
 0x2f0   :  { %2058 = vst.msk [vmem:[%s4178_s19 + $0x48] sm:$0xff] %vm941_vm4, %v1144_v47  ;;  %v1112_v50 = vadd.f32 %v2563_v26, %v3751_v57  ;;  %v1106_v51 = vpop.f32.mrb[15].mxu1 }
 0x2f1   :  { %2057 = vst.msk [vmem:[%s4178_s19 + $0x40] sm:$0xff] %vm941_vm4, %v1143_v48  ;;  %v1107_v16 = vadd.f32 %v3751_v57, %v1106_v51  ;;  %2586 = vmatprep.mubr.msk.f32.mxu1 %vm941_vm4, %v1143_v48 }
 0x2f2   :  { %v1146_v27 = vmax.f32 %v1112_v50, 0.0  ;;  %2587 = vmatmul.mubr.msk.f32.gmra.mrb[28].mxu1 %vm941_vm4, %v1144_v47 }
 0x2f3   :  { %v1145_v37 = vmax.f32 %v1107_v16, 0.0  ;;  %v2566_v6 = vpop.f32.mrb[16].mxu1 }
 0x2f4   :  { %2060 = vst.msk [vmem:[%s4178_s19 + $0x58] sm:$0xff] %vm941_vm4, %v1146_v27  ;;  %v1122_v52 = vadd.f32 %v2566_v6, %v3751_v57  ;;  %v1116_v13 = vpop.f32.mrb[17].mxu1  ;;  %v1481_v6 = vld [vmem:[%s4217_s27 + $0x10] sm:$0xff] }
 0x2f5   :  { %2059 = vst.msk [vmem:[%s4178_s19 + $0x50] sm:$0xff] %vm941_vm4, %v1145_v37  ;;  %v1117_v38 = vadd.f32 %v3751_v57, %v1116_v13  ;;  %2589 = vmatprep.mubr.msk.f32.mxu1 %vm941_vm4, %v1145_v37 }
 0x2f6   :  { %v1148_v9 = vmax.f32 %v1122_v52, 0.0  ;;  %2590 = vmatmul.mubr.msk.f32.gmra.mrb[30].mxu1 %vm941_vm4, %v1146_v27  ;;  %v1482_v52 = vld [vmem:[%s4217_s27 + $0x18] sm:$0xff] }
 0x2f7   :  { %v1147_v19 = vmax.f32 %v1117_v38, 0.0  ;;  %v2569_v17 = vpop.f32.mrb[18].mxu1  ;;  %v2744_v13 = vpack.c.bf16 %v1482_v52, %v1481_v6  ;;  %v1592_v38 = vld [vmem:[%s4170_s11] sm:$0xff]  ;;  %v1826_v52 = vld [vmem:[%s4174_s15 + $0x28] sm:$0xff] }
 0x2f8   :  { %2062 = vst.msk [vmem:[%s4178_s19 + $0x68] sm:$0xff] %vm941_vm4, %v1148_v9  ;;  %v1132_v55 = vadd.f32 %v2569_v17, %v3751_v57  ;;  %v1126_v56 = vpop.f32.mrb[19].mxu1  ;;  %v2242_v17 = vld [vmem:[#allocation6] ss:$0 sm:$0xff] }
 0x2f9   :  { %2061 = vst.msk [vmem:[%s4178_s19 + $0x60] sm:$0xff] %vm941_vm4, %v1147_v19  ;;  %v1127_v60 = vadd.f32 %v3751_v57, %v1126_v56  ;;  %2592 = vmatprep.mubr.msk.f32.mxu1 %vm941_vm4, %v1147_v19  ;;  %v1825_v6 = vld [vmem:[%s4174_s15 + $0x20] sm:$0xff] }
 0x2fa   :  { %v1150_v20 = vmax.f32 %v1132_v55, 0.0  ;;  %2593 = vmatmul.mubr.msk.f32.gmra.mrb[32].mxu1 %vm941_vm4, %v1148_v9  ;;  %v1593_v9 = vld [vmem:[%s4170_s11 + $0x8] sm:$0xff] }
 0x2fb   :  { %v1149_v28 = vmax.f32 %v1127_v60, 0.0  ;;  %v2748_v19 = vpack.c.bf16 %v1593_v9, %v1592_v38  ;;  %v2780_v9 = vpack.c.bf16 %v1826_v52, %v1825_v6 }
 0x2fc   :  { %2064 = vst.msk [vmem:[%s4178_s19 + $0x78] sm:$0xff] %vm941_vm4, %v1150_v20 }
 0x2fd   :  { %2063 = vst.msk [vmem:[%s4178_s19 + $0x70] sm:$0xff] %vm941_vm4, %v1149_v28  ;;  %2595 = vmatprep.mubr.msk.f32.mxu1 %vm941_vm4, %v1149_v28 }
 0x2fe   :  { %2596 = vmatmul.mubr.msk.f32.gmra.mrb[34].mxu1 %vm941_vm4, %v1150_v20 }
 0x3b5   :  { %v2576_v0 = vpop.f32.mrb[20].mxu1 }
 0x3b6   :  { %v1280_v24 = vadd.f32 %v2576_v0, %v3855_v63  ;;  %v1274_v35 = vpop.f32.mrb[21].mxu1 }
 0x3b7   :  { %v1275_v21 = vadd.f32 %v3855_v63, %v1274_v35 }
 0x3b8   :  { %v1354_v46 = vmax.f32 %v1280_v24, 0.0 }
 0x3b9   :  { %v1353_v1 = vmax.f32 %v1275_v21, 0.0  ;;  %v2579_v33 = vpop.f32.mrb[22].mxu1  ;;  %v1594_v21 = vld [vmem:[%s4170_s11 + $0x10] sm:$0xff] }
 0x3ba   :  { %2066 = vst.msk [vmem:[%s4179_s20 + $0x8] sm:$0xff] %vm941_vm4, %v1354_v46  ;;  %v1290_v30 = vadd.f32 %v2579_v33, %v3855_v63  ;;  %v1284_v42 = vpop.f32.mrb[23].mxu1  ;;  %v1704_v33 = vld [vmem:[%s4172_s13] sm:$0xff] }
 0x3bb   :  { %2065 = vst.msk [vmem:[%s4179_s20] sm:$0xff] %vm941_vm4, %v1353_v1  ;;  %v1285_v45 = vadd.f32 %v3855_v63, %v1284_v42  ;;  %2602 = vmatprep.mubr.msk.f32.mxu1 %vm941_vm4, %v1353_v1 }
 0x3bc   :  { %v1356_v54 = vmax.f32 %v1290_v30, 0.0  ;;  %2603 = vmatmul.mubr.msk.f32.vlgmr.msra.gmra.mrb[36].mxu1 %vm941_vm4, %v1354_v46  ;;  %v1595_v46 = vld [vmem:[%s4170_s11 + $0x18] sm:$0xff]  ;;  %v1705_v30 = vld [vmem:[%s4172_s13 + $0x8] sm:$0xff] }
 0x3bd   :  { %v1355_v57 = vmax.f32 %v1285_v45, 0.0  ;;  %v2582_v2 = vpop.f32.mrb[24].mxu1  ;;  %2743 = vmatpush3.bf16.msra.mxu1 %v2740_v23  ;;  %v2752_v1 = vpack.c.bf16 %v1595_v46, %v1594_v21  ;;  %v2756_v42 = vpack.c.bf16 %v1705_v30, %v1704_v33  ;;  %v2247_v45 = vld [vmem:[#allocation7] ss:$0 sm:$0xff]  ;;  %v1947_v30 = vld [vmem:[%s4176_s17 + $0x50] sm:$0xff] }
 0x3be   :  { %2068 = vst.msk [vmem:[%s4179_s20 + $0x18] sm:$0xff] %vm941_vm4, %v1356_v54  ;;  %v1300_v5 = vadd.f32 %v2582_v2, %v3855_v63  ;;  %v1294_v32 = vpop.f32.mrb[25].mxu1  ;;  %2745 = vmatprep.subr.bf16.mxu1 %v2744_v13  ;;  %v1945_v46 = vld [vmem:[%s4176_s17 + $0x40] sm:$0xff] }
 0x3bf   :  { %2067 = vst.msk [vmem:[%s4179_s20 + $0x10] sm:$0xff] %vm941_vm4, %v1355_v57  ;;  %v1295_v14 = vadd.f32 %v3855_v63, %v1294_v32  ;;  %2605 = vmatprep.mubr.msk.f32.mxu1 %vm941_vm4, %v1355_v57  ;;  %v1706_v32 = vld [vmem:[%s4172_s13 + $0x10] sm:$0xff] }
 0x3c0   :  { %v1358_v53 = vmax.f32 %v1300_v5, 0.0  ;;  %2606 = vmatmul.mubr.msk.f32.gmra.mrb[38].mxu1 %vm941_vm4, %v1356_v54 }
 0x3c1   :  { %v1357_v59 = vmax.f32 %v1295_v14, 0.0  ;;  %v2585_v62 = vpop.f32.mrb[26].mxu1  ;;  %2747 = vmatpush3.bf16.msra.mxu1 %v2744_v13  ;;  %v1707_v14 = vld [vmem:[%s4172_s13 + $0x18] sm:$0xff] }
 0x3c2   :  { %2070 = vst.msk [vmem:[%s4179_s20 + $0x28] sm:$0xff] %vm941_vm4, %v1358_v53  ;;  %v1310_v29 = vadd.f32 %v2585_v62, %v3855_v63  ;;  %v1304_v3 = vpop.f32.mrb[27].mxu1  ;;  %2749 = vmatprep.subr.bf16.mxu1 %v2748_v19 }
 0x3c3   :  { %2069 = vst.msk [vmem:[%s4179_s20 + $0x20] sm:$0xff] %vm941_vm4, %v1357_v59  ;;  %v1305_v8 = vadd.f32 %v3855_v63, %v1304_v3 }
 0x3c4   :  { %v1360_v12 = vmax.f32 %v1310_v29, 0.0 }
 0x3c5   :  { %v1359_v41 = vmax.f32 %v1305_v8, 0.0  ;;  %v2588_v49 = vpop.f32.mrb[28].mxu1  ;;  %v2760_v8 = vpack.c.bf16 %v1707_v14, %v1706_v32  ;;  %v1952_v32 = vld [vmem:[%s4176_s17 + $0x78] sm:$0xff] }
 0x3c6   :  { %2072 = vst.msk [vmem:[%s4179_s20 + $0x38] sm:$0xff] %vm941_vm4, %v1360_v12  ;;  %v1320_v4 = vadd.f32 %v2588_v49, %v3855_v63  ;;  %v1314_v7 = vpop.f32.mrb[29].mxu1  ;;  %v1709_v49 = vld [vmem:[%s4172_s13 + $0x28] sm:$0xff] }
 0x3c7   :  { %2071 = vst.msk [vmem:[%s4179_s20 + $0x30] sm:$0xff] %vm941_vm4, %v1359_v41  ;;  %v1315_v10 = vadd.f32 %v3855_v63, %v1314_v7  ;;  %v1708_v41 = vld [vmem:[%s4172_s13 + $0x20] sm:$0xff] }
 0x3c8   :  { %v1362_v11 = vmax.f32 %v1320_v4, 0.0 }
 0x3c9   :  { %v1361_v31 = vmax.f32 %v1315_v10, 0.0  ;;  %v2591_v15 = vpop.f32.mrb[30].mxu1  ;;  %v2764_v10 = vpack.c.bf16 %v1709_v49, %v1708_v41 }
 0x3ca   :  { %2074 = vst.msk [vmem:[%s4179_s20 + $0x48] sm:$0xff] %vm941_vm4, %v1362_v11  ;;  %v1330_v40 = vadd.f32 %v2591_v15, %v3855_v63  ;;  %v1324_v34 = vpop.f32.mrb[31].mxu1  ;;  %v1710_v11 = vld [vmem:[%s4172_s13 + $0x30] sm:$0xff] }
 0x3cb   :  { %2073 = vst.msk [vmem:[%s4179_s20 + $0x40] sm:$0xff] %vm941_vm4, %v1361_v31  ;;  %v1325_v58 = vadd.f32 %v3855_v63, %v1324_v34  ;;  %v1711_v31 = vld [vmem:[%s4172_s13 + $0x38] sm:$0xff]  ;;  %v1822_v34 = vld [vmem:[%s4174_s15 + $0x8] sm:$0xff] }
 0x3cc   :  { %v1364_v25 = vmax.f32 %v1330_v40, 0.0  ;;  %v2768_v15 = vpack.c.bf16 %v1711_v31, %v1710_v11  ;;  %v1821_v40 = vld [vmem:[%s4174_s15] sm:$0xff]  ;;  %v2262_v31 = vld [vmem:[#allocation12] ss:$0 sm:$0xff] }
 0x3cd   :  { %v1363_v43 = vmax.f32 %v1325_v58, 0.0  ;;  %v2594_v36 = vpop.f32.mrb[32].mxu1  ;;  %v2772_v58 = vpack.c.bf16 %v1822_v34, %v1821_v40 }
 0x3ce   :  { %2076 = vst.msk [vmem:[%s4179_s20 + $0x58] sm:$0xff] %vm941_vm4, %v1364_v25  ;;  %v1340_v61 = vadd.f32 %v2594_v36, %v3855_v63  ;;  %v1334_v44 = vpop.f32.mrb[33].mxu1  ;;  %v2252_v25 = vld [vmem:[#allocation9] ss:$0 sm:$0xff] }
 0x3cf   :  { %2075 = vst.msk [vmem:[%s4179_s20 + $0x50] sm:$0xff] %vm941_vm4, %v1363_v43  ;;  %v1335_v18 = vadd.f32 %v3855_v63, %v1334_v44 }
 0x3d0   :  { %v1366_v47 = vmax.f32 %v1340_v61, 0.0 }
 0x3d1   :  { %v1365_v48 = vmax.f32 %v1335_v18, 0.0  ;;  %v2597_v26 = vpop.f32.mrb[34].mxu1  ;;  %v1823_v18 = vld [vmem:[%s4174_s15 + $0x10] sm:$0xff] }
 0x3d2   :  { %2078 = vst.msk [vmem:[%s4179_s20 + $0x68] sm:$0xff] %vm941_vm4, %v1366_v47  ;;  %v1350_v50 = vadd.f32 %v2597_v26, %v3855_v63  ;;  %v1344_v51 = vpop.f32.mrb[35].mxu1  ;;  %v1824_v47 = vld [vmem:[%s4174_s15 + $0x18] sm:$0xff] }
 0x3d3   :  { %2077 = vst.msk [vmem:[%s4179_s20 + $0x60] sm:$0xff] %vm941_vm4, %v1365_v48  ;;  %v1345_v16 = vadd.f32 %v3855_v63, %v1344_v51 }
 0x3d4   :  { %v1368_v27 = vmax.f32 %v1350_v50, 0.0 }
 0x3d5   :  { %v1367_v37 = vmax.f32 %v1345_v16, 0.0 }
 0x3d6   :  { %2080 = vst.msk [vmem:[%s4179_s20 + $0x78] sm:$0xff] %vm941_vm4, %v1368_v27  ;;  %v2776_v27 = vpack.c.bf16 %v1824_v47, %v1823_v18 }
 0x3d7   :  { %2079 = vst.msk [vmem:[%s4179_s20 + $0x70] sm:$0xff] %vm941_vm4, %v1367_v37 }
 0x48f   :  { %v2604_v55 = vpop.f32.mrb[36].mxu1 }
 0x490   :  { %v1462_v56 = vadd.f32 %v2604_v55, %v2242_v17  ;;  %v1456_v60 = vpop.f32.mrb[37].mxu1 }
 0x491   :  { %v1457_v20 = vadd.f32 %v2242_v17, %v1456_v60  ;;  %v1938_v60 = vld [vmem:[%s4176_s17 + $0x8] sm:$0xff] }
 0x492   :  { %v1476_v28 = vmax.f32 %v1462_v56, 0.0  ;;  %v1937_v56 = vld [vmem:[%s4176_s17] sm:$0xff] }
 0x493   :  { %v1475_v22 = vmax.f32 %v1457_v20, 0.0  ;;  %v2607_v39 = vpop.f32.mrb[38].mxu1  ;;  %v1939_v20 = vld [vmem:[%s4176_s17 + $0x10] sm:$0xff] }
 0x494   :  { %2082 = vst.msk [vmem:[%s4180_s21 + $0x8] sm:$0xff] %vm1490_vm5, %v1476_v28  ;;  %v1472_v23 = vadd.f32 %v2607_v39, %v2242_v17  ;;  %v1466_v63 = vpop.f32.mrb[39].mxu1 }
 0x495   :  { %2081 = vst.msk [vmem:[%s4180_s21] sm:$0xff] %vm1490_vm5, %v1475_v22  ;;  %v1467_v0 = vadd.f32 %v2242_v17, %v1466_v63  ;;  %2616 = vmatprep.mubr.msk.f32.mxu1 %vm1490_vm5, %v1475_v22  ;;  %v1828_v17 = vld [vmem:[%s4174_s15 + $0x38] sm:$0xff]  ;;  %v1942_v63 = vld [vmem:[%s4176_s17 + $0x28] sm:$0xff] }
 0x496   :  { %v1478_v24 = vmax.f32 %v1472_v23, 0.0  ;;  %2617 = vmatmul.mubr.msk.f32.vlgmr.msra.gmra.mrb[40].mxu1 %vm1490_vm5, %v1476_v28  ;;  %v2788_v28 = vpack.c.bf16 %v1938_v60, %v1937_v56  ;;  %v1940_v22 = vld [vmem:[%s4176_s17 + $0x18] sm:$0xff]  ;;  %v1941_v23 = vld [vmem:[%s4176_s17 + $0x20] sm:$0xff] }
 0x497   :  { %v1477_v35 = vmax.f32 %v1467_v0, 0.0  ;;  %2751 = vmatpush3.bf16.msra.mxu1 %v2748_v19  ;;  %v1827_v19 = vld [vmem:[%s4174_s15 + $0x30] sm:$0xff]  ;;  %v2792_v39 = vpack.c.bf16 %v1940_v22, %v1939_v20  ;;  %v2796_v0 = vpack.c.bf16 %v1942_v63, %v1941_v23 }
 0x498   :  { %2084 = vst.msk [vmem:[%s4180_s21 + $0x18] sm:$0xff] %vm1490_vm5, %v1478_v24  ;;  %2753 = vmatprep.subr.bf16.mxu1 %v2752_v1  ;;  %v2784_v55 = vpack.c.bf16 %v1828_v17, %v1827_v19  ;;  %2789 = vmatprep.subr.bf16.mxu0 %v2788_v28 }
 0x499   :  { %2083 = vst.msk [vmem:[%s4180_s21 + $0x10] sm:$0xff] %vm1490_vm5, %v1477_v35  ;;  %2619 = vmatprep.mubr.msk.f32.mxu1 %vm1490_vm5, %v1477_v35  ;;  %2791 = vmatpush3.bf16.msra.mxu0 %v2788_v28  ;;  %v1944_v35 = vld [vmem:[%s4176_s17 + $0x38] sm:$0xff] }
 0x49a   :  { %2620 = vmatmul.mubr.msk.f32.gmra.mrb[42].mxu1 %vm1490_vm5, %v1478_v24  ;;  %2793 = vmatprep.subr.bf16.mxu0 %v2792_v39  ;;  %v1943_v24 = vld [vmem:[%s4176_s17 + $0x30] sm:$0xff] }
 0x49b   :  { %2755 = vmatpush3.bf16.msra.mxu1 %v2752_v1  ;;  %v2800_v21 = vpack.c.bf16 %v1944_v35, %v1943_v24  ;;  %v1946_v1 = vld [vmem:[%s4176_s17 + $0x48] sm:$0xff] }
 0x49c   :  { %2757 = vmatprep.subr.bf16.mxu1 %v2756_v42  ;;  %v2804_v33 = vpack.c.bf16 %v1946_v1, %v1945_v46 }
 0x49d   :  { %2795 = vmatpush3.bf16.msra.mxu0 %v2792_v39 }
 0x49e   :  { %2797 = vmatprep.subr.bf16.mxu0 %v2796_v0 }
 0x4a1   :  { %2799 = vmatpush3.bf16.msra.mxu0 %v2796_v0 }
 0x4a2   :  { %2801 = vmatprep.subr.bf16.mxu0 %v2800_v21 }
 0x4a5   :  { %2803 = vmatpush3.bf16.msra.mxu0 %v2800_v21 }
 0x4a6   :  { %2805 = vmatprep.subr.bf16.mxu0 %v2804_v33 }
 0x4a9   :  { %2807 = vmatpush3.bf16.msra.mxu0 %v2804_v33 }
 0x569   :  { %v2618_v54 = vpop.f32.mrb[40].mxu1 }
 0x56a   :  { %v1575_v57 = vadd.f32 %v2618_v54, %v2247_v45  ;;  %v1569_v2 = vpop.f32.mrb[41].mxu1  ;;  %v1949_v54 = vld [vmem:[%s4176_s17 + $0x60] sm:$0xff] }
 0x56b   :  { %v1570_v5 = vadd.f32 %v2247_v45, %v1569_v2 }
 0x56c   :  { %v1589_v53 = vmax.f32 %v1575_v57, 0.0  ;;  %v1950_v57 = vld [vmem:[%s4176_s17 + $0x68] sm:$0xff] }
 0x56d   :  { %v1588_v59 = vmax.f32 %v1570_v5, 0.0  ;;  %v2621_v62 = vpop.f32.mrb[42].mxu1  ;;  %v2812_v2 = vpack.c.bf16 %v1950_v57, %v1949_v54  ;;  %v1951_v5 = vld [vmem:[%s4176_s17 + $0x70] sm:$0xff] }
 0x56e   :  { %2086 = vst.msk [vmem:[%s4181_s22 + $0x8] sm:$0xff] %vm1490_vm5, %v1589_v53  ;;  %v1585_v29 = vadd.f32 %v2621_v62, %v2247_v45  ;;  %v1579_v3 = vpop.f32.mrb[43].mxu1  ;;  %v2816_v14 = vpack.c.bf16 %v1952_v32, %v1951_v5 }
 0x56f   :  { %2085 = vst.msk [vmem:[%s4181_s22] sm:$0xff] %vm1490_vm5, %v1588_v59  ;;  %v1580_v12 = vadd.f32 %v2247_v45, %v1579_v3  ;;  %2630 = vmatprep.mubr.msk.f32.mxu1 %vm1490_vm5, %v1588_v59 }
 0x570   :  { %v1591_v4 = vmax.f32 %v1585_v29, 0.0  ;;  %2631 = vmatmul.mubr.msk.f32.vlgmr.msra.gmra.mrb[44].mxu1 %vm1490_vm5, %v1589_v53  ;;  %v2257_v53 = vld [vmem:[#allocation10] ss:$0 sm:$0xff] }
 0x571   :  { %v1590_v7 = vmax.f32 %v1580_v12, 0.0  ;;  %2759 = vmatpush3.bf16.msra.mxu1 %v2756_v42  ;;  %v1948_v42 = vld [vmem:[%s4176_s17 + $0x58] sm:$0xff] }
 0x572   :  { %2088 = vst.msk [vmem:[%s4181_s22 + $0x18] sm:$0xff] %vm1490_vm5, %v1591_v4  ;;  %2761 = vmatprep.subr.bf16.mxu1 %v2760_v8  ;;  %v2808_v45 = vpack.c.bf16 %v1948_v42, %v1947_v30 }
 0x573   :  { %2087 = vst.msk [vmem:[%s4181_s22 + $0x10] sm:$0xff] %vm1490_vm5, %v1590_v7  ;;  %2633 = vmatprep.mubr.msk.f32.mxu1 %vm1490_vm5, %v1590_v7 }
 0x574   :  { %2634 = vmatmul.mubr.msk.f32.gmra.mrb[46].mxu1 %vm1490_vm5, %v1591_v4  ;;  %2809 = vmatprep.subr.bf16.mxu0 %v2808_v45 }
 0x575   :  { %2763 = vmatpush3.bf16.msra.mxu1 %v2760_v8  ;;  %2811 = vmatpush3.bf16.msra.mxu0 %v2808_v45 }
 0x576   :  { %2765 = vmatprep.subr.bf16.mxu1 %v2764_v10  ;;  %2813 = vmatprep.subr.bf16.mxu0 %v2812_v2 }
 0x579   :  { %2767 = vmatpush3.bf16.msra.mxu1 %v2764_v10  ;;  %2815 = vmatpush3.bf16.msra.mxu0 %v2812_v2 }
 0x57a   :  { %2769 = vmatprep.subr.bf16.mxu1 %v2768_v15  ;;  %2817 = vmatprep.subr.bf16.mxu0 %v2816_v14 }
 0x57d   :  { %2771 = vmatpush3.bf16.msra.mxu1 %v2768_v15  ;;  %2819 = vmatpush3.bf16.msra.mxu0 %v2816_v14 }
 0x57e   :  { %2773 = vmatprep.subr.bf16.mxu1 %v2772_v58 }
 0x643   :  { %v2632_v43 = vpop.f32.mrb[44].mxu1 }
 0x644   :  { %v1687_v36 = vadd.f32 %v2632_v43, %v2252_v25  ;;  %v1681_v61 = vpop.f32.mrb[45].mxu1 }
 0x645   :  { %v1682_v44 = vadd.f32 %v2252_v25, %v1681_v61 }
 0x646   :  { %v1701_v48 = vmax.f32 %v1687_v36, 0.0 }
 0x647   :  { %v1700_v26 = vmax.f32 %v1682_v44, 0.0  ;;  %v2635_v50 = vpop.f32.mrb[46].mxu1 }
 0x648   :  { %2090 = vst.msk [vmem:[%s4182_s23 + $0x8] sm:$0xff] %vm1719_vm6, %v1701_v48  ;;  %v1697_v51 = vadd.f32 %v2635_v50, %v2252_v25  ;;  %v1691_v16 = vpop.f32.mrb[47].mxu1 }
 0x649   :  { %2089 = vst.msk [vmem:[%s4182_s23] sm:$0xff] %vm1719_vm6, %v1700_v26  ;;  %v1692_v37 = vadd.f32 %v2252_v25, %v1691_v16  ;;  %2652 = vmatprep.mubr.msk.f32.mxu1 %vm1719_vm6, %v1700_v26  ;;  %v2267_v26 = vld [vmem:[#allocation13] ss:$0 sm:$0xff] }
 0x64a   :  { %v1703_v13 = vmax.f32 %v1697_v51, 0.0  ;;  %2653 = vmatmul.mubr.msk.f32.vlgmr.msra.gmra.mrb[48].mxu1 %vm1719_vm6, %v1701_v48 }
 0x64b   :  { %v1702_v38 = vmax.f32 %v1692_v37, 0.0  ;;  %2775 = vmatpush3.bf16.msra.mxu1 %v2772_v58 }
 0x64c   :  { %2092 = vst.msk [vmem:[%s4182_s23 + $0x18] sm:$0xff] %vm1719_vm6, %v1703_v13  ;;  %2777 = vmatprep.subr.bf16.mxu1 %v2776_v27 }
 0x64d   :  { %2091 = vst.msk [vmem:[%s4182_s23 + $0x10] sm:$0xff] %vm1719_vm6, %v1702_v38  ;;  %2655 = vmatprep.mubr.msk.f32.mxu1 %vm1719_vm6, %v1702_v38 }
 0x64e   :  { %2656 = vmatmul.mubr.msk.f32.gmra.mrb[50].mxu1 %vm1719_vm6, %v1703_v13 }
 0x64f   :  { %2779 = vmatpush3.bf16.msra.mxu1 %v2776_v27 }
 0x650   :  { %2781 = vmatprep.subr.bf16.mxu1 %v2780_v9 }
 0x653   :  { %2783 = vmatpush3.bf16.msra.mxu1 %v2780_v9 }
 0x654   :  { %2785 = vmatprep.subr.bf16.mxu1 %v2784_v55 }
 0x657   :  { %2787 = vmatpush3.bf16.msra.mxu1 %v2784_v55 }
 0x71d   :  { %v2654_v59 = vpop.f32.mrb[48].mxu1 }
 0x71e   :  { %v1804_v62 = vadd.f32 %v2654_v59, %v2257_v53  ;;  %v1798_v29 = vpop.f32.mrb[49].mxu1 }
 0x71f   :  { %v1799_v3 = vadd.f32 %v2257_v53, %v1798_v29 }
 0x720   :  { %v1818_v8 = vmax.f32 %v1804_v62, 0.0 }
 0x721   :  { %v1817_v12 = vmax.f32 %v1799_v3, 0.0  ;;  %v2657_v41 = vpop.f32.mrb[50].mxu1 }
 0x722   :  { %2094 = vst.msk [vmem:[%s4183_s24 + $0x8] sm:$0xff] %vm1719_vm6, %v1818_v8  ;;  %v1814_v49 = vadd.f32 %v2657_v41, %v2257_v53  ;;  %v1808_v4 = vpop.f32.mrb[51].mxu1 }
 0x723   :  { %2093 = vst.msk [vmem:[%s4183_s24] sm:$0xff] %vm1719_vm6, %v1817_v12  ;;  %v1809_v7 = vadd.f32 %v2257_v53, %v1808_v4  ;;  %2674 = vmatprep.mubr.msk.f32.mxu1 %vm1719_vm6, %v1817_v12 }
 0x724   :  { %v1820_v10 = vmax.f32 %v1814_v49, 0.0  ;;  %2675 = vmatmul.mubr.msk.f32.vlgmr.msra.gmra.mrb[52].mxu1 %vm1719_vm6, %v1818_v8 }
 0x725   :  { %v1819_v11 = vmax.f32 %v1809_v7, 0.0 }
 0x726   :  { %2096 = vst.msk [vmem:[%s4183_s24 + $0x18] sm:$0xff] %vm1719_vm6, %v1820_v10 }
 0x727   :  { %2095 = vst.msk [vmem:[%s4183_s24 + $0x10] sm:$0xff] %vm1719_vm6, %v1819_v11  ;;  %2677 = vmatprep.mubr.msk.f32.mxu1 %vm1719_vm6, %v1819_v11 }
 0x728   :  { %2678 = vmatmul.mubr.msk.f32.gmra.mrb[54].mxu1 %vm1719_vm6, %v1820_v10 }
 0x7f7   :  { %v2676_v15 = vpop.f32.mrb[52].mxu1 }
 0x7f8   :  { %v1920_v40 = vadd.f32 %v2676_v15, %v2262_v31  ;;  %v1914_v34 = vpop.f32.mrb[53].mxu1 }
 0x7f9   :  { %v1915_v58 = vadd.f32 %v2262_v31, %v1914_v34 }
 0x7fa   :  { %v1934_v25 = vmax.f32 %v1920_v40, 0.0 }
 0x7fb   :  { %v1933_v43 = vmax.f32 %v1915_v58, 0.0  ;;  %v2679_v36 = vpop.f32.mrb[54].mxu1 }
 0x7fc   :  { %2098 = vst [vmem:[%s4184_s25 + $0x8] sm:$0xff] %v1934_v25  ;;  %v1930_v61 = vadd.f32 %v2679_v36, %v2262_v31  ;;  %v1924_v44 = vpop.f32.mrb[55].mxu1 }
 0x7fd   :  { %2097 = vst [vmem:[%s4184_s25] sm:$0xff] %v1933_v43  ;;  %v1925_v18 = vadd.f32 %v2262_v31, %v1924_v44  ;;  %2712 = vmatprep.mubr.f32.mxu0 %v1933_v43 }
 0x7fe   :  { %v1936_v47 = vmax.f32 %v1930_v61, 0.0  ;;  %2713 = vmatmul.mubr.f32.vlgmr.msra.gmra.mrb[60].mxu0 %v1934_v25 }
 0x7ff   :  { %v1935_v48 = vmax.f32 %v1925_v18, 0.0 }
 0x800   :  { %2100 = vst [vmem:[%s4184_s25 + $0x18] sm:$0xff] %v1936_v47 }
 0x801   :  { %2099 = vst [vmem:[%s4184_s25 + $0x10] sm:$0xff] %v1935_v48  ;;  %2715 = vmatprep.mubr.f32.mxu0 %v1935_v48 }
 0x802   :  { %2716 = vmatmul.mubr.f32.gmra.mrb[62].mxu0 %v1936_v47 }
 0x8d1   :  { %v2714_v50 = vpop.f32.mrb[60].mxu0 }
 0x8d2   :  { %v2032_v51 = vadd.f32 %v2714_v50, %v2267_v26  ;;  %v2026_v16 = vpop.f32.mrb[61].mxu0 }
 0x8d3   :  { %v2027_v27 = vadd.f32 %v2267_v26, %v2026_v16 }
 0x8d4   :  { %v2046_v37 = vmax.f32 %v2032_v51, 0.0 }
 0x8d5   :  { %v2045_v6 = vmax.f32 %v2027_v27, 0.0  ;;  %v2717_v52 = vpop.f32.mrb[62].mxu0 }
 0x8d6   :  { %2102 = vst [vmem:[%s4185_s26 + $0x8] sm:$0xff] %v2046_v37  ;;  %v2042_v13 = vadd.f32 %v2717_v52, %v2267_v26  ;;  %v2036_v38 = vpop.f32.mrb[63].mxu0 }
 0x8d7   :  { %2101 = vst [vmem:[%s4185_s26] sm:$0xff] %v2045_v6  ;;  %v2037_v9 = vadd.f32 %v2267_v26, %v2036_v38 }
 0x8d8   :  { %v2048_v19 = vmax.f32 %v2042_v13, 0.0 }
 0x8d9   :  { %v2047_v17 = vmax.f32 %v2037_v9, 0.0 }
 0x8da   :  { %2104 = vst [vmem:[%s4185_s26 + $0x18] sm:$0xff] %v2048_v19 }
 0x8db   :  { %2103 = vst [vmem:[%s4185_s26 + $0x10] sm:$0xff] %v2047_v17 }
 0x8dc   :  { %2137 = vsyncpa [#allocation3], 1 }
 0x8dd   :  { %2138 = vsyncpa [#allocation5], 1 }
 0x8de   :  { %2139 = vsyncpa [#allocation8], 1 }
 0x8df   :  { %2140 = vsyncpa [#allocation11], 1 }
 0x8e0   :  { %2141 = vsyncpa [#allocation14], 1 }

// kernel: forward.7
= control target key start
LH: loop header
LB: loop body
LE: loop exit
PB: predicated region body
PF: predicated region fallthrough
CT: control target
= control target key end

     0   :  { %vm33_vm0 = vcmask 1043456   ;;  %v258_v1 = vmov 0.0   ;;  %vm20_vm1 = vcmask 31744   ;;  %s342_s1 = inlined_call_operand.vmem [shape: f32[4,384], index: 1, kind: input, shape index: {}]   ;;  %s343_s0 = inlined_call_operand.vmem [shape: f32[32,4], index: 0, kind: input, shape index: {}]   ;;  %s344_s2 = inlined_call_operand.vmem [shape: f32[32,384], index: 2, kind: output, shape index: {}]  }
   0x1   :  { %v15_v0 = vld [vmem:[%s342_s1] sm:$0xff]  ;;  %104 = vmatprep.mubr.f32.mxu0 %v258_v1  ;;  %122 = vmatprep.mubr.f32.mxu1 %v258_v1  ;;  %v14_v4 = vld [vmem:[%s343_s0 + $0x18] sm:$0xff]  ;;  %v16_v5 = vld [vmem:[%s342_s1 + $0x8] sm:$0xf] }
   0x2   :  { %v19_v2 = vcombine.high %v15_v0, %v15_v0  ;;  %v11_v3 = vld [vmem:[%s343_s0] sm:$0xff]  ;;  %v12_v6 = vld [vmem:[%s343_s0 + $0x8] sm:$0xff]  ;;  %v13_v7 = vld [vmem:[%s343_s0 + $0x10] sm:$0xff] }
   0x4   :  { %230 = vmatprep.subr.msk.mxu0 %vm33_vm0, %v19_v2  ;;  %254 = vmatprep.subr.msk.mxu1 %vm33_vm0, %v19_v2 }
   0x5   :  { %231 = vmatpush1.msk.msra.mxu0 %vm33_vm0, %v15_v0  ;;  %255 = vmatpush1.msk.msra.mxu1 %vm33_vm0, %v15_v0 }
   0x6   :  { %232 = vmatmul.mubr.msk.f32.vlgmr.msra.gmra.mrb[0].mxu0 %vm20_vm1, %v11_v3  ;;  %235 = vmatmul.mubr.msk.f32.vlgmr.msra.gmra.mrb[0].mxu1 %vm20_vm1, %v14_v4 }
   0x7   :  { %246 = vmatprep.subr.msk.mxu1 %vm33_vm0, %v16_v5  ;;  %110 = vmatprep.mubr.f32.mxu0 %v258_v1 }
   0x8   :  { %247 = vmatpush3.msk.msra.mxu1 %vm33_vm0, %v16_v5  ;;  %248 = vmatprep.mubr.msk.f32.mxu1 %vm20_vm1, %v11_v3 }
   0xa   :  { %233 = vmatmul.mubr.msk.f32.gmra.mrb[2].mxu0 %vm20_vm1, %v12_v6  ;;  %249 = vmatmul.mubr.msk.f32.vlgmr.msra.gmra.mrb[2].mxu1 %vm20_vm1, %v12_v6 }
   0xb   :  { %116 = vmatprep.mubr.f32.mxu0 %v258_v1  ;;  %251 = vmatprep.mubr.msk.f32.mxu1 %vm20_vm1, %v13_v7 }
   0xe   :  { %234 = vmatmul.mubr.msk.f32.gmra.mrb[4].mxu0 %vm20_vm1, %v13_v7  ;;  %252 = vmatmul.mubr.msk.f32.gmra.mrb[4].mxu1 %vm20_vm1, %v14_v4 }
  0xd9   :  { %v106_v8 = vpop.f32.mrb[0].mxu0  ;;  %v124_v9 = vpop.f32.mrb[0].mxu1 }
  0xda   :  { %214 = vst [vmem:[%s344_s2] sm:$0xff] %v106_v8  ;;  %223 = vst [vmem:[%s344_s2 + $0x48] sm:$0xff] %v124_v9  ;;  %v108_v10 = vpop.f32.mrb[1].mxu0  ;;  %v126_v11 = vpop.f32.mrb[1].mxu1 }
  0xdb   :  { %215 = vst [vmem:[%s344_s2 + $0x8] sm:$0xff] %v108_v10  ;;  %224 = vst [vmem:[%s344_s2 + $0x50] sm:$0xff] %v126_v11 }
  0xdd   :  { %v112_v12 = vpop.f32.mrb[2].mxu0  ;;  %v250_v13 = vpop.f32.mrb[2].mxu1 }
  0xde   :  { %217 = vst [vmem:[%s344_s2 + $0x18] sm:$0xff] %v112_v12  ;;  %219 = vst [vmem:[%s344_s2 + $0x28] sm:$0xff] %v250_v13  ;;  %v114_v14 = vpop.f32.mrb[3].mxu0  ;;  %v195_v15 = vpop.f32.mrb[3].mxu1 }
  0xdf   :  { %218 = vst [vmem:[%s344_s2 + $0x20] sm:$0xff] %v114_v14  ;;  %216 = vst [vmem:[%s344_s2 + $0x10] sm:$0xff] %v195_v15 }
  0xe1   :  { %v118_v16 = vpop.f32.mrb[4].mxu0  ;;  %v253_v17 = vpop.f32.mrb[4].mxu1 }
  0xe2   :  { %220 = vst [vmem:[%s344_s2 + $0x30] sm:$0xff] %v118_v16  ;;  %225 = vst [vmem:[%s344_s2 + $0x58] sm:$0xff] %v253_v17  ;;  %v120_v18 = vpop.f32.mrb[5].mxu0  ;;  %v205_v19 = vpop.f32.mrb[5].mxu1 }
  0xe3   :  { %221 = vst [vmem:[%s344_s2 + $0x38] sm:$0xff] %v120_v18  ;;  %222 = vst [vmem:[%s344_s2 + $0x40] sm:$0xff] %v205_v19 }

// kernel: forward.6
= control target key start
LH: loop header
LB: loop body
LE: loop exit
PB: predicated region body
PF: predicated region fallthrough
CT: control target
= control target key end

     0   :  { %s5209_s6 = smov 1   ;;  %s5210_s10 = smov 2   ;;  %s5779_s0 = inlined_call_operand.smem [shape: u32[38], index: -1, kind: input, shape index: {}] }
   0x1   :  { %s5254_s5 = sld [smem:[%s5779_s0]]   ;;  %s5211_s14 = smov 3  }
   0x2   :  { %s5259_s9 = sld [smem:[%s5779_s0 + %s5209_s6]]   ;;  %s5212_s18 = smov 4  }
   0x3   :  { %s5264_s13 = sld [smem:[%s5779_s0 + %s5210_s10]]   ;;  %s5213_s22 = smov 5  }
   0x4   :  { %s5269_s17 = sld [smem:[%s5779_s0 + %s5211_s14]]   ;;  %s5214_s26 = smov 6  }
   0x5   :  { %s5274_s21 = sld [smem:[%s5779_s0 + %s5212_s18]]   ;;  %s5215_s30 = smov 7  }
   0x6   :  { %s5279_s25 = sld [smem:[%s5779_s0 + %s5213_s22]]   ;;  %s5216_s4 = smov 8  }
   0x7   :  { %s5284_s29 = sld [smem:[%s5779_s0 + %s5214_s26]]   ;;  %s5217_s10 = smov 9  }
   0x8   :  { %s5289_s3 = sld [smem:[%s5779_s0 + %s5215_s30]]   ;;  %s5218_s15 = smov 10  }
   0x9   :  { %s5294_s8 = sld [smem:[%s5779_s0 + %s5216_s4]]   ;;  %s5219_s20 = smov 11  }
   0xa   :  { %5787 = sst [smem:[#allocation2_spill]] %s5269_s17  ;;  %s5220_s26 = smov 12  }
   0xb   :  { %5788 = sst [smem:[#allocation3_spill]] %s5274_s21  ;;  %s5221_s1 = smov 13  }
   0xc   :  { %5789 = sst [smem:[#allocation4_spill]] %s5279_s25  ;;  %s5222_s7 = smov 14  }
   0xd   :  { %5790 = sst [smem:[#allocation5_spill]] %s5284_s29  ;;  %s5224_s22 = smov 16  }
   0xe   :  { %5791 = sst [smem:[#allocation6_spill]] %s5289_s3  ;;  %s5225_s28 = smov 17  }
   0xf   :  { %s5299_s14 = sld [smem:[%s5779_s0 + %s5217_s10]]  }
  0x10   :  { %s5304_s19 = sld [smem:[%s5779_s0 + %s5218_s15]]   ;;  %s5223_s15 = smov 15  }
  0x11   :  { %s5309_s24 = sld [smem:[%s5779_s0 + %s5219_s20]]  }
  0x12   :  { %s5314_s30 = sld [smem:[%s5779_s0 + %s5220_s26]]  }
  0x13   :  { %s5319_s6 = sld [smem:[%s5779_s0 + %s5221_s1]]  }
  0x14   :  { %s5324_s12 = sld [smem:[%s5779_s0 + %s5222_s7]]   ;;  %s5226_s7 = smov 18  }
  0x15   :  { %s5329_s20 = sld [smem:[%s5779_s0 + %s5223_s15]]   ;;  %s5227_s15 = smov 19  }
  0x16   :  { %s5334_s27 = sld [smem:[%s5779_s0 + %s5224_s22]]   ;;  %s5228_s22 = smov 20  }
  0x17   :  { %5792 = sst [smem:[#allocation7_spill]] %s5309_s24 }
  0x18   :  { %5793 = sst [smem:[#allocation8_spill]] %s5314_s30 }
  0x19   :  { %5794 = sst [smem:[#allocation9_spill]] %s5319_s6 }
  0x1a   :  { %s5339_s4 = sld [smem:[%s5779_s0 + %s5225_s28]]   ;;  %s5229_s28 = smov 21  }
  0x1b   :  { %s5344_s3 = sld [smem:[%s5779_s0 + %s5226_s7]]   ;;  %s5230_s7 = smov 22  }
  0x1c   :  { %s5349_s29 = sld [smem:[%s5779_s0 + %s5227_s15]]   ;;  %s5231_s15 = smov 23  }
  0x1d   :  { %s5354_s6 = sld [smem:[%s5779_s0 + %s5228_s22]]   ;;  %s5232_s22 = smov 24  }
  0x1e   :  { %s5359_s25 = sld [smem:[%s5779_s0 + %s5229_s28]]   ;;  %s5233_s28 = smov 25  }
  0x1f   :  { %s5364_s30 = sld [smem:[%s5779_s0 + %s5230_s7]]   ;;  %s5234_s7 = smov 26  }
  0x20   :  { %s5369_s21 = sld [smem:[%s5779_s0 + %s5231_s15]]   ;;  %s5235_s15 = smov 27  }
  0x21   :  { %s5374_s24 = sld [smem:[%s5779_s0 + %s5232_s22]]   ;;  %s5236_s22 = smov 28  }
  0x22   :  { %s5379_s17 = sld [smem:[%s5779_s0 + %s5233_s28]]   ;;  %s5237_s28 = smov 29  }
  0x25   :  { %5795 = sst [smem:[#allocation10_spill]] %s5364_s30 }
  0x26   :  { %5796 = sst [smem:[#allocation11_spill]] %s5369_s21 }
  0x27   :  { %5797 = sst [smem:[#allocation12_spill]] %s5374_s24 }
  0x28   :  { %5798 = sst [smem:[#allocation13_spill]] %s5379_s17 }
  0x29   :  { %s5384_s30 = sld [smem:[%s5779_s0 + %s5234_s7]]   ;;  %s5238_s7 = smov 30  }
  0x2a   :  { %s5389_s21 = sld [smem:[%s5779_s0 + %s5235_s15]]   ;;  %s5239_s15 = smov 31  }
  0x2b   :  { %s5394_s24 = sld [smem:[%s5779_s0 + %s5236_s22]]   ;;  %s5240_s22 = smov 32  }
  0x2c   :  { %s5399_s17 = sld [smem:[%s5779_s0 + %s5237_s28]]   ;;  %s5241_s28 = smov 33  }
  0x2f   :  { %5799 = sst [smem:[#allocation14_spill]] %s5384_s30 }
  0x30   :  { %5800 = sst [smem:[#allocation15_spill]] %s5389_s21 }
  0x31   :  { %5801 = sst [smem:[#allocation16_spill]] %s5394_s24 }
  0x32   :  { %5802 = sst [smem:[#allocation17_spill]] %s5399_s17 }
  0x33   :  { %s5404_s30 = sld [smem:[%s5779_s0 + %s5238_s7]]   ;;  %s5242_s7 = smov 34  }
  0x34   :  { %s5409_s21 = sld [smem:[%s5779_s0 + %s5239_s15]]   ;;  %s5243_s15 = smov 35  }
  0x35   :  { %s5414_s24 = sld [smem:[%s5779_s0 + %s5240_s22]]   ;;  %s5244_s22 = smov 36  }
  0x36   :  { %s5419_s17 = sld [smem:[%s5779_s0 + %s5241_s28]]   ;;  %s5245_s28 = smov 37  }
  0x39   :  { %5803 = sst [smem:[#allocation18_spill]] %s5404_s30 }
  0x3a   :  { %5804 = sst [smem:[#allocation19_spill]] %s5409_s21 }
  0x3b   :  { %5805 = sst [smem:[#allocation20_spill]] %s5414_s24 }
  0x3c   :  { %5806 = sst [smem:[#allocation21_spill]] %s5419_s17 }
  0x3d   :  { %s5424_s30 = sld [smem:[%s5779_s0 + %s5242_s7]]   ;;  %s5441_s7 = smov 0  }
  0x3e   :  { %s5429_s21 = sld [smem:[%s5779_s0 + %s5243_s15]]  }
  0x3f   :  { %s5434_s24 = sld [smem:[%s5779_s0 + %s5244_s22]]  }
  0x40   :  { %s5439_s17 = sld [smem:[%s5779_s0 + %s5245_s28]]  }
  0x41 LB: > { %s4139_s10 = sadd.s32 4294967295, %s5207_s7   ;;  %p4143_p0 = scmp.ge.s32.totalorder %s5207_s7, 1  ;;  %s5207_s7 = sphi %s5441_s7, %s85_s7  }
  0x42   : > { %p1223_p1 = scmp.lt.s32.totalorder %s5207_s7, 4 }
  0x44   : > { %p1224_p2 = pnand %p4143_p0, %p1223_p1 }
  0x45   : > { %p1403_p3 = scmp.lt.s32.totalorder (!%p1224_p2), %s4139_s10, 2  ;;  %v1501_v0 = vld [vmem:[%s5254_s5] sm:$0xff] (!%p1224_p2)  ;;  %vm1526_vm0 = vcmask (!%p1224_p2), 130048   ;;  %v1502_v4 = vld [vmem:[%s5254_s5 + $0x8] sm:$0xff] (!%p1224_p2)  ;;  %v1503_v5 = vld [vmem:[%s5254_s5 + $0x10] sm:$0xff] (!%p1224_p2)  ;;  %vm1793_vm1 = vcmask (!%p1224_p2), 1043456  }
  0x46   : > { %1227 = sbr.rel (%p1224_p2) target bundleno = 3121 (0xc31), region = 168  ;;  %4490 = vmatprep.mubr.msk.f32.mxu0 (!%p1224_p2), %vm1526_vm0, %v1501_v0  ;;  %v1504_v6 = vld [vmem:[%s5254_s5 + $0x18] sm:$0xff] (!%p1224_p2)  ;;  %v1505_v7 = vld [vmem:[%s5254_s5 + $0x20] sm:$0xff] (!%p1224_p2)  ;;  %v1506_v8 = vld [vmem:[%s5254_s5 + $0x28] sm:$0xff] (!%p1224_p2)  ;;  %vm1744_vm2 = vcmask (!%p1224_p2), 31744   ;;  %vm2296_vm3 = vcmask (!%p1224_p2), 261120  }
  0x47   : > { %v1507_v9 = vld [vmem:[%s5254_s5 + $0x30] sm:$0xff] (!%p1224_p2)  ;;  %v1508_v10 = vld [vmem:[%s5254_s5 + $0x38] sm:$0xff] (!%p1224_p2)  ;;  %v1509_v11 = vld [vmem:[%s5254_s5 + $0x40] sm:$0xff] (!%p1224_p2)  ;;  %vm2514_vm4 = vcmask (!%p1224_p2), 64512   ;;  %vm2772_vm5 = vcmask (!%p1224_p2), 523264  }
  0x48   : > { %v1510_v12 = vld [vmem:[%s5254_s5 + $0x48] sm:$0xff] (!%p1224_p2)  ;;  %v1511_v13 = vld [vmem:[%s5254_s5 + $0x50] sm:$0xff] (!%p1224_p2)  ;;  %v1512_v14 = vld [vmem:[%s5254_s5 + $0x58] sm:$0xff] (!%p1224_p2) }
  0x49   : > { %v1513_v15 = vld [vmem:[%s5254_s5 + $0x60] sm:$0xff] (!%p1224_p2)  ;;  %v1514_v16 = vld [vmem:[%s5254_s5 + $0x68] sm:$0xff] (!%p1224_p2)  ;;  %v1515_v17 = vld [vmem:[%s5254_s5 + $0x70] sm:$0xff] (!%p1224_p2) }
  0x4a   : > { %v1516_v18 = vld [vmem:[%s5254_s5 + $0x78] sm:$0xff] (!%p1224_p2) }
  0x4d   : > { %s5828_s10 = smov (!%p1403_p3, %s4139_s10), 2 }
  0x4e   : > { %s4274_s0 = sshll.u32 %s5828_s10, 4  ;;  %s4146_s15 = sshll.u32 %s5828_s10, 2 }
  0x4f   : > { %s1407_s11 = scalar_lea.vmem %s5324_s12, %s4274_s0  ;;  %s1414_s16 = scalar_lea.vmem %s5334_s27, %s4146_s15 }
  0x50   : > { %v1517_v1 = vld [vmem:[%s1407_s11] sm:$0xff]  ;;  %v1518_v2 = vld [vmem:[%s1407_s11 + $0x8] sm:$0xff]  ;;  %s1410_s18 = scalar_lea.vmem %s5329_s20, %s5828_s10  ;;  %s1417_s22 = scalar_lea.vmem %s5339_s4, %s5828_s10 }
  0x51   : > { %v4836_v3 = vpack.c.bf16 %v1518_v2, %v1517_v1  ;;  %v1736_v19 = vld [vmem:[%s1414_s16] sm:$0xf]  ;;  %s5562_s23 = sshll.u32 %s5828_s10, 5  ;;  %s4151_s1 = sshll.u32 %s5828_s10, 3 }
  0x52   : > { %4514 = vmatprep.subr.msk.mxu1 %vm1793_vm1, %v1736_v19  ;;  %v4170_v20 = vld [vmem:[%s1410_s18] ss:$0 sm:$0xff]  ;;  %s1427_s26 = scalar_lea.vmem %s5349_s29, %s5562_s23  ;;  %s5568_s28 = scalar_lea.vmem %s5344_s3, %s5562_s23 }
  0x53   : > { %4837 = vmatprep.subr.bf16.mxu0 %v4836_v3  ;;  %4515 = vmatpush3.msk.msra.mxu1 %vm1793_vm1, %v1736_v19  ;;  %s1434_s2 = scalar_lea.vmem %s5359_s25, %s4151_s1  ;;  %s1430_s11 = scalar_lea.vmem %s5354_s6, %s5828_s10 }
  0x54   : > { %4839 = vmatpush3.bf16.msra.mxu0 %v4836_v3  ;;  %s5807_s15 = sld [smem:[#allocation12_spill]]  ;;  %s4277_s16 = sshll.u32 %s5828_s10, 6 }
  0x55   : > { %s5810_s1 = sld [smem:[#allocation11_spill]] }
  0x57   : > { %4491 = vmatmul.mubr.msk.f32.vlgmr.msra.gmra.mrb[0].mxu0 %vm1526_vm0, %v1502_v4 }
  0x58   : > { %4493 = vmatprep.mubr.msk.f32.mxu0 %vm1526_vm0, %v1503_v5  ;;  %v2054_v5 = vld [vmem:[%s5294_s8] sm:$0xff] }
  0x5a   : > { %s1447_s18 = scalar_lea.vmem %s5807_s15, %s4277_s16 }
  0x5b   : > { %4494 = vmatmul.mubr.msk.f32.gmra.mrb[2].mxu0 %vm1526_vm0, %v1504_v6  ;;  %v2055_v6 = vld [vmem:[%s5294_s8 + $0x8] sm:$0xff]  ;;  %s5616_s15 = scalar_lea.vmem %s5810_s1, %s4277_s16  ;;  %s5813_s16 = sld [smem:[#allocation3_spill]] }
  0x5c   : > { %4496 = vmatprep.mubr.msk.f32.mxu0 %vm1526_vm0, %v1505_v7  ;;  %v4840_v7 = vpack.c.bf16 %v2055_v6, %v2054_v5  ;;  %s5816_s1 = sld [smem:[#allocation17_spill]] }
  0x5e   : > { %4841 = vmatprep.subr.bf16.mxu1 %v4840_v7 }
  0x5f   : > { %4497 = vmatmul.mubr.msk.f32.gmra.mrb[4].mxu0 %vm1526_vm0, %v1506_v8  ;;  %v5511_v8 = vld [vmem:[%s1417_s22] ss:$0 sm:$0xff]  ;;  %s5808_s22 = sld [smem:[#allocation10_spill]] }
  0x60   : > { %4499 = vmatprep.mubr.msk.f32.mxu0 %vm1526_vm0, %v1507_v9 }
  0x63   : > { %4500 = vmatmul.mubr.msk.f32.gmra.mrb[6].mxu0 %vm1526_vm0, %v1508_v10 }
  0x64   : > { %4502 = vmatprep.mubr.msk.f32.mxu0 %vm1526_vm0, %v1509_v11 }
  0x67   : > { %4503 = vmatmul.mubr.msk.f32.gmra.mrb[8].mxu0 %vm1526_vm0, %v1510_v12 }
  0x68   : > { %4505 = vmatprep.mubr.msk.f32.mxu0 %vm1526_vm0, %v1511_v13 }
  0x6b   : > { %4506 = vmatmul.mubr.msk.f32.gmra.mrb[10].mxu0 %vm1526_vm0, %v1512_v14 }
  0x6c   : > { %4508 = vmatprep.mubr.msk.f32.mxu0 %vm1526_vm0, %v1513_v15 }
  0x6f   : > { %4509 = vmatmul.mubr.msk.f32.gmra.mrb[12].mxu0 %vm1526_vm0, %v1514_v16 }
  0x70   : > { %4511 = vmatprep.mubr.msk.f32.mxu0 %vm1526_vm0, %v1515_v17 }
  0x73   : > { %4512 = vmatmul.mubr.msk.f32.gmra.mrb[14].mxu0 %vm1526_vm0, %v1516_v18 }
 0x12a   : > { %v4492_v21 = vpop.f32.mrb[0].mxu0 }
 0x12b   : > { %v1647_v22 = vadd.f32 %v4492_v21, %v4170_v20  ;;  %v1641_v23 = vpop.f32.mrb[1].mxu0 }
 0x12c   : > { %v1642_v24 = vadd.f32 %v4170_v20, %v1641_v23 }
 0x12d   : > { %v1721_v27 = vmax.f32 %v1647_v22, 0.0 }
 0x12e   : > { %v1720_v25 = vmax.f32 %v1642_v24, 0.0  ;;  %v4495_v26 = vpop.f32.mrb[2].mxu0 }
 0x12f   : > { %v1657_v28 = vadd.f32 %v4495_v26, %v4170_v20  ;;  %v1651_v29 = vpop.f32.mrb[3].mxu0 }
 0x130   : > { %v1652_v30 = vadd.f32 %v4170_v20, %v1651_v29  ;;  %4516 = vmatprep.mubr.msk.f32.mxu1 %vm1744_vm2, %v1720_v25 }
 0x131   : > { %4517 = vmatmul.mubr.msk.f32.vlgmr.msra.gmra.mrb[0].mxu1 %vm1744_vm2, %v1721_v27  ;;  %v1723_v33 = vmax.f32 %v1657_v28, 0.0 }
 0x132   : > { %v1722_v31 = vmax.f32 %v1652_v30, 0.0  ;;  %v4498_v32 = vpop.f32.mrb[4].mxu0  ;;  %4843 = vmatpush3.bf16.msra.mxu1 %v4840_v7 }
 0x133   : > { %v1667_v34 = vadd.f32 %v4498_v32, %v4170_v20  ;;  %v1661_v35 = vpop.f32.mrb[5].mxu0 }
 0x134   : > { %v1662_v36 = vadd.f32 %v4170_v20, %v1661_v35  ;;  %4519 = vmatprep.mubr.msk.f32.mxu1 %vm1744_vm2, %v1722_v31 }
 0x135   : > { %4520 = vmatmul.mubr.msk.f32.gmra.mrb[2].mxu1 %vm1744_vm2, %v1723_v33  ;;  %v1725_v39 = vmax.f32 %v1667_v34, 0.0 }
 0x136   : > { %v1724_v37 = vmax.f32 %v1662_v36, 0.0  ;;  %v4501_v38 = vpop.f32.mrb[6].mxu0 }
 0x137   : > { %v1677_v40 = vadd.f32 %v4501_v38, %v4170_v20  ;;  %v1671_v41 = vpop.f32.mrb[7].mxu0 }
 0x138   : > { %v1672_v42 = vadd.f32 %v4170_v20, %v1671_v41  ;;  %4522 = vmatprep.mubr.msk.f32.mxu1 %vm1744_vm2, %v1724_v37 }
 0x139   : > { %4523 = vmatmul.mubr.msk.f32.gmra.mrb[4].mxu1 %vm1744_vm2, %v1725_v39  ;;  %v1727_v45 = vmax.f32 %v1677_v40, 0.0 }
 0x13a   : > { %v1726_v43 = vmax.f32 %v1672_v42, 0.0  ;;  %v4504_v44 = vpop.f32.mrb[8].mxu0 }
 0x13b   : > { %v1687_v46 = vadd.f32 %v4504_v44, %v4170_v20  ;;  %v1681_v47 = vpop.f32.mrb[9].mxu0 }
 0x13c   : > { %v1682_v48 = vadd.f32 %v4170_v20, %v1681_v47  ;;  %4525 = vmatprep.mubr.msk.f32.mxu1 %vm1744_vm2, %v1726_v43 }
 0x13d   : > { %4526 = vmatmul.mubr.msk.f32.gmra.mrb[6].mxu1 %vm1744_vm2, %v1727_v45  ;;  %v1729_v51 = vmax.f32 %v1687_v46, 0.0 }
 0x13e   : > { %v1728_v49 = vmax.f32 %v1682_v48, 0.0  ;;  %v4507_v50 = vpop.f32.mrb[10].mxu0 }
 0x13f   : > { %v1697_v52 = vadd.f32 %v4507_v50, %v4170_v20  ;;  %v1691_v53 = vpop.f32.mrb[11].mxu0 }
 0x140   : > { %v1692_v54 = vadd.f32 %v4170_v20, %v1691_v53  ;;  %4528 = vmatprep.mubr.msk.f32.mxu1 %vm1744_vm2, %v1728_v49 }
 0x141   : > { %4529 = vmatmul.mubr.msk.f32.gmra.mrb[8].mxu1 %vm1744_vm2, %v1729_v51  ;;  %v1731_v57 = vmax.f32 %v1697_v52, 0.0 }
 0x142   : > { %v1730_v55 = vmax.f32 %v1692_v54, 0.0  ;;  %v4510_v56 = vpop.f32.mrb[12].mxu0 }
 0x143   : > { %v1707_v58 = vadd.f32 %v4510_v56, %v4170_v20  ;;  %v1701_v59 = vpop.f32.mrb[13].mxu0 }
 0x144   : > { %v1702_v60 = vadd.f32 %v4170_v20, %v1701_v59  ;;  %4531 = vmatprep.mubr.msk.f32.mxu1 %vm1744_vm2, %v1730_v55 }
 0x145   : > { %4532 = vmatmul.mubr.msk.f32.gmra.mrb[10].mxu1 %vm1744_vm2, %v1731_v57  ;;  %v1733_v63 = vmax.f32 %v1707_v58, 0.0 }
 0x146   : > { %v1732_v61 = vmax.f32 %v1702_v60, 0.0  ;;  %v4513_v62 = vpop.f32.mrb[14].mxu0 }
 0x147   : > { %v1717_v0 = vadd.f32 %v4513_v62, %v4170_v20  ;;  %v1711_v1 = vpop.f32.mrb[15].mxu0 }
 0x148   : > { %v1712_v2 = vadd.f32 %v4170_v20, %v1711_v1  ;;  %4534 = vmatprep.mubr.msk.f32.mxu1 %vm1744_vm2, %v1732_v61 }
 0x149   : > { %4535 = vmatmul.mubr.msk.f32.gmra.mrb[12].mxu1 %vm1744_vm2, %v1733_v63  ;;  %v1735_v4 = vmax.f32 %v1717_v0, 0.0 }
 0x14a   : > { %v1734_v3 = vmax.f32 %v1712_v2, 0.0 }
 0x14c   : > { %4537 = vmatprep.mubr.msk.f32.mxu1 %vm1744_vm2, %v1734_v3 }
 0x14d   : > { %4538 = vmatmul.mubr.msk.f32.gmra.mrb[14].mxu1 %vm1744_vm2, %v1735_v4 }
 0x204   : > { %v4518_v9 = vpop.f32.mrb[0].mxu1 }
 0x205   : > { %v1869_v10 = vadd.f32 %v4518_v9, %v5511_v8  ;;  %v1863_v11 = vpop.f32.mrb[1].mxu1 }
 0x206   : > { %v1864_v12 = vadd.f32 %v5511_v8, %v1863_v11 }
 0x207   : > { %v1943_v13 = vsub.f32 0.0, %v1869_v10 }
 0x208   : > { %v1942_v14 = vsub.f32 0.0, %v1864_v12  ;;  %v4521_v15 = vpop.f32.mrb[2].mxu1 }
 0x209   : > { %v1960_v16 = vmul.f32 1.442695, %v1943_v13  ;;  %v1879_v17 = vadd.f32 %v4521_v15, %v5511_v8  ;;  %v1873_v18 = vpop.f32.mrb[3].mxu1 }
 0x20a   : > { %v1958_v19 = vmul.f32 1.442695, %v1942_v14  ;;  %v1874_v20 = vadd.f32 %v5511_v8, %v1873_v18 }
 0x20b   : > { %5089 = vpow2.f32 %v1960_v16  ;;  %v1945_v21 = vsub.f32 0.0, %v1879_v17  ;;  %v2022_v17 = vld [vmem:[%s5259_s9] sm:$0xff] }
 0x20c   : > { %5091 = vpow2.f32 %v1958_v19  ;;  %v1944_v22 = vsub.f32 0.0, %v1874_v20  ;;  %v4524_v23 = vpop.f32.mrb[4].mxu1  ;;  %v2023_v19 = vld [vmem:[%s5259_s9 + $0x8] sm:$0xff] }
 0x20d   : > { %v1964_v24 = vmul.f32 1.442695, %v1945_v21  ;;  %v1889_v25 = vadd.f32 %v4524_v23, %v5511_v8  ;;  %v1883_v26 = vpop.f32.mrb[5].mxu1 }
 0x20e   : > { %v1962_v27 = vmul.f32 1.442695, %v1944_v22  ;;  %v1884_v28 = vadd.f32 %v5511_v8, %v1883_v26 }
 0x20f   : > { %5093 = vpow2.f32 %v1964_v24  ;;  %v1947_v29 = vsub.f32 0.0, %v1889_v25 }
 0x210   : > { %5095 = vpow2.f32 %v1962_v27  ;;  %v1946_v30 = vsub.f32 0.0, %v1884_v28  ;;  %v4527_v31 = vpop.f32.mrb[6].mxu1 }
 0x211   : > { %v1968_v32 = vmul.f32 1.442695, %v1947_v29  ;;  %v1899_v33 = vadd.f32 %v4527_v31, %v5511_v8  ;;  %v1893_v34 = vpop.f32.mrb[7].mxu1 }
 0x212   : > { %v1966_v35 = vmul.f32 1.442695, %v1946_v30  ;;  %v1894_v36 = vadd.f32 %v5511_v8, %v1893_v34 }
 0x213   : > { %5097 = vpow2.f32 %v1968_v32  ;;  %v1949_v37 = vsub.f32 0.0, %v1899_v33  ;;  %v2024_v32 = vld [vmem:[%s5259_s9 + $0x10] sm:$0xff] }
 0x214   : > { %5099 = vpow2.f32 %v1966_v35  ;;  %v1948_v38 = vsub.f32 0.0, %v1894_v36  ;;  %v4530_v39 = vpop.f32.mrb[8].mxu1 }
 0x215   : > { %v5090_v40 = vpop.eup %5089  ;;  %v1972_v41 = vmul.f32 1.442695, %v1949_v37  ;;  %v1909_v42 = vadd.f32 %v4530_v39, %v5511_v8  ;;  %v1903_v43 = vpop.f32.mrb[9].mxu1 }
 0x216   : > { %v5092_v44 = vpop.eup %5091  ;;  %v1991_v45 = vadd.f32 1.0, %v5090_v40  ;;  %v1970_v46 = vmul.f32 1.442695, %v1948_v38  ;;  %v1904_v47 = vadd.f32 %v5511_v8, %v1903_v43 }
 0x217   : > { %v1990_v48 = vadd.f32 1.0, %v5092_v44  ;;  %5101 = vpow2.f32 %v1972_v41  ;;  %v1951_v49 = vsub.f32 0.0, %v1909_v42  ;;  %v2026_v42 = vld [vmem:[%s5259_s9 + $0x20] sm:$0xff] }
 0x218   : > { %5103 = vrcp.f32 %v1991_v45  ;;  %v1950_v50 = vsub.f32 0.0, %v1904_v47  ;;  %v4533_v51 = vpop.f32.mrb[10].mxu1  ;;  %v2027_v45 = vld [vmem:[%s5259_s9 + $0x28] sm:$0xff] }
 0x219   : > { %v5094_v52 = vpop.eup %5093  ;;  %5105 = vrcp.f32 %v1990_v48  ;;  %v1976_v53 = vmul.f32 1.442695, %v1951_v49  ;;  %v1919_v54 = vadd.f32 %v4533_v51, %v5511_v8  ;;  %v1913_v55 = vpop.f32.mrb[11].mxu1 }
 0x21a   : > { %v5096_v56 = vpop.eup %5095  ;;  %v1993_v57 = vadd.f32 1.0, %v5094_v52  ;;  %5107 = vpow2.f32 %v1970_v46  ;;  %v1974_v58 = vmul.f32 1.442695, %v1950_v50  ;;  %v1914_v59 = vadd.f32 %v5511_v8, %v1913_v55 }
 0x21b   : > { %v1992_v60 = vadd.f32 1.0, %v5096_v56  ;;  %5109 = vpow2.f32 %v1976_v53  ;;  %v1953_v61 = vsub.f32 0.0, %v1919_v54  ;;  %v2028_v54 = vld [vmem:[%s5259_s9 + $0x30] sm:$0xff] }
 0x21c   : > { %5111 = vrcp.f32 %v1993_v57  ;;  %v1952_v62 = vsub.f32 0.0, %v1914_v59  ;;  %v4536_v63 = vpop.f32.mrb[12].mxu1  ;;  %v2029_v57 = vld [vmem:[%s5259_s9 + $0x38] sm:$0xff] }
 0x21d   : > { %v5098_v0 = vpop.eup %5097  ;;  %5113 = vrcp.f32 %v1992_v60  ;;  %v1980_v1 = vmul.f32 1.442695, %v1953_v61  ;;  %v1929_v2 = vadd.f32 %v4536_v63, %v5511_v8  ;;  %v1923_v3 = vpop.f32.mrb[13].mxu1  ;;  %v2030_v63 = vld [vmem:[%s5259_s9 + $0x40] sm:$0xff] }
 0x21e   : > { %v5100_v4 = vpop.eup %5099  ;;  %v1995_v5 = vadd.f32 1.0, %v5098_v0  ;;  %5115 = vpow2.f32 %v1974_v58  ;;  %v1978_v6 = vmul.f32 1.442695, %v1952_v62  ;;  %v1924_v7 = vadd.f32 %v5511_v8, %v1923_v3 }
 0x21f   : > { %v1994_v9 = vadd.f32 1.0, %v5100_v4  ;;  %5117 = vpow2.f32 %v1980_v1  ;;  %v1955_v10 = vsub.f32 0.0, %v1929_v2  ;;  %v2031_v2 = vld [vmem:[%s5259_s9 + $0x48] sm:$0xff] }
 0x220   : > { %5119 = vrcp.f32 %v1995_v5  ;;  %v1954_v11 = vsub.f32 0.0, %v1924_v7  ;;  %v4539_v12 = vpop.f32.mrb[14].mxu1  ;;  %v2032_v7 = vld [vmem:[%s5259_s9 + $0x50] sm:$0xff] }
 0x221   : > { %v5102_v13 = vpop.eup %5101  ;;  %5121 = vrcp.f32 %v1994_v9  ;;  %v1984_v14 = vmul.f32 1.442695, %v1955_v10  ;;  %v1939_v15 = vadd.f32 %v4539_v12, %v5511_v8  ;;  %v1933_v16 = vpop.f32.mrb[15].mxu1  ;;  %v2033_v10 = vld [vmem:[%s5259_s9 + $0x58] sm:$0xff] }
 0x222   : > { %v5104_v18 = vpop.eup %5103  ;;  %v1997_v20 = vadd.f32 1.0, %v5102_v13  ;;  %5123 = vpow2.f32 %v1978_v6  ;;  %v1982_v21 = vmul.f32 1.442695, %v1954_v11  ;;  %v1934_v22 = vadd.f32 %v5511_v8, %v1933_v16  ;;  %v2025_v8 = vld [vmem:[%s5259_s9 + $0x18] sm:$0xff]  ;;  %v2034_v13 = vld [vmem:[%s5259_s9 + $0x60] sm:$0xff] }
 0x223   : > { %v5106_v23 = vpop.eup %5105  ;;  %5125 = vpow2.f32 %v1984_v14  ;;  %v1957_v24 = vsub.f32 0.0, %v1939_v15  ;;  %v2039_v29 = vmul.f32 %v5104_v18, %v2023_v19 }
 0x224   : > { %v5108_v25 = vpop.eup %5107  ;;  %v1956_v26 = vsub.f32 0.0, %v1934_v22  ;;  %v2038_v27 = vmul.f32 %v5106_v23, %v2022_v17  ;;  %5127 = vpow2.f32 %v1982_v21  ;;  %v2035_v17 = vld [vmem:[%s5259_s9 + $0x68] sm:$0xff]  ;;  %v2037_v22 = vld [vmem:[%s5259_s9 + $0x78] sm:$0xff] }
 0x225   : > { %v5110_v28 = vpop.eup %5109  ;;  %v1996_v30 = vadd.f32 1.0, %v5108_v25  ;;  %v1988_v31 = vmul.f32 1.442695, %v1957_v24  ;;  %5129 = vrcp.f32 %v1997_v20  ;;  %v2036_v20 = vld [vmem:[%s5259_s9 + $0x70] sm:$0xff] }
 0x226   : > { %v5112_v33 = vpop.eup %5111  ;;  %v1999_v34 = vadd.f32 1.0, %v5110_v28  ;;  %v1986_v35 = vmul.f32 1.442695, %v1956_v26  ;;  %4544 = vmatprep.mubr.msk.f32.mxu1 %vm1526_vm0, %v2038_v27  ;;  %v2292_v26 = vld [vmem:[%s1427_s26] sm:$0xff]  ;;  %v2293_v27 = vld [vmem:[%s1427_s26 + $0x8] sm:$0xff] }
 0x227   : > { %v5114_v36 = vpop.eup %5113  ;;  %5131 = vrcp.f32 %v1996_v30  ;;  %4545 = vmatmul.mubr.msk.f32.vlgmr.msra.gmra.mrb[16].mxu1 %vm1526_vm0, %v2039_v29  ;;  %v2041_v41 = vmul.f32 %v5112_v33, %v2025_v8  ;;  %v4844_v28 = vpack.c.bf16 %v2293_v27, %v2292_v26  ;;  %v2294_v29 = vld [vmem:[%s1427_s26 + $0x10] sm:$0xff]  ;;  %v2295_v30 = vld [vmem:[%s1427_s26 + $0x18] sm:$0xff]  ;;  %v2289_v33 = vld [vmem:[%s5568_s28 + $0x8] sm:$0xff]  ;;  %s1437_s26 = scalar_lea.vmem %s5808_s22, %s5828_s10 }
 0x228   : > { %v5116_v37 = vpop.eup %5115  ;;  %5133 = vrcp.f32 %v1999_v34  ;;  %v2040_v38 = vmul.f32 %v5114_v36, %v2024_v32  ;;  %v2288_v32 = vld [vmem:[%s5568_s28] sm:$0xff] }
 0x229   : > { %v5118_v39 = vpop.eup %5117  ;;  %v1998_v40 = vadd.f32 1.0, %v5116_v37  ;;  %5135 = vpow2.f32 %v1988_v31  ;;  %4845 = vmatprep.subr.bf16.mxu0 %v4844_v28  ;;  %v4848_v31 = vpack.c.bf16 %v2295_v30, %v2294_v29  ;;  %v5572_v34 = vpack.c.bf16 %v2289_v33, %v2288_v32  ;;  %v4205_v36 = vld [vmem:[%s5299_s14] ss:$0 sm:$0xff] }
 0x22a   : > { %v5120_v43 = vpop.eup %5119  ;;  %v2001_v44 = vadd.f32 1.0, %v5118_v39  ;;  %5137 = vpow2.f32 %v1986_v35  ;;  %4547 = vmatprep.mubr.msk.f32.mxu1 %vm1526_vm0, %v2040_v38  ;;  %4847 = vmatpush3.bf16.msra.mxu0 %v4844_v28 }
 0x22b   : > { %v5122_v46 = vpop.eup %5121  ;;  %5139 = vrcp.f32 %v1998_v40  ;;  %4548 = vmatmul.mubr.msk.f32.gmra.mrb[18].mxu1 %vm1526_vm0, %v2041_v41  ;;  %v2043_v51 = vmul.f32 %v5120_v43, %v2027_v45  ;;  %4849 = vmatprep.subr.bf16.mxu0 %v4848_v31 }
 0x22c   : > { %v5124_v47 = vpop.eup %5123  ;;  %v2042_v48 = vmul.f32 %v5122_v46, %v2026_v42  ;;  %5141 = vrcp.f32 %v2001_v44 }
 0x22d   : > { %v5126_v49 = vpop.eup %5125  ;;  %v2000_v50 = vadd.f32 1.0, %v5124_v47 }
 0x22e   : > { %v2003_v52 = vadd.f32 1.0, %v5126_v49  ;;  %4550 = vmatprep.mubr.msk.f32.mxu1 %vm1526_vm0, %v2042_v48  ;;  %v5128_v53 = vpop.eup %5127  ;;  %4851 = vmatpush3.bf16.msra.mxu0 %v4848_v31 }
 0x22f   : > { %5143 = vrcp.f32 %v2000_v50  ;;  %4551 = vmatmul.mubr.msk.f32.gmra.mrb[20].mxu1 %vm1526_vm0, %v2043_v51  ;;  %v5130_v55 = vpop.eup %5129  ;;  %v2002_v56 = vadd.f32 1.0, %v5128_v53  ;;  %4853 = vmatprep.subr.bf16.mxu0 %v5572_v34 }
 0x230   : > { %5145 = vrcp.f32 %v2003_v52  ;;  %v2045_v62 = vmul.f32 %v5130_v55, %v2029_v57 }
 0x231   : > { %v5132_v58 = vpop.eup %5131  ;;  %5147 = vrcp.f32 %v2002_v56 }
 0x232   : > { %v5134_v59 = vpop.eup %5133  ;;  %v2044_v60 = vmul.f32 %v5132_v58, %v2028_v54 }
 0x233   : > { %v5136_v61 = vpop.eup %5135  ;;  %v2047_v6 = vmul.f32 %v5134_v59, %v2031_v2 }
 0x234   : > { %v5138_v0 = vpop.eup %5137  ;;  %v2005_v1 = vadd.f32 1.0, %v5136_v61  ;;  %4553 = vmatprep.mubr.msk.f32.mxu1 %vm1526_vm0, %v2044_v60 }
 0x235   : > { %v5140_v3 = vpop.eup %5139  ;;  %v2004_v4 = vadd.f32 1.0, %v5138_v0  ;;  %4554 = vmatmul.mubr.msk.f32.gmra.mrb[22].mxu1 %vm1526_vm0, %v2045_v62 }
 0x236   : > { %5149 = vrcp.f32 %v2005_v1  ;;  %v2046_v5 = vmul.f32 %v5140_v3, %v2030_v63  ;;  %v5142_v9 = vpop.eup %5141 }
 0x237   : > { %5151 = vrcp.f32 %v2004_v4  ;;  %v2049_v15 = vmul.f32 %v5142_v9, %v2033_v10 }
 0x238   : > { %4556 = vmatprep.mubr.msk.f32.mxu1 %vm1526_vm0, %v2046_v5 }
 0x239   : > { %v5144_v11 = vpop.eup %5143  ;;  %4557 = vmatmul.mubr.msk.f32.gmra.mrb[24].mxu1 %vm1526_vm0, %v2047_v6 }
 0x23a   : > { %v2048_v12 = vmul.f32 %v5144_v11, %v2032_v7  ;;  %v5146_v14 = vpop.eup %5145 }
 0x23b   : > { %v5148_v16 = vpop.eup %5147  ;;  %v2051_v19 = vmul.f32 %v5146_v14, %v2035_v17 }
 0x23c   : > { %4559 = vmatprep.mubr.msk.f32.mxu1 %vm1526_vm0, %v2048_v12  ;;  %v2050_v18 = vmul.f32 %v5148_v16, %v2034_v13 }
 0x23d   : > { %4560 = vmatmul.mubr.msk.f32.gmra.mrb[26].mxu1 %vm1526_vm0, %v2049_v15 }
 0x23e   : > { %4562 = vmatprep.mubr.msk.f32.mxu1 %vm1526_vm0, %v2050_v18 }
 0x240   : > { %v5150_v21 = vpop.eup %5149 }
 0x241   : > { %v5152_v23 = vpop.eup %5151  ;;  %4563 = vmatmul.mubr.msk.f32.gmra.mrb[28].mxu1 %vm1526_vm0, %v2051_v19  ;;  %v2053_v25 = vmul.f32 %v5150_v21, %v2037_v22  ;;  %v2290_v22 = vld [vmem:[%s5568_s28 + $0x10] sm:$0xff] }
 0x242   : > { %v2052_v24 = vmul.f32 %v5152_v23, %v2036_v20  ;;  %v2291_v23 = vld [vmem:[%s5568_s28 + $0x18] sm:$0xff]  ;;  %s5809_s28 = sld [smem:[#allocation2_spill]] }
 0x243   : > { %v4856_v31 = vpack.c.bf16 %v2291_v23, %v2290_v22 }
 0x244   : > { %4565 = vmatprep.mubr.msk.f32.mxu1 %vm1526_vm0, %v2052_v24 }
 0x245   : > { %4566 = vmatmul.mubr.msk.f32.gmra.mrb[30].mxu1 %vm1526_vm0, %v2053_v25 }
 0x2fa   : > { %v4546_v35 = vpop.f32.mrb[16].mxu1 }
 0x2fb   : > { %v2177_v8 = vpop.f32.mrb[17].mxu1  ;;  %v2183_v39 = vadd.f32 %v4546_v35, %v4205_v36 }
 0x2fc   : > { %v2178_v40 = vadd.f32 %v4205_v36, %v2177_v8  ;;  %v2284_v8 = vld [vmem:[%s5264_s13] sm:$0xff] }
 0x2fd   : > { %v2257_v45 = vmax.f32 %v2183_v39, 0.0  ;;  %v4230_v39 = vld [vmem:[%s1430_s11] ss:$0 sm:$0xff]  ;;  %s5812_s11 = sld [smem:[#allocation7_spill]] }
 0x2fe   : > { %v4549_v37 = vpop.f32.mrb[18].mxu1  ;;  %v2256_v47 = vmax.f32 %v2178_v40, 0.0 }
 0x2ff   : > { %v2187_v38 = vpop.f32.mrb[19].mxu1  ;;  %v2193_v49 = vadd.f32 %v4549_v37, %v4205_v36  ;;  %v2285_v37 = vld [vmem:[%s5264_s13 + $0x8] sm:$0xff] }
 0x300   : > { %v2188_v51 = vadd.f32 %v4205_v36, %v2187_v38  ;;  %v2286_v38 = vld [vmem:[%s5264_s13 + $0x10] sm:$0xff] }
 0x301   : > { %v2259_v57 = vmax.f32 %v2193_v49, 0.0 }
 0x302   : > { %v4552_v41 = vpop.f32.mrb[20].mxu1  ;;  %v2258_v59 = vmax.f32 %v2188_v51, 0.0 }
 0x303   : > { %v2203_v42 = vadd.f32 %v4552_v41, %v4205_v36  ;;  %v2197_v43 = vpop.f32.mrb[21].mxu1 }
 0x304   : > { %v2198_v44 = vadd.f32 %v4205_v36, %v2197_v43 }
 0x305   : > { %v2261_v46 = vmax.f32 %v2203_v42, 0.0 }
 0x306   : > { %v2260_v48 = vmax.f32 %v2198_v44, 0.0 }
 0x307   : > { %v2273_v50 = vmax.f32 %v2257_v45, %v2261_v46 }
 0x308   : > { %v2272_v52 = vmax.f32 %v2256_v47, %v2260_v48  ;;  %v4555_v53 = vpop.f32.mrb[22].mxu1 }
 0x309   : > { %v2213_v54 = vadd.f32 %v4555_v53, %v4205_v36  ;;  %v2207_v55 = vpop.f32.mrb[23].mxu1  ;;  %v2641_v53 = vld [vmem:[%s5304_s19 + $0x8] sm:$0xff] }
 0x30a   : > { %v2208_v56 = vadd.f32 %v4205_v36, %v2207_v55  ;;  %v2642_v55 = vld [vmem:[%s5304_s19 + $0x10] sm:$0xff] }
 0x30b   : > { %v2263_v58 = vmax.f32 %v2213_v54, 0.0 }
 0x30c   : > { %v2262_v60 = vmax.f32 %v2208_v56, 0.0  ;;  %v4558_v61 = vpop.f32.mrb[24].mxu1  ;;  %v2643_v56 = vld [vmem:[%s5304_s19 + $0x18] sm:$0xff] }
 0x30d   : > { %v2275_v62 = vmax.f32 %v2259_v57, %v2263_v58  ;;  %v2217_v63 = vpop.f32.mrb[25].mxu1  ;;  %v2223_v3 = vadd.f32 %v4558_v61, %v4205_v36  ;;  %v4864_v57 = vpack.c.bf16 %v2643_v56, %v2642_v55  ;;  %v2764_v58 = vld [vmem:[%s1447_s18] sm:$0xff]  ;;  %v2759_v55 = vld [vmem:[%s5616_s15 + $0x18] sm:$0xff] }
 0x30e   : > { %v2274_v0 = vmax.f32 %v2258_v59, %v2262_v60  ;;  %v2218_v4 = vadd.f32 %v4205_v36, %v2217_v63  ;;  %v2765_v59 = vld [vmem:[%s1447_s18 + $0x8] sm:$0xff]  ;;  %v2766_v60 = vld [vmem:[%s1447_s18 + $0x10] sm:$0xff] }
 0x30f   : > { %v2265_v10 = vmax.f32 %v2223_v3, 0.0  ;;  %v4868_v61 = vpack.c.bf16 %v2765_v59, %v2764_v58  ;;  %v2770_v3 = vld [vmem:[%s1447_s18 + $0x30] sm:$0xff] }
 0x310   : > { %v4561_v1 = vpop.f32.mrb[26].mxu1  ;;  %v2264_v13 = vmax.f32 %v2218_v4, 0.0  ;;  %v2771_v4 = vld [vmem:[%s1447_s18 + $0x38] sm:$0xff] }
 0x311   : > { %v2227_v2 = vpop.f32.mrb[27].mxu1  ;;  %v2233_v11 = vadd.f32 %v4561_v1, %v4205_v36  ;;  %v2769_v1 = vld [vmem:[%s1447_s18 + $0x28] sm:$0xff]  ;;  %4869 = vmatprep.subr.bf16.mxu1 %v4868_v61 }
 0x312   : > { %v2228_v14 = vadd.f32 %v4205_v36, %v2227_v2  ;;  %4871 = vmatpush3.bf16.msra.mxu1 %v4868_v61 }
 0x313   : > { %v2267_v24 = vmax.f32 %v2233_v11, 0.0 }
 0x314   : > { %v4564_v5 = vpop.f32.mrb[28].mxu1  ;;  %v2266_v27 = vmax.f32 %v2228_v14, 0.0 }
 0x315   : > { %v2243_v6 = vadd.f32 %v4564_v5, %v4205_v36  ;;  %v2237_v7 = vpop.f32.mrb[29].mxu1  ;;  %v4880_v5 = vpack.c.bf16 %v2771_v4, %v2770_v3  ;;  %v2752_v4 = vld [vmem:[%s5813_s16] sm:$0xff] }
 0x316   : > { %v2238_v9 = vadd.f32 %v4205_v36, %v2237_v7 }
 0x317   : > { %v2269_v12 = vmax.f32 %v2243_v6, 0.0  ;;  %v4231_v6 = vld [vmem:[%s1437_s26] ss:$0 sm:$0xff]  ;;  %s5815_s26 = sld [smem:[#allocation8_spill]] }
 0x318   : > { %v2268_v15 = vmax.f32 %v2238_v9, 0.0  ;;  %v4567_v16 = vpop.f32.mrb[30].mxu1 }
 0x319   : > { %v2277_v17 = vmax.f32 %v2265_v10, %v2269_v12  ;;  %v2253_v18 = vadd.f32 %v4567_v16, %v4205_v36  ;;  %v2247_v19 = vpop.f32.mrb[31].mxu1 }
 0x31a   : > { %v2276_v20 = vmax.f32 %v2264_v13, %v2268_v15  ;;  %v2248_v21 = vadd.f32 %v4205_v36, %v2247_v19  ;;  %v2506_v36 = vld [vmem:[%s1434_s2] sm:$0xff]  ;;  %s5811_s2 = sld [smem:[#allocation14_spill]] }
 0x31b   : > { %v2281_v25 = vmax.f32 %v2273_v50, %v2277_v17  ;;  %v2271_v26 = vmax.f32 %v2253_v18, 0.0 }
 0x31c   : > { %v2280_v28 = vmax.f32 %v2272_v52, %v2276_v20  ;;  %v2270_v29 = vmax.f32 %v2248_v21, 0.0  ;;  %v2640_v52 = vld [vmem:[%s5304_s19] sm:$0xff] }
 0x31d   : > { %v2279_v30 = vmax.f32 %v2267_v24, %v2271_v26  ;;  %v4860_v54 = vpack.c.bf16 %v2641_v53, %v2640_v52 }
 0x31e   : > { %v2278_v32 = vmax.f32 %v2266_v27, %v2270_v29  ;;  %4576 = vmatprep.mubr.msk.f32.mxu0 %vm2296_vm3, %v2280_v28 }
 0x31f   : > { %v2283_v33 = vmax.f32 %v2275_v62, %v2279_v30  ;;  %4577 = vmatmul.mubr.msk.f32.vlgmr.msra.gmra.mrb[16].mxu0 %vm2296_vm3, %v2281_v25  ;;  %v2767_v62 = vld [vmem:[%s1447_s18 + $0x18] sm:$0xff] }
 0x320   : > { %v2282_v35 = vmax.f32 %v2274_v0, %v2278_v32  ;;  %4855 = vmatpush3.bf16.msra.mxu0 %v5572_v34  ;;  %v2287_v34 = vld [vmem:[%s5264_s13 + $0x18] sm:$0xff]  ;;  %v4872_v63 = vpack.c.bf16 %v2767_v62, %v2766_v60  ;;  %v2768_v0 = vld [vmem:[%s1447_s18 + $0x20] sm:$0xff]  ;;  %s1455_s18 = scalar_lea.vmem %s5811_s2, %s4274_s0  ;;  %s5814_s0 = sld [smem:[#allocation13_spill]] }
 0x321   : > { %4857 = vmatprep.subr.bf16.mxu0 %v4856_v31  ;;  %v4876_v2 = vpack.c.bf16 %v2769_v1, %v2768_v0  ;;  %v2632_v32 = vld [vmem:[%s5809_s28] sm:$0xff]  ;;  %v2761_v0 = vld [vmem:[%s5616_s15 + $0x28] sm:$0xff]  ;;  %s5657_s2 = sshll.u32 %s5828_s10, 7 }
 0x322   : > { %4579 = vmatprep.mubr.msk.f32.mxu0 %vm2296_vm3, %v2282_v35  ;;  %4873 = vmatprep.subr.bf16.mxu1 %v4872_v63  ;;  %v2633_v35 = vld [vmem:[%s5809_s28 + $0x8] sm:$0xff] }
 0x323   : > { %4580 = vmatmul.mubr.msk.f32.gmra.mrb[18].mxu0 %vm2296_vm3, %v2283_v33  ;;  %4875 = vmatpush3.bf16.msra.mxu1 %v4872_v63  ;;  %v2760_v63 = vld [vmem:[%s5616_s15 + $0x20] sm:$0xff] }
 0x324   : > { %4859 = vmatpush3.bf16.msra.mxu0 %v4856_v31  ;;  %4590 = vmatprep.mubr.msk.f32.mxu0 %vm2296_vm3, %v2284_v8  ;;  %v4892_v3 = vpack.c.bf16 %v2761_v0, %v2760_v63 }
 0x325   : > { %4596 = vmatprep.subr.mxu0 %v2506_v36  ;;  %4877 = vmatprep.subr.bf16.mxu1 %v4876_v2 }
 0x326   : > { %s1450_s22 = scalar_lea.vmem %s5814_s0, %s5828_s10  ;;  %s5818_s0 = sld [smem:[#allocation4_spill]] }
 0x327   : > { %4591 = vmatmul.mubr.msk.f32.vlgmr.msra.gmra.mrb[16].mxu0 %vm2296_vm3, %v2285_v37  ;;  %4879 = vmatpush3.bf16.msra.mxu1 %v4876_v2 }
 0x328   : > { %4593 = vmatprep.mubr.msk.f32.mxu0 %vm2296_vm3, %v2286_v38  ;;  %4597 = vmatpush3.msra.mxu0 %v2506_v36  ;;  %v2634_v38 = vld [vmem:[%s5809_s28 + $0x10] sm:$0xff] }
 0x329   : > { %4861 = vmatprep.subr.bf16.mxu0 %v4860_v54  ;;  %4881 = vmatprep.subr.bf16.mxu1 %v4880_v5 }
 0x32b   : > { %4594 = vmatmul.mubr.msk.f32.gmra.mrb[18].mxu0 %vm2296_vm3, %v2287_v34  ;;  %4883 = vmatpush3.bf16.msra.mxu1 %v4880_v5  ;;  %v2762_v5 = vld [vmem:[%s5616_s15 + $0x30] sm:$0xff] }
 0x3fa   : > { %v4592_v40 = vpop.f32.mrb[16].mxu0 }
 0x3fb   : > { %v2499_v41 = vadd.f32 %v4592_v40, %v4230_v39  ;;  %v2472_v42 = vpop.f32.mrb[17].mxu0 }
 0x3fc   : > { %v2498_v43 = vadd.f32 %v4230_v39, %v2472_v42 }
 0x3fd   : > { %v2503_v46 = vmax.f32 %v2499_v41, 0.0 }
 0x3fe   : > { %v2502_v44 = vmax.f32 %v2498_v43, 0.0  ;;  %v4595_v45 = vpop.f32.mrb[18].mxu0  ;;  %v2756_v43 = vld [vmem:[%s5616_s15] sm:$0xff] }
 0x3ff   : > { %v2501_v47 = vadd.f32 %v4595_v45, %v4230_v39  ;;  %v2482_v48 = vpop.f32.mrb[19].mxu0 }
 0x400   : > { %v2500_v49 = vadd.f32 %v4230_v39, %v2482_v48  ;;  %4598 = vmatprep.mubr.msk.f32.mxu0 %vm2514_vm4, %v2502_v44  ;;  %v2635_v39 = vld [vmem:[%s5809_s28 + $0x18] sm:$0xff]  ;;  %v2757_v44 = vld [vmem:[%s5616_s15 + $0x8] sm:$0xff] }
 0x401   : > { %4599 = vmatmul.mubr.msk.f32.vlgmr.msra.gmra.mrb[20].mxu0 %vm2514_vm4, %v2503_v46  ;;  %v2505_v51 = vmax.f32 %v2501_v47, 0.0  ;;  %v4884_v45 = vpack.c.bf16 %v2757_v44, %v2756_v43  ;;  %v2982_v46 = vld [vmem:[%s1455_s18] sm:$0xff]  ;;  %v2983_v47 = vld [vmem:[%s1455_s18 + $0x8] sm:$0xff] }
 0x402   : > { %v2504_v50 = vmax.f32 %v2500_v49, 0.0  ;;  %4863 = vmatpush3.bf16.msra.mxu0 %v4860_v54  ;;  %v4900_v48 = vpack.c.bf16 %v2983_v47, %v2982_v46  ;;  %v4236_v49 = vld [vmem:[%s5812_s11] ss:$0 sm:$0xff]  ;;  %v2758_v54 = vld [vmem:[%s5616_s15 + $0x10] sm:$0xff]  ;;  %s5661_s11 = scalar_lea.vmem %s5816_s1, %s5657_s2  ;;  %s5820_s1 = sld [smem:[#allocation19_spill]] }
 0x403   : > { %4865 = vmatprep.subr.bf16.mxu0 %v4864_v57  ;;  %4885 = vmatprep.subr.bf16.mxu1 %v4884_v45  ;;  %v4888_v61 = vpack.c.bf16 %v2759_v55, %v2758_v54  ;;  %v3257_v43 = vld [vmem:[%s5661_s11 + $0x28] sm:$0xff]  ;;  %v3259_v46 = vld [vmem:[%s5661_s11 + $0x38] sm:$0xff]  ;;  %v3264_v54 = vld [vmem:[%s5661_s11 + $0x60] sm:$0xff] }
 0x404   : > { %4601 = vmatprep.mubr.msk.f32.mxu0 %vm2514_vm4, %v2504_v50  ;;  %v3265_v55 = vld [vmem:[%s5661_s11 + $0x68] sm:$0xff] }
 0x405   : > { %4602 = vmatmul.mubr.msk.f32.gmra.mrb[22].mxu0 %vm2514_vm4, %v2505_v51 }
 0x406   : > { %4867 = vmatpush3.bf16.msra.mxu0 %v4864_v57 }
 0x407   : > { %4901 = vmatprep.subr.bf16.mxu0 %v4900_v48 }
 0x4d4   : > { %v4600_v7 = vpop.f32.mrb[20].mxu0 }
 0x4d5   : > { %v2599_v9 = vadd.f32 %v4600_v7, %v4231_v6  ;;  %v2593_v10 = vpop.f32.mrb[21].mxu0 }
 0x4d6   : > { %v2594_v11 = vadd.f32 %v4231_v6, %v2593_v10  ;;  %v2754_v10 = vld [vmem:[%s5813_s16 + $0x10] sm:$0xff] }
 0x4d7   : > { %v2613_v12 = vsub.f32 0.0, %v2599_v9  ;;  %v2753_v9 = vld [vmem:[%s5813_s16 + $0x8] sm:$0xff] }
 0x4d8   : > { %v2612_v13 = vsub.f32 0.0, %v2594_v11  ;;  %v4603_v14 = vpop.f32.mrb[22].mxu0  ;;  %v2755_v11 = vld [vmem:[%s5813_s16 + $0x18] sm:$0xff] }
 0x4d9   : > { %v2618_v15 = vmul.f32 1.442695, %v2613_v12  ;;  %v2609_v16 = vadd.f32 %v4603_v14, %v4231_v6  ;;  %v2603_v17 = vpop.f32.mrb[23].mxu0  ;;  %v4249_v12 = vld [vmem:[%s1450_s22] ss:$0 sm:$0xff]  ;;  %s5819_s22 = sld [smem:[#allocation16_spill]] }
 0x4da   : > { %v2616_v18 = vmul.f32 1.442695, %v2612_v13  ;;  %v2604_v19 = vadd.f32 %v4231_v6, %v2603_v17  ;;  %v2763_v6 = vld [vmem:[%s5616_s15 + $0x38] sm:$0xff]  ;;  %s5817_s15 = sld [smem:[#allocation15_spill]] }
 0x4db   : > { %5153 = vpow2.f32 %v2618_v15  ;;  %v2615_v20 = vsub.f32 0.0, %v2609_v16  ;;  %v4896_v7 = vpack.c.bf16 %v2763_v6, %v2762_v5 }
 0x4dc   : > { %5155 = vpow2.f32 %v2616_v18  ;;  %v2614_v21 = vsub.f32 0.0, %v2604_v19 }
 0x4dd   : > { %v2622_v22 = vmul.f32 1.442695, %v2615_v20 }
 0x4de   : > { %v2620_v23 = vmul.f32 1.442695, %v2614_v21 }
 0x4df   : > { %5157 = vpow2.f32 %v2622_v22 }
 0x4e0   : > { %5159 = vpow2.f32 %v2620_v23  ;;  %s1458_s18 = scalar_lea.vmem %s5817_s15, %s5828_s10  ;;  %s5821_s15 = sld [smem:[#allocation9_spill]] }
 0x4e5   : > { %v5154_v24 = vpop.eup %5153 }
 0x4e6   : > { %v5156_v25 = vpop.eup %5155  ;;  %v2625_v26 = vadd.f32 1.0, %v5154_v24 }
 0x4e7   : > { %v2624_v27 = vadd.f32 1.0, %v5156_v25  ;;  %v3116_v25 = vld [vmem:[%s5815_s26] sm:$0xff] }
 0x4e8   : > { %5161 = vrcp.f32 %v2625_v26  ;;  %v3117_v26 = vld [vmem:[%s5815_s26 + $0x8] sm:$0xff] }
 0x4e9   : > { %v5158_v28 = vpop.eup %5157  ;;  %5163 = vrcp.f32 %v2624_v27  ;;  %v4904_v27 = vpack.c.bf16 %v3117_v26, %v3116_v25  ;;  %v3110_v25 = vld [vmem:[%s5818_s0 + $0x10] sm:$0xff] }
 0x4ea   : > { %v5160_v29 = vpop.eup %5159  ;;  %v2627_v30 = vadd.f32 1.0, %v5158_v28  ;;  %v3118_v28 = vld [vmem:[%s5815_s26 + $0x10] sm:$0xff] }
 0x4eb   : > { %v2626_v31 = vadd.f32 1.0, %v5160_v29  ;;  %v3119_v29 = vld [vmem:[%s5815_s26 + $0x18] sm:$0xff] }
 0x4ec   : > { %5165 = vrcp.f32 %v2627_v30  ;;  %v4908_v30 = vpack.c.bf16 %v3119_v29, %v3118_v28 }
 0x4ed   : > { %5167 = vrcp.f32 %v2626_v31  ;;  %v3120_v31 = vld [vmem:[%s5815_s26 + $0x20] sm:$0xff] }
 0x4f2   : > { %v5162_v33 = vpop.eup %5161 }
 0x4f3   : > { %v5164_v8 = vpop.eup %5163  ;;  %v2637_v37 = vmul.f32 %v5162_v33, %v2633_v35  ;;  %v3122_v35 = vld [vmem:[%s5815_s26 + $0x30] sm:$0xff] }
 0x4f4   : > { %v2636_v36 = vmul.f32 %v5164_v8, %v2632_v32  ;;  %v3121_v32 = vld [vmem:[%s5815_s26 + $0x28] sm:$0xff]  ;;  %v3123_v8 = vld [vmem:[%s5815_s26 + $0x38] sm:$0xff] }
 0x4f5   : > { %v4912_v33 = vpack.c.bf16 %v3121_v32, %v3120_v31  ;;  %v3266_v31 = vld [vmem:[%s5661_s11 + $0x70] sm:$0xff]  ;;  %v3267_v32 = vld [vmem:[%s5661_s11 + $0x78] sm:$0xff] }
 0x4f6   : > { %v5166_v34 = vpop.eup %5165  ;;  %4612 = vmatprep.mubr.msk.f32.mxu0 %vm2296_vm3, %v2636_v36  ;;  %v4916_v36 = vpack.c.bf16 %v3123_v8, %v3122_v35 }
 0x4f7   : > { %v5168_v40 = vpop.eup %5167  ;;  %4613 = vmatmul.mubr.msk.f32.vlgmr.msra.gmra.mrb[24].mxu0 %vm2296_vm3, %v2637_v37  ;;  %v2639_v42 = vmul.f32 %v5166_v34, %v2635_v39  ;;  %v3252_v37 = vld [vmem:[%s5661_s11] sm:$0xff]  ;;  %v3254_v34 = vld [vmem:[%s5661_s11 + $0x10] sm:$0xff] }
 0x4f8   : > { %v2638_v41 = vmul.f32 %v5168_v40, %v2634_v38  ;;  %4903 = vmatpush3.bf16.msra.mxu0 %v4900_v48  ;;  %v3253_v38 = vld [vmem:[%s5661_s11 + $0x8] sm:$0xff]  ;;  %v3255_v40 = vld [vmem:[%s5661_s11 + $0x18] sm:$0xff]  ;;  %v3260_v48 = vld [vmem:[%s5661_s11 + $0x40] sm:$0xff] }
 0x4f9   : > { %4905 = vmatprep.subr.bf16.mxu0 %v4904_v27  ;;  %v4920_v39 = vpack.c.bf16 %v3253_v38, %v3252_v37 }
 0x4fa   : > { %4615 = vmatprep.mubr.msk.f32.mxu0 %vm2296_vm3, %v2638_v41  ;;  %v4924_v41 = vpack.c.bf16 %v3255_v40, %v3254_v34 }
 0x4fb   : > { %4616 = vmatmul.mubr.msk.f32.gmra.mrb[26].mxu0 %vm2296_vm3, %v2639_v42  ;;  %v3256_v42 = vld [vmem:[%s5661_s11 + $0x20] sm:$0xff] }
 0x4fc   : > { %v4928_v44 = vpack.c.bf16 %v3257_v43, %v3256_v42 }
 0x5ca   : > { %v4614_v50 = vpop.f32.mrb[24].mxu0 }
 0x5cb   : > { %v2735_v51 = vadd.f32 %v4614_v50, %v4236_v49  ;;  %v2729_v52 = vpop.f32.mrb[25].mxu0 }
 0x5cc   : > { %v2730_v53 = vadd.f32 %v4236_v49, %v2729_v52  ;;  %v3263_v52 = vld [vmem:[%s5661_s11 + $0x58] sm:$0xff] }
 0x5cd   : > { %v2749_v58 = vmax.f32 %v2735_v51, 0.0  ;;  %v3262_v51 = vld [vmem:[%s5661_s11 + $0x50] sm:$0xff] }
 0x5ce   : > { %v2748_v56 = vmax.f32 %v2730_v53, 0.0  ;;  %v4617_v57 = vpop.f32.mrb[26].mxu0  ;;  %v4940_v53 = vpack.c.bf16 %v3263_v52, %v3262_v51 }
 0x5cf   : > { %v2745_v59 = vadd.f32 %v4617_v57, %v4236_v49  ;;  %v2739_v60 = vpop.f32.mrb[27].mxu0  ;;  %v4250_v57 = vld [vmem:[%s1458_s18] ss:$0 sm:$0xff]  ;;  %s5691_s18 = scalar_lea.vmem %s5819_s22, %s5657_s2  ;;  %s5823_s22 = sld [smem:[#allocation18_spill]] }
 0x5d0   : > { %v2740_v62 = vadd.f32 %v4236_v49, %v2739_v60  ;;  %4634 = vmatprep.mubr.msk.f32.mxu1 %vm2772_vm5, %v2748_v56  ;;  %v3261_v49 = vld [vmem:[%s5661_s11 + $0x48] sm:$0xff]  ;;  %v4944_v56 = vpack.c.bf16 %v3265_v55, %v3264_v54  ;;  %v3236_v35 = vld [vmem:[%s5691_s18] sm:$0xff] }
 0x5d1   : > { %4635 = vmatmul.mubr.msk.f32.vlgmr.msra.gmra.mrb[32].mxu1 %vm2772_vm5, %v2749_v58  ;;  %v2751_v2 = vmax.f32 %v2745_v59, 0.0  ;;  %v4936_v50 = vpack.c.bf16 %v3261_v49, %v3260_v48  ;;  %v3237_v8 = vld [vmem:[%s5691_s18 + $0x8] sm:$0xff] }
 0x5d2   : > { %v2750_v1 = vmax.f32 %v2740_v62, 0.0  ;;  %4887 = vmatpush3.bf16.msra.mxu1 %v4884_v45  ;;  %v3258_v45 = vld [vmem:[%s5661_s11 + $0x30] sm:$0xff]  ;;  %s5822_s11 = sld [smem:[#allocation5_spill]]  ;;  %v3241_v54 = vld [vmem:[%s5691_s18 + $0x28] sm:$0xff] }
 0x5d3   : > { %4889 = vmatprep.subr.bf16.mxu1 %v4888_v61  ;;  %v4932_v47 = vpack.c.bf16 %v3259_v46, %v3258_v45  ;;  %v3239_v45 = vld [vmem:[%s5691_s18 + $0x18] sm:$0xff] }
 0x5d4   : > { %4637 = vmatprep.mubr.msk.f32.mxu1 %vm2772_vm5, %v2750_v1 }
 0x5d5   : > { %4638 = vmatmul.mubr.msk.f32.gmra.mrb[34].mxu1 %vm2772_vm5, %v2751_v2 }
 0x5d6   : > { %4891 = vmatpush3.bf16.msra.mxu1 %v4888_v61  ;;  %4656 = vmatprep.mubr.msk.f32.mxu1 %vm2772_vm5, %v2752_v4 }
 0x5d7   : > { %4893 = vmatprep.subr.bf16.mxu1 %v4892_v3 }
 0x5da   : > { %4895 = vmatpush3.bf16.msra.mxu1 %v4892_v3 }
 0x5db   : > { %4897 = vmatprep.subr.bf16.mxu1 %v4896_v7 }
 0x5de   : > { %4899 = vmatpush3.bf16.msra.mxu1 %v4896_v7 }
 0x5df   : > { %4921 = vmatprep.subr.bf16.mxu1 %v4920_v39 }
 0x5e1   : > { %4657 = vmatmul.mubr.msk.f32.vlgmr.msra.gmra.mrb[32].mxu1 %vm2772_vm5, %v2753_v9 }
 0x5e2   : > { %4659 = vmatprep.mubr.msk.f32.mxu1 %vm2772_vm5, %v2754_v10  ;;  %4923 = vmatpush3.bf16.msra.mxu1 %v4920_v39  ;;  %v4255_v39 = vld [vmem:[%s5821_s15] ss:$0 sm:$0xff]  ;;  %s5824_s15 = sld [smem:[#allocation21_spill]] }
 0x5e3   : > { %4925 = vmatprep.subr.bf16.mxu1 %v4924_v41 }
 0x5e5   : > { %4660 = vmatmul.mubr.msk.f32.gmra.mrb[34].mxu1 %vm2772_vm5, %v2755_v11 }
 0x5e6   : > { %4927 = vmatpush3.bf16.msra.mxu1 %v4924_v41 }
 0x5e7   : > { %4929 = vmatprep.subr.bf16.mxu1 %v4928_v44 }
 0x5ea   : > { %4931 = vmatpush3.bf16.msra.mxu1 %v4928_v44  ;;  %v3238_v44 = vld [vmem:[%s5691_s18 + $0x10] sm:$0xff] }
 0x5eb   : > { %4933 = vmatprep.subr.bf16.mxu1 %v4932_v47  ;;  %v4956_v51 = vpack.c.bf16 %v3239_v45, %v3238_v44 }
 0x5ee   : > { %4935 = vmatpush3.bf16.msra.mxu1 %v4932_v47 }
 0x5ef   : > { %4937 = vmatprep.subr.bf16.mxu1 %v4936_v50 }
 0x5f2   : > { %4939 = vmatpush3.bf16.msra.mxu1 %v4936_v50 }
 0x5f3   : > { %4941 = vmatprep.subr.bf16.mxu1 %v4940_v53 }
 0x5f6   : > { %4943 = vmatpush3.bf16.msra.mxu1 %v4940_v53  ;;  %v3240_v53 = vld [vmem:[%s5691_s18 + $0x20] sm:$0xff] }
 0x5f7   : > { %4945 = vmatprep.subr.bf16.mxu1 %v4944_v56 }
 0x5fa   : > { %4947 = vmatpush3.bf16.msra.mxu1 %v4944_v56 }
 0x6b4   : > { %v4658_v13 = vpop.f32.mrb[32].mxu1 }
 0x6b5   : > { %v2975_v14 = vadd.f32 %v4658_v13, %v4249_v12  ;;  %v2948_v15 = vpop.f32.mrb[33].mxu1 }
 0x6b6   : > { %v2974_v16 = vadd.f32 %v4249_v12, %v2948_v15 }
 0x6b7   : > { %v2979_v19 = vmax.f32 %v2975_v14, 0.0 }
 0x6b8   : > { %v2978_v17 = vmax.f32 %v2974_v16, 0.0  ;;  %v4661_v18 = vpop.f32.mrb[34].mxu1 }
 0x6b9   : > { %v2977_v20 = vadd.f32 %v4661_v18, %v4249_v12  ;;  %v2958_v21 = vpop.f32.mrb[35].mxu1 }
 0x6ba   : > { %v2976_v22 = vadd.f32 %v4249_v12, %v2958_v21  ;;  %4666 = vmatprep.mubr.msk.f32.mxu0 %vm1526_vm0, %v2978_v17  ;;  %v3109_v21 = vld [vmem:[%s5818_s0 + $0x8] sm:$0xff] }
 0x6bb   : > { %4667 = vmatmul.mubr.msk.f32.vlgmr.msra.gmra.mrb[28].mxu0 %vm1526_vm0, %v2979_v19  ;;  %v2981_v24 = vmax.f32 %v2977_v20, 0.0  ;;  %v3108_v19 = vld [vmem:[%s5818_s0] sm:$0xff] }
 0x6bc   : > { %v2980_v23 = vmax.f32 %v2976_v22, 0.0  ;;  %4907 = vmatpush3.bf16.msra.mxu0 %v4904_v27  ;;  %v3111_v27 = vld [vmem:[%s5818_s0 + $0x18] sm:$0xff]  ;;  %s5697_s0 = scalar_lea.vmem %s5820_s1, %s5562_s23  ;;  %s1471_s1 = scalar_lea.vmem %s5823_s22, %s5828_s10 }
 0x6bd   : > { %4909 = vmatprep.subr.bf16.mxu0 %v4908_v30  ;;  %v3453_v37 = vld [vmem:[%s5697_s0] sm:$0xff]  ;;  %v3454_v38 = vld [vmem:[%s5697_s0 + $0x8] sm:$0xff] }
 0x6be   : > { %4669 = vmatprep.mubr.msk.f32.mxu0 %vm1526_vm0, %v2980_v23  ;;  %v4984_v34 = vpack.c.bf16 %v3454_v38, %v3453_v37 }
 0x6bf   : > { %4670 = vmatmul.mubr.msk.f32.gmra.mrb[30].mxu0 %vm1526_vm0, %v2981_v24 }
 0x6c0   : > { %4911 = vmatpush3.bf16.msra.mxu0 %v4908_v30 }
 0x6c1   : > { %4913 = vmatprep.subr.bf16.mxu0 %v4912_v33 }
 0x6c4   : > { %4915 = vmatpush3.bf16.msra.mxu0 %v4912_v33  ;;  %v4948_v33 = vpack.c.bf16 %v3267_v32, %v3266_v31 }
 0x6c5   : > { %4917 = vmatprep.subr.bf16.mxu0 %v4916_v36 }
 0x6c6   : > { %4949 = vmatprep.subr.bf16.mxu1 %v4948_v33 }
 0x6c7   : > { %4951 = vmatpush3.bf16.msra.mxu1 %v4948_v33 }
 0x6c8   : > { %4919 = vmatpush3.bf16.msra.mxu0 %v4916_v36  ;;  %v4952_v36 = vpack.c.bf16 %v3237_v8, %v3236_v35 }
 0x6c9   : > { %4985 = vmatprep.subr.bf16.mxu0 %v4984_v34 }
 0x6ca   : > { %4953 = vmatprep.subr.bf16.mxu1 %v4952_v36 }
 0x78e   : > { %v4668_v58 = vpop.f32.mrb[28].mxu0 }
 0x78f   : > { %v3075_v59 = vadd.f32 %v4668_v58, %v4250_v57  ;;  %v3069_v60 = vpop.f32.mrb[29].mxu0  ;;  %v3232_v58 = vld [vmem:[%s5822_s11] sm:$0xff] }
 0x790   : > { %v3070_v61 = vadd.f32 %v4250_v57, %v3069_v60  ;;  %v3243_v60 = vld [vmem:[%s5691_s18 + $0x38] sm:$0xff] }
 0x791   : > { %v3089_v62 = vsub.f32 0.0, %v3075_v59  ;;  %v3242_v59 = vld [vmem:[%s5691_s18 + $0x30] sm:$0xff] }
 0x792   : > { %v3088_v63 = vsub.f32 0.0, %v3070_v61  ;;  %v4671_v0 = vpop.f32.mrb[30].mxu0  ;;  %v4964_v61 = vpack.c.bf16 %v3243_v60, %v3242_v59 }
 0x793   : > { %v3094_v1 = vmul.f32 1.442695, %v3089_v62  ;;  %v3085_v2 = vadd.f32 %v4671_v0, %v4250_v57  ;;  %v3079_v3 = vpop.f32.mrb[31].mxu0  ;;  %v3244_v62 = vld [vmem:[%s5691_s18 + $0x40] sm:$0xff] }
 0x794   : > { %v3092_v4 = vmul.f32 1.442695, %v3088_v63  ;;  %v3080_v5 = vadd.f32 %v4250_v57, %v3079_v3  ;;  %v4960_v57 = vpack.c.bf16 %v3241_v54, %v3240_v53  ;;  %v3245_v63 = vld [vmem:[%s5691_s18 + $0x48] sm:$0xff] }
 0x795   : > { %5169 = vpow2.f32 %v3094_v1  ;;  %v3091_v6 = vsub.f32 0.0, %v3085_v2  ;;  %v4968_v0 = vpack.c.bf16 %v3245_v63, %v3244_v62  ;;  %v3246_v1 = vld [vmem:[%s5691_s18 + $0x50] sm:$0xff]  ;;  %v3247_v2 = vld [vmem:[%s5691_s18 + $0x58] sm:$0xff] }
 0x796   : > { %5171 = vpow2.f32 %v3092_v4  ;;  %v3090_v7 = vsub.f32 0.0, %v3080_v5  ;;  %v4972_v3 = vpack.c.bf16 %v3247_v2, %v3246_v1  ;;  %v3248_v4 = vld [vmem:[%s5691_s18 + $0x60] sm:$0xff]  ;;  %v3249_v5 = vld [vmem:[%s5691_s18 + $0x68] sm:$0xff] }
 0x797   : > { %v3098_v9 = vmul.f32 1.442695, %v3091_v6  ;;  %v4976_v6 = vpack.c.bf16 %v3249_v5, %v3248_v4 }
 0x798   : > { %v3096_v10 = vmul.f32 1.442695, %v3090_v7  ;;  %v3250_v7 = vld [vmem:[%s5691_s18 + $0x70] sm:$0xff] }
 0x799   : > { %5173 = vpow2.f32 %v3098_v9  ;;  %v3251_v9 = vld [vmem:[%s5691_s18 + $0x78] sm:$0xff]  ;;  %s5750_s18 = scalar_lea.vmem %s5429_s21, %s5562_s23 }
 0x79a   : > { %5175 = vpow2.f32 %v3096_v10  ;;  %v4980_v10 = vpack.c.bf16 %v3251_v9, %v3250_v7  ;;  %v3701_v53 = vld [vmem:[%s5750_s18] sm:$0xff]  ;;  %v3702_v54 = vld [vmem:[%s5750_s18 + $0x8] sm:$0xff] }
 0x79f   : > { %v5170_v11 = vpop.eup %5169 }
 0x7a0   : > { %v5172_v12 = vpop.eup %5171  ;;  %v3101_v13 = vadd.f32 1.0, %v5170_v11  ;;  %v3233_v11 = vld [vmem:[%s5822_s11 + $0x8] sm:$0xff] }
 0x7a1   : > { %v3100_v14 = vadd.f32 1.0, %v5172_v12  ;;  %v3234_v12 = vld [vmem:[%s5822_s11 + $0x10] sm:$0xff] }
 0x7a2   : > { %5177 = vrcp.f32 %v3101_v13  ;;  %v3235_v13 = vld [vmem:[%s5822_s11 + $0x18] sm:$0xff] }
 0x7a3   : > { %v5174_v15 = vpop.eup %5173  ;;  %5179 = vrcp.f32 %v3100_v14  ;;  %v3455_v14 = vld [vmem:[%s5697_s0 + $0x10] sm:$0xff] }
 0x7a4   : > { %v5176_v16 = vpop.eup %5175  ;;  %v3103_v17 = vadd.f32 1.0, %v5174_v15  ;;  %v3456_v15 = vld [vmem:[%s5697_s0 + $0x18] sm:$0xff]  ;;  %s5730_s0 = scalar_lea.vmem %s5824_s15, %s5657_s2  ;;  %s5825_s2 = sld [smem:[#allocation20_spill]] }
 0x7a5   : > { %v3102_v18 = vadd.f32 1.0, %v5176_v16  ;;  %v4988_v16 = vpack.c.bf16 %v3456_v15, %v3455_v14  ;;  %v3590_v31 = vld [vmem:[%s5730_s0 + $0x8] sm:$0xff]  ;;  %v3591_v33 = vld [vmem:[%s5730_s0 + $0x10] sm:$0xff]  ;;  %v3592_v35 = vld [vmem:[%s5730_s0 + $0x18] sm:$0xff]  ;;  %s1487_s15 = scalar_lea.vmem %s5424_s30, %s5828_s10 }
 0x7a6   : > { %5181 = vrcp.f32 %v3103_v17  ;;  %v4260_v17 = vld [vmem:[%s1471_s1] ss:$0 sm:$0xff]  ;;  %v4996_v8 = vpack.c.bf16 %v3592_v35, %v3591_v33  ;;  %v3594_v37 = vld [vmem:[%s5730_s0 + $0x28] sm:$0xff]  ;;  %v3599_v44 = vld [vmem:[%s5730_s0 + $0x50] sm:$0xff]  ;;  %s5826_s1 = sld [smem:[#allocation6_spill]] }
 0x7a7   : > { %5183 = vrcp.f32 %v3102_v18  ;;  %v3600_v45 = vld [vmem:[%s5730_s0 + $0x58] sm:$0xff]  ;;  %v4266_v33 = vld [vmem:[%s1487_s15] ss:$0 sm:$0xff] }
 0x7aa   : > { %s1479_s22 = scalar_lea.vmem %s5825_s2, %s5828_s10  ;;  %s1500_s2 = scalar_lea.vmem %s5439_s17, %s5562_s23 }
 0x7ac   : > { %v5178_v20 = vpop.eup %5177 }
 0x7ad   : > { %v5180_v22 = vpop.eup %5179  ;;  %v3113_v24 = vmul.f32 %v5178_v20, %v3109_v21 }
 0x7ae   : > { %v3112_v23 = vmul.f32 %v5180_v22, %v3108_v19 }
 0x7b0   : > { %v5182_v26 = vpop.eup %5181  ;;  %4688 = vmatprep.mubr.msk.f32.mxu0 %vm2772_vm5, %v3112_v23 }
 0x7b1   : > { %v5184_v28 = vpop.eup %5183  ;;  %4689 = vmatmul.mubr.msk.f32.vlgmr.msra.gmra.mrb[32].mxu0 %vm2772_vm5, %v3113_v24  ;;  %v3115_v30 = vmul.f32 %v5182_v26, %v3111_v27 }
 0x7b2   : > { %v3114_v29 = vmul.f32 %v5184_v28, %v3110_v25  ;;  %4987 = vmatpush3.bf16.msra.mxu0 %v4984_v34  ;;  %v3595_v34 = vld [vmem:[%s5730_s0 + $0x30] sm:$0xff] }
 0x7b3   : > { %4989 = vmatprep.subr.bf16.mxu0 %v4988_v16 }
 0x7b4   : > { %4691 = vmatprep.mubr.msk.f32.mxu0 %vm2772_vm5, %v3114_v29 }
 0x7b5   : > { %4692 = vmatmul.mubr.msk.f32.gmra.mrb[34].mxu0 %vm2772_vm5, %v3115_v30  ;;  %v3589_v30 = vld [vmem:[%s5730_s0] sm:$0xff] }
 0x7b6   : > { %4991 = vmatpush3.bf16.msra.mxu0 %v4988_v16  ;;  %v4992_v32 = vpack.c.bf16 %v3590_v31, %v3589_v30  ;;  %v3703_v30 = vld [vmem:[%s5750_s18 + $0x10] sm:$0xff]  ;;  %v3704_v31 = vld [vmem:[%s5750_s18 + $0x18] sm:$0xff] }
 0x7b8   : > { %4993 = vmatprep.subr.bf16.mxu0 %v4992_v32 }
 0x884   : > { %v4690_v40 = vpop.f32.mrb[32].mxu0 }
 0x885   : > { %v3215_v41 = vadd.f32 %v4690_v40, %v4255_v39  ;;  %v3209_v42 = vpop.f32.mrb[33].mxu0 }
 0x886   : > { %v3210_v43 = vadd.f32 %v4255_v39, %v3209_v42  ;;  %v3598_v42 = vld [vmem:[%s5730_s0 + $0x48] sm:$0xff] }
 0x887   : > { %v3229_v48 = vmax.f32 %v3215_v41, 0.0  ;;  %v3597_v41 = vld [vmem:[%s5730_s0 + $0x40] sm:$0xff] }
 0x888   : > { %v3228_v46 = vmax.f32 %v3210_v43, 0.0  ;;  %v4693_v47 = vpop.f32.mrb[34].mxu0  ;;  %v5008_v43 = vpack.c.bf16 %v3598_v42, %v3597_v41 }
 0x889   : > { %v3225_v49 = vadd.f32 %v4693_v47, %v4255_v39  ;;  %v3219_v50 = vpop.f32.mrb[35].mxu0  ;;  %v3601_v47 = vld [vmem:[%s5730_s0 + $0x60] sm:$0xff] }
 0x88a   : > { %v3220_v52 = vadd.f32 %v4255_v39, %v3219_v50  ;;  %4726 = vmatprep.mubr.f32.mxu1 %v3228_v46  ;;  %v3596_v39 = vld [vmem:[%s5730_s0 + $0x38] sm:$0xff]  ;;  %v5012_v46 = vpack.c.bf16 %v3600_v45, %v3599_v44  ;;  %v3603_v50 = vld [vmem:[%s5730_s0 + $0x70] sm:$0xff] }
 0x88b   : > { %4727 = vmatmul.mubr.f32.vlgmr.msra.gmra.mrb[36].mxu1 %v3229_v48  ;;  %v3231_v56 = vmax.f32 %v3225_v49, 0.0  ;;  %v5004_v40 = vpack.c.bf16 %v3596_v39, %v3595_v34  ;;  %v3602_v48 = vld [vmem:[%s5730_s0 + $0x68] sm:$0xff] }
 0x88c   : > { %v3230_v55 = vmax.f32 %v3220_v52, 0.0  ;;  %4955 = vmatpush3.bf16.msra.mxu1 %v4952_v36  ;;  %v3593_v36 = vld [vmem:[%s5730_s0 + $0x20] sm:$0xff]  ;;  %v5016_v49 = vpack.c.bf16 %v3602_v48, %v3601_v47 }
 0x88d   : > { %4957 = vmatprep.subr.bf16.mxu1 %v4956_v51  ;;  %v5000_v38 = vpack.c.bf16 %v3594_v37, %v3593_v36 }
 0x88e   : > { %4729 = vmatprep.mubr.f32.mxu1 %v3230_v55  ;;  %v5024_v55 = vpack.c.bf16 %v3702_v54, %v3701_v53 }
 0x88f   : > { %4730 = vmatmul.mubr.f32.gmra.mrb[38].mxu1 %v3231_v56  ;;  %v4261_v56 = vld [vmem:[%s1479_s22] ss:$0 sm:$0xff] }
 0x890   : > { %4959 = vmatpush3.bf16.msra.mxu1 %v4956_v51  ;;  %4764 = vmatprep.mubr.f32.mxu1 %v3232_v58  ;;  %v3604_v51 = vld [vmem:[%s5730_s0 + $0x78] sm:$0xff]  ;;  %s1495_s0 = scalar_lea.vmem %s5434_s24, %s5828_s10 }
 0x891   : > { %4961 = vmatprep.subr.bf16.mxu1 %v4960_v57  ;;  %v5020_v52 = vpack.c.bf16 %v3604_v51, %v3603_v50  ;;  %v4267_v45 = vld [vmem:[%s1495_s0] ss:$0 sm:$0xff] }
 0x894   : > { %4963 = vmatpush3.bf16.msra.mxu1 %v4960_v57 }
 0x895   : > { %4965 = vmatprep.subr.bf16.mxu1 %v4964_v61 }
 0x898   : > { %4967 = vmatpush3.bf16.msra.mxu1 %v4964_v61 }
 0x899   : > { %4969 = vmatprep.subr.bf16.mxu1 %v4968_v0 }
 0x89c   : > { %4971 = vmatpush3.bf16.msra.mxu1 %v4968_v0 }
 0x89d   : > { %4973 = vmatprep.subr.bf16.mxu1 %v4972_v3 }
 0x8a0   : > { %4975 = vmatpush3.bf16.msra.mxu1 %v4972_v3 }
 0x8a1   : > { %4977 = vmatprep.subr.bf16.mxu1 %v4976_v6 }
 0x8a4   : > { %4979 = vmatpush3.bf16.msra.mxu1 %v4976_v6 }
 0x8a5   : > { %4981 = vmatprep.subr.bf16.mxu1 %v4980_v10 }
 0x8a8   : > { %4983 = vmatpush3.bf16.msra.mxu1 %v4980_v10 }
 0x8ab   : > { %4765 = vmatmul.mubr.f32.vlgmr.msra.gmra.mrb[36].mxu1 %v3233_v11 }
 0x8ac   : > { %4767 = vmatprep.mubr.f32.mxu1 %v3234_v12 }
 0x8af   : > { %4768 = vmatmul.mubr.f32.gmra.mrb[38].mxu1 %v3235_v13 }
 0x97e   : > { %v4766_v18 = vpop.f32.mrb[36].mxu1 }
 0x97f   : > { %v3446_v19 = vadd.f32 %v4766_v18, %v4260_v17  ;;  %v3419_v20 = vpop.f32.mrb[37].mxu1  ;;  %v3581_v18 = vld [vmem:[%s5826_s1] sm:$0xff] }
 0x980   : > { %v3445_v21 = vadd.f32 %v4260_v17, %v3419_v20  ;;  %v3582_v20 = vld [vmem:[%s5826_s1 + $0x8] sm:$0xff] }
 0x981   : > { %v3450_v24 = vmax.f32 %v3446_v19, 0.0 }
 0x982   : > { %v3449_v22 = vmax.f32 %v3445_v21, 0.0  ;;  %v4769_v23 = vpop.f32.mrb[38].mxu1 }
 0x983   : > { %v3448_v25 = vadd.f32 %v4769_v23, %v4260_v17  ;;  %v3429_v26 = vpop.f32.mrb[39].mxu1 }
 0x984   : > { %v3447_v27 = vadd.f32 %v4260_v17, %v3429_v26  ;;  %4778 = vmatprep.mubr.msk.f32.mxu0 %vm2296_vm3, %v3449_v22  ;;  %v3584_v26 = vld [vmem:[%s5826_s1 + $0x18] sm:$0xff] }
 0x985   : > { %4779 = vmatmul.mubr.msk.f32.vlgmr.msra.gmra.mrb[36].mxu0 %vm2296_vm3, %v3450_v24  ;;  %v3452_v29 = vmax.f32 %v3448_v25, 0.0  ;;  %v3583_v24 = vld [vmem:[%s5826_s1 + $0x10] sm:$0xff] }
 0x986   : > { %v3451_v28 = vmax.f32 %v3447_v27, 0.0  ;;  %4995 = vmatpush3.bf16.msra.mxu0 %v4992_v32  ;;  %v5028_v32 = vpack.c.bf16 %v3704_v31, %v3703_v30 }
 0x987   : > { %4997 = vmatprep.subr.bf16.mxu0 %v4996_v8 }
 0x988   : > { %4781 = vmatprep.mubr.msk.f32.mxu0 %vm2296_vm3, %v3451_v28 }
 0x989   : > { %4782 = vmatmul.mubr.msk.f32.gmra.mrb[38].mxu0 %vm2296_vm3, %v3452_v29 }
 0x98a   : > { %4999 = vmatpush3.bf16.msra.mxu0 %v4996_v8 }
 0x98b   : > { %5001 = vmatprep.subr.bf16.mxu0 %v5000_v38 }
 0x98e   : > { %5003 = vmatpush3.bf16.msra.mxu0 %v5000_v38 }
 0x98f   : > { %5005 = vmatprep.subr.bf16.mxu0 %v5004_v40 }
 0x992   : > { %5007 = vmatpush3.bf16.msra.mxu0 %v5004_v40 }
 0x993   : > { %5009 = vmatprep.subr.bf16.mxu0 %v5008_v43 }
 0x996   : > { %5011 = vmatpush3.bf16.msra.mxu0 %v5008_v43 }
 0x997   : > { %5013 = vmatprep.subr.bf16.mxu0 %v5012_v46 }
 0x99a   : > { %5015 = vmatpush3.bf16.msra.mxu0 %v5012_v46 }
 0x99b   : > { %5017 = vmatprep.subr.bf16.mxu0 %v5016_v49 }
 0x99e   : > { %5019 = vmatpush3.bf16.msra.mxu0 %v5016_v49 }
 0x99f   : > { %5021 = vmatprep.subr.bf16.mxu0 %v5020_v52 }
 0x9a2   : > { %5023 = vmatpush3.bf16.msra.mxu0 %v5020_v52 }
 0x9a3   : > { %5025 = vmatprep.subr.bf16.mxu0 %v5024_v55 }
 0xa58   : > { %v4780_v57 = vpop.f32.mrb[36].mxu0 }
 0xa59   : > { %v3548_v58 = vadd.f32 %v4780_v57, %v4261_v56  ;;  %v3542_v59 = vpop.f32.mrb[37].mxu0 }
 0xa5a   : > { %v3543_v60 = vadd.f32 %v4261_v56, %v3542_v59 }
 0xa5b   : > { %v3562_v61 = vsub.f32 0.0, %v3548_v58 }
 0xa5c   : > { %v3561_v62 = vsub.f32 0.0, %v3543_v60  ;;  %v4783_v63 = vpop.f32.mrb[38].mxu0 }
 0xa5d   : > { %v3567_v0 = vmul.f32 1.442695, %v3562_v61  ;;  %v3558_v1 = vadd.f32 %v4783_v63, %v4261_v56  ;;  %v3552_v2 = vpop.f32.mrb[39].mxu0 }
 0xa5e   : > { %v3565_v3 = vmul.f32 1.442695, %v3561_v62  ;;  %v3553_v4 = vadd.f32 %v4261_v56, %v3552_v2 }
 0xa5f   : > { %5185 = vpow2.f32 %v3567_v0  ;;  %v3564_v5 = vsub.f32 0.0, %v3558_v1 }
 0xa60   : > { %5187 = vpow2.f32 %v3565_v3  ;;  %v3563_v6 = vsub.f32 0.0, %v3553_v4 }
 0xa61   : > { %v3571_v7 = vmul.f32 1.442695, %v3564_v5 }
 0xa62   : > { %v3569_v9 = vmul.f32 1.442695, %v3563_v6 }
 0xa63   : > { %5189 = vpow2.f32 %v3571_v7 }
 0xa64   : > { %5191 = vpow2.f32 %v3569_v9 }
 0xa69   : > { %v5186_v10 = vpop.eup %5185 }
 0xa6a   : > { %v5188_v11 = vpop.eup %5187  ;;  %v3574_v12 = vadd.f32 1.0, %v5186_v10 }
 0xa6b   : > { %v3573_v13 = vadd.f32 1.0, %v5188_v11 }
 0xa6c   : > { %5193 = vrcp.f32 %v3574_v12 }
 0xa6d   : > { %v5190_v14 = vpop.eup %5189  ;;  %5195 = vrcp.f32 %v3573_v13 }
 0xa6e   : > { %v5192_v15 = vpop.eup %5191  ;;  %v3576_v16 = vadd.f32 1.0, %v5190_v14 }
 0xa6f   : > { %v3575_v17 = vadd.f32 1.0, %v5192_v15 }
 0xa70   : > { %5197 = vrcp.f32 %v3576_v16 }
 0xa71   : > { %5199 = vrcp.f32 %v3575_v17 }
 0xa76   : > { %v5194_v19 = vpop.eup %5193 }
 0xa77   : > { %v5196_v21 = vpop.eup %5195  ;;  %v3586_v23 = vmul.f32 %v5194_v19, %v3582_v20 }
 0xa78   : > { %v3585_v22 = vmul.f32 %v5196_v21, %v3581_v18 }
 0xa7a   : > { %v5198_v25 = vpop.eup %5197  ;;  %4816 = vmatprep.mubr.f32.mxu0 %v3585_v22 }
 0xa7b   : > { %v5200_v27 = vpop.eup %5199  ;;  %4817 = vmatmul.mubr.f32.vlgmr.msra.gmra.mrb[40].mxu0 %v3586_v23  ;;  %v3588_v29 = vmul.f32 %v5198_v25, %v3584_v26 }
 0xa7c   : > { %v3587_v28 = vmul.f32 %v5200_v27, %v3583_v24  ;;  %5027 = vmatpush3.bf16.msra.mxu0 %v5024_v55 }
 0xa7d   : > { %5029 = vmatprep.subr.bf16.mxu0 %v5028_v32 }
 0xa7e   : > { %4819 = vmatprep.mubr.f32.mxu0 %v3587_v28 }
 0xa7f   : > { %4820 = vmatmul.mubr.f32.gmra.mrb[42].mxu0 %v3588_v29 }
 0xa80   : > { %5031 = vmatpush3.bf16.msra.mxu0 %v5028_v32 }
 0xb4e   : > { %v4818_v35 = vpop.f32.mrb[40].mxu0 }
 0xb4f   : > { %v3684_v8 = vadd.f32 %v4818_v35, %v4266_v33  ;;  %v3678_v36 = vpop.f32.mrb[41].mxu0 }
 0xb50   : > { %v3679_v37 = vadd.f32 %v4266_v33, %v3678_v36 }
 0xb51   : > { %v3698_v39 = vmax.f32 %v3684_v8, 0.0 }
 0xb52   : > { %v3697_v38 = vmax.f32 %v3679_v37, 0.0  ;;  %v4821_v34 = vpop.f32.mrb[42].mxu0 }
 0xb53   : > { %v3694_v40 = vadd.f32 %v4821_v34, %v4266_v33  ;;  %v3688_v41 = vpop.f32.mrb[43].mxu0 }
 0xb54   : > { %v3689_v42 = vadd.f32 %v4266_v33, %v3688_v41  ;;  %4830 = vmatprep.mubr.msk.f32.mxu0 %vm2296_vm3, %v3697_v38 }
 0xb55   : > { %4831 = vmatmul.mubr.msk.f32.vlgmr.msra.gmra.mrb[44].mxu0 %vm2296_vm3, %v3698_v39  ;;  %v3700_v44 = vmax.f32 %v3694_v40, 0.0 }
 0xb56   : > { %v3699_v43 = vmax.f32 %v3689_v42, 0.0 }
 0xb58   : > { %4833 = vmatprep.mubr.msk.f32.mxu0 %vm2296_vm3, %v3699_v43 }
 0xb59   : > { %4834 = vmatmul.mubr.msk.f32.gmra.mrb[46].mxu0 %vm2296_vm3, %v3700_v44 }
 0xc28   : > { %v4832_v46 = vpop.f32.mrb[44].mxu0 }
 0xc29   : > { %v3796_v47 = vadd.f32 %v4832_v46, %v4267_v45  ;;  %v3790_v48 = vpop.f32.mrb[45].mxu0 }
 0xc2a   : > { %v3791_v49 = vadd.f32 %v4267_v45, %v3790_v48 }
 0xc2b   : > { %3810 = vst.msk [vmem:[%s1500_s2 + $0x8] sm:$0xff] %vm1526_vm0, %v3796_v47 }
 0xc2c   : > { %3809 = vst.msk [vmem:[%s1500_s2] sm:$0xff] %vm1526_vm0, %v3791_v49  ;;  %v4835_v50 = vpop.f32.mrb[46].mxu0 }
 0xc2d   : > { %v3806_v51 = vadd.f32 %v4835_v50, %v4267_v45  ;;  %v3800_v52 = vpop.f32.mrb[47].mxu0 }
 0xc2e   : > { %v3801_v53 = vadd.f32 %v4267_v45, %v3800_v52 }
 0xc2f   : > { %3812 = vst.msk [vmem:[%s1500_s2 + $0x18] sm:$0xff] %vm1526_vm0, %v3806_v51 }
 0xc30   : > { %3811 = vst.msk [vmem:[%s1500_s2 + $0x10] sm:$0xff] %vm1526_vm0, %v3801_v53 }
 0xc31 PF: > { %s85_s7 = sadd.s32 1, %s5207_s7  }
 0xc32   : > { %p82_p4 = scmp.ge.s32.totalorder %s85_s7, 5  }
 0xc34   :  { %84 = sbr.rel (!%p82_p4) target bundleno = 65 (0x41), region = 301 }

// kernel: forward.8
= control target key start
LH: loop header
LB: loop body
LE: loop exit
PB: predicated region body
PF: predicated region fallthrough
CT: control target
= control target key end

     0   :  { %vm64_vm0 = vcmask 1043456   ;;  %v1366_v2 = vmov 0.0   ;;  %vm51_vm1 = vcmask 31744   ;;  %s1894_s1 = inlined_call_operand.vmem [shape: f32[4,3072], index: 1, kind: input, shape index: {}]   ;;  %s1895_s0 = inlined_call_operand.vmem [shape: f32[32,4], index: 0, kind: input, shape index: {}]   ;;  %s1896_s2 = inlined_call_operand.vmem [shape: f32[32,3072], index: 2, kind: output, shape index: {}]  }
   0x1   :  { %v15_v0 = vld [vmem:[%s1894_s1] sm:$0xff]  ;;  %v16_v1 = vld [vmem:[%s1894_s1 + $0x8] sm:$0xff]  ;;  %177 = vmatprep.mubr.f32.mxu0 %v1366_v2  ;;  %266 = vmatprep.mubr.f32.mxu1 %v1366_v2  ;;  %v17_v5 = vld [vmem:[%s1894_s1 + $0x10] sm:$0xff] }
   0x2   :  { %v39_v3 = vcombine.high %v15_v0, %v15_v0  ;;  %v40_v4 = vcombine.high %v16_v1, %v16_v1  ;;  %v18_v6 = vld [vmem:[%s1894_s1 + $0x18] sm:$0xff]  ;;  %v1399_v7 = vld [vmem:[%s1895_s0] sm:$0xff]  ;;  %v41_v8 = vcombine.high %v17_v5, %v17_v5  ;;  %v20_v11 = vld [vmem:[%s1894_s1 + $0x28] sm:$0xff] }
   0x3   :  { %v42_v9 = vcombine.high %v18_v6, %v18_v6  ;;  %v19_v10 = vld [vmem:[%s1894_s1 + $0x20] sm:$0xff]  ;;  %v1420_v12 = vld [vmem:[%s1895_s0 + $0x8] sm:$0xff]  ;;  %v44_v14 = vcombine.high %v20_v11, %v20_v11  ;;  %v1435_v15 = vld [vmem:[%s1895_s0 + $0x10] sm:$0xff] }
   0x4   :  { %1281 = vmatprep.subr.msk.mxu0 %vm64_vm0, %v39_v3  ;;  %1287 = vmatprep.subr.msk.mxu1 %vm64_vm0, %v40_v4  ;;  %v43_v13 = vcombine.high %v19_v10, %v19_v10  ;;  %v1448_v16 = vld [vmem:[%s1895_s0 + $0x18] sm:$0xff]  ;;  %v21_v17 = vld [vmem:[%s1894_s1 + $0x30] sm:$0xff]  ;;  %v23_v21 = vld [vmem:[%s1894_s1 + $0x40] sm:$0xff] }
   0x5   :  { %1282 = vmatpush1.msk.msra.mxu0 %vm64_vm0, %v15_v0  ;;  %1288 = vmatpush1.msk.msra.mxu1 %vm64_vm0, %v16_v1  ;;  %v22_v18 = vld [vmem:[%s1894_s1 + $0x38] sm:$0xff]  ;;  %v45_v19 = vcombine.high %v21_v17, %v21_v17  ;;  %v24_v22 = vld [vmem:[%s1894_s1 + $0x48] sm:$0xff]  ;;  %v47_v23 = vcombine.high %v23_v21, %v23_v21  ;;  %v25_v25 = vld [vmem:[%s1894_s1 + $0x50] sm:$0xff] }
   0x6   :  { %1283 = vmatmul.mubr.msk.f32.vlgmr.msra.gmra.mrb[0].mxu0 %vm51_vm1, %v1399_v7  ;;  %1289 = vmatmul.mubr.msk.f32.vlgmr.msra.gmra.mrb[0].mxu1 %vm51_vm1, %v1399_v7  ;;  %v46_v20 = vcombine.high %v22_v18, %v22_v18  ;;  %v48_v24 = vcombine.high %v24_v22, %v24_v22  ;;  %v26_v26 = vld [vmem:[%s1894_s1 + $0x58] sm:$0xff]  ;;  %v49_v27 = vcombine.high %v25_v25, %v25_v25 }
   0x7   :  { %1293 = vmatprep.subr.msk.mxu0 %vm64_vm0, %v41_v8  ;;  %1299 = vmatprep.subr.msk.mxu1 %vm64_vm0, %v42_v9  ;;  %v50_v28 = vcombine.high %v26_v26, %v26_v26 }
   0x8   :  { %1294 = vmatpush1.msk.msra.mxu0 %vm64_vm0, %v17_v5  ;;  %1300 = vmatpush1.msk.msra.mxu1 %vm64_vm0, %v18_v6 }
   0x9   :  { %183 = vmatprep.mubr.f32.mxu0 %v1366_v2  ;;  %272 = vmatprep.mubr.f32.mxu1 %v1366_v2 }
   0xa   :  { %1284 = vmatmul.mubr.msk.f32.gmra.mrb[2].mxu0 %vm51_vm1, %v1420_v12  ;;  %1290 = vmatmul.mubr.msk.f32.gmra.mrb[2].mxu1 %vm51_vm1, %v1420_v12 }
   0xb   :  { %189 = vmatprep.mubr.f32.mxu0 %v1366_v2  ;;  %278 = vmatprep.mubr.f32.mxu1 %v1366_v2 }
   0xc   :  { %1305 = vmatprep.subr.msk.mxu0 %vm64_vm0, %v43_v13  ;;  %1311 = vmatprep.subr.msk.mxu1 %vm64_vm0, %v44_v14 }
   0xe   :  { %1285 = vmatmul.mubr.msk.f32.gmra.mrb[4].mxu0 %vm51_vm1, %v1435_v15  ;;  %1291 = vmatmul.mubr.msk.f32.gmra.mrb[4].mxu1 %vm51_vm1, %v1435_v15 }
   0xf   :  { %195 = vmatprep.mubr.f32.mxu0 %v1366_v2  ;;  %284 = vmatprep.mubr.f32.mxu1 %v1366_v2 }
  0x12   :  { %1286 = vmatmul.mubr.msk.f32.gmra.mrb[6].mxu0 %vm51_vm1, %v1448_v16  ;;  %1292 = vmatmul.mubr.msk.f32.gmra.mrb[6].mxu1 %vm51_vm1, %v1448_v16 }
  0x13   :  { %355 = vmatprep.mubr.f32.mxu0 %v1366_v2  ;;  %444 = vmatprep.mubr.f32.mxu1 %v1366_v2 }
  0x16   :  { %1295 = vmatmul.mubr.msk.f32.vlgmr.msra.gmra.mrb[8].mxu0 %vm51_vm1, %v1399_v7  ;;  %1301 = vmatmul.mubr.msk.f32.vlgmr.msra.gmra.mrb[8].mxu1 %vm51_vm1, %v1399_v7 }
  0x17   :  { %1306 = vmatpush1.msk.msra.mxu0 %vm64_vm0, %v19_v10  ;;  %1312 = vmatpush1.msk.msra.mxu1 %vm64_vm0, %v20_v11 }
  0x18   :  { %361 = vmatprep.mubr.f32.mxu0 %v1366_v2  ;;  %450 = vmatprep.mubr.f32.mxu1 %v1366_v2 }
  0x19   :  { %1317 = vmatprep.subr.msk.mxu0 %vm64_vm0, %v45_v19  ;;  %1323 = vmatprep.subr.msk.mxu1 %vm64_vm0, %v46_v20 }
  0x1a   :  { %1296 = vmatmul.mubr.msk.f32.gmra.mrb[10].mxu0 %vm51_vm1, %v1420_v12  ;;  %1302 = vmatmul.mubr.msk.f32.gmra.mrb[10].mxu1 %vm51_vm1, %v1420_v12 }
  0x1b   :  { %367 = vmatprep.mubr.f32.mxu0 %v1366_v2  ;;  %456 = vmatprep.mubr.f32.mxu1 %v1366_v2 }
  0x1e   :  { %1297 = vmatmul.mubr.msk.f32.gmra.mrb[12].mxu0 %vm51_vm1, %v1435_v15  ;;  %1303 = vmatmul.mubr.msk.f32.gmra.mrb[12].mxu1 %vm51_vm1, %v1435_v15 }
  0x1f   :  { %373 = vmatprep.mubr.f32.mxu0 %v1366_v2  ;;  %462 = vmatprep.mubr.f32.mxu1 %v1366_v2 }
  0x22   :  { %1298 = vmatmul.mubr.msk.f32.gmra.mrb[14].mxu0 %vm51_vm1, %v1448_v16  ;;  %1304 = vmatmul.mubr.msk.f32.gmra.mrb[14].mxu1 %vm51_vm1, %v1448_v16 }
  0x23   :  { %533 = vmatprep.mubr.f32.mxu0 %v1366_v2  ;;  %622 = vmatprep.mubr.f32.mxu1 %v1366_v2 }
  0x26   :  { %1307 = vmatmul.mubr.msk.f32.vlgmr.msra.gmra.mrb[16].mxu0 %vm51_vm1, %v1399_v7  ;;  %1313 = vmatmul.mubr.msk.f32.vlgmr.msra.gmra.mrb[16].mxu1 %vm51_vm1, %v1399_v7 }
  0x27   :  { %1318 = vmatpush1.msk.msra.mxu0 %vm64_vm0, %v21_v17  ;;  %1324 = vmatpush1.msk.msra.mxu1 %vm64_vm0, %v22_v18 }
  0x28   :  { %539 = vmatprep.mubr.f32.mxu0 %v1366_v2  ;;  %628 = vmatprep.mubr.f32.mxu1 %v1366_v2 }
  0x29   :  { %1329 = vmatprep.subr.msk.mxu0 %vm64_vm0, %v47_v23  ;;  %1335 = vmatprep.subr.msk.mxu1 %vm64_vm0, %v48_v24 }
  0x2a   :  { %1308 = vmatmul.mubr.msk.f32.gmra.mrb[18].mxu0 %vm51_vm1, %v1420_v12  ;;  %1314 = vmatmul.mubr.msk.f32.gmra.mrb[18].mxu1 %vm51_vm1, %v1420_v12 }
  0x2b   :  { %545 = vmatprep.mubr.f32.mxu0 %v1366_v2  ;;  %634 = vmatprep.mubr.f32.mxu1 %v1366_v2 }
  0x2e   :  { %1309 = vmatmul.mubr.msk.f32.gmra.mrb[20].mxu0 %vm51_vm1, %v1435_v15  ;;  %1315 = vmatmul.mubr.msk.f32.gmra.mrb[20].mxu1 %vm51_vm1, %v1435_v15 }
  0x2f   :  { %551 = vmatprep.mubr.f32.mxu0 %v1366_v2  ;;  %640 = vmatprep.mubr.f32.mxu1 %v1366_v2 }
  0x32   :  { %1310 = vmatmul.mubr.msk.f32.gmra.mrb[22].mxu0 %vm51_vm1, %v1448_v16  ;;  %1316 = vmatmul.mubr.msk.f32.gmra.mrb[22].mxu1 %vm51_vm1, %v1448_v16 }
  0x33   :  { %711 = vmatprep.mubr.f32.mxu0 %v1366_v2  ;;  %800 = vmatprep.mubr.f32.mxu1 %v1366_v2 }
  0x36   :  { %1319 = vmatmul.mubr.msk.f32.vlgmr.msra.gmra.mrb[24].mxu0 %vm51_vm1, %v1399_v7  ;;  %1325 = vmatmul.mubr.msk.f32.vlgmr.msra.gmra.mrb[24].mxu1 %vm51_vm1, %v1399_v7 }
  0x37   :  { %1330 = vmatpush1.msk.msra.mxu0 %vm64_vm0, %v23_v21  ;;  %1336 = vmatpush1.msk.msra.mxu1 %vm64_vm0, %v24_v22 }
  0x38   :  { %717 = vmatprep.mubr.f32.mxu0 %v1366_v2  ;;  %806 = vmatprep.mubr.f32.mxu1 %v1366_v2 }
  0x39   :  { %1341 = vmatprep.subr.msk.mxu0 %vm64_vm0, %v49_v27  ;;  %1347 = vmatprep.subr.msk.mxu1 %vm64_vm0, %v50_v28 }
  0x3a   :  { %1320 = vmatmul.mubr.msk.f32.gmra.mrb[26].mxu0 %vm51_vm1, %v1420_v12  ;;  %1326 = vmatmul.mubr.msk.f32.gmra.mrb[26].mxu1 %vm51_vm1, %v1420_v12 }
  0x3b   :  { %723 = vmatprep.mubr.f32.mxu0 %v1366_v2  ;;  %812 = vmatprep.mubr.f32.mxu1 %v1366_v2 }
  0x3e   :  { %1321 = vmatmul.mubr.msk.f32.gmra.mrb[28].mxu0 %vm51_vm1, %v1435_v15  ;;  %1327 = vmatmul.mubr.msk.f32.gmra.mrb[28].mxu1 %vm51_vm1, %v1435_v15 }
  0x3f   :  { %729 = vmatprep.mubr.f32.mxu0 %v1366_v2  ;;  %818 = vmatprep.mubr.f32.mxu1 %v1366_v2 }
  0x42   :  { %1322 = vmatmul.mubr.msk.f32.gmra.mrb[30].mxu0 %vm51_vm1, %v1448_v16  ;;  %1328 = vmatmul.mubr.msk.f32.gmra.mrb[30].mxu1 %vm51_vm1, %v1448_v16 }
  0x43   :  { %889 = vmatprep.mubr.f32.mxu0 %v1366_v2  ;;  %978 = vmatprep.mubr.f32.mxu1 %v1366_v2 }
  0x46   :  { %1331 = vmatmul.mubr.msk.f32.vlgmr.msra.gmra.mrb[32].mxu0 %vm51_vm1, %v1399_v7  ;;  %1337 = vmatmul.mubr.msk.f32.vlgmr.msra.gmra.mrb[32].mxu1 %vm51_vm1, %v1399_v7 }
  0x47   :  { %1342 = vmatpush1.msk.msra.mxu0 %vm64_vm0, %v25_v25  ;;  %1348 = vmatpush1.msk.msra.mxu1 %vm64_vm0, %v26_v26 }
  0x48   :  { %895 = vmatprep.mubr.f32.mxu0 %v1366_v2  ;;  %984 = vmatprep.mubr.f32.mxu1 %v1366_v2 }
  0x4a   :  { %1332 = vmatmul.mubr.msk.f32.gmra.mrb[34].mxu0 %vm51_vm1, %v1420_v12  ;;  %1338 = vmatmul.mubr.msk.f32.gmra.mrb[34].mxu1 %vm51_vm1, %v1420_v12 }
  0x4b   :  { %901 = vmatprep.mubr.f32.mxu0 %v1366_v2  ;;  %990 = vmatprep.mubr.f32.mxu1 %v1366_v2 }
  0x4e   :  { %1333 = vmatmul.mubr.msk.f32.gmra.mrb[36].mxu0 %vm51_vm1, %v1435_v15  ;;  %1339 = vmatmul.mubr.msk.f32.gmra.mrb[36].mxu1 %vm51_vm1, %v1435_v15 }
  0x4f   :  { %907 = vmatprep.mubr.f32.mxu0 %v1366_v2  ;;  %996 = vmatprep.mubr.f32.mxu1 %v1366_v2 }
  0x52   :  { %1334 = vmatmul.mubr.msk.f32.gmra.mrb[38].mxu0 %vm51_vm1, %v1448_v16  ;;  %1340 = vmatmul.mubr.msk.f32.gmra.mrb[38].mxu1 %vm51_vm1, %v1448_v16 }
  0x53   :  { %1067 = vmatprep.mubr.f32.mxu0 %v1366_v2  ;;  %1156 = vmatprep.mubr.f32.mxu1 %v1366_v2 }
  0x56   :  { %1343 = vmatmul.mubr.msk.f32.vlgmr.msra.gmra.mrb[40].mxu0 %vm51_vm1, %v1399_v7  ;;  %1349 = vmatmul.mubr.msk.f32.vlgmr.msra.gmra.mrb[40].mxu1 %vm51_vm1, %v1399_v7 }
  0x57   :  { %1073 = vmatprep.mubr.f32.mxu0 %v1366_v2  ;;  %1162 = vmatprep.mubr.f32.mxu1 %v1366_v2 }
  0x5a   :  { %1344 = vmatmul.mubr.msk.f32.gmra.mrb[42].mxu0 %vm51_vm1, %v1420_v12  ;;  %1350 = vmatmul.mubr.msk.f32.gmra.mrb[42].mxu1 %vm51_vm1, %v1420_v12 }
  0x5b   :  { %1079 = vmatprep.mubr.f32.mxu0 %v1366_v2  ;;  %1168 = vmatprep.mubr.f32.mxu1 %v1366_v2 }
  0x5e   :  { %1345 = vmatmul.mubr.msk.f32.gmra.mrb[44].mxu0 %vm51_vm1, %v1435_v15  ;;  %1351 = vmatmul.mubr.msk.f32.gmra.mrb[44].mxu1 %vm51_vm1, %v1435_v15 }
  0x5f   :  { %1085 = vmatprep.mubr.f32.mxu0 %v1366_v2  ;;  %1174 = vmatprep.mubr.f32.mxu1 %v1366_v2 }
  0x62   :  { %1346 = vmatmul.mubr.msk.f32.gmra.mrb[46].mxu0 %vm51_vm1, %v1448_v16  ;;  %1352 = vmatmul.mubr.msk.f32.gmra.mrb[46].mxu1 %vm51_vm1, %v1448_v16 }
  0xd9   :  { %v179_v29 = vpop.f32.mrb[0].mxu0  ;;  %v268_v30 = vpop.f32.mrb[0].mxu1 }
  0xda   :  { %1181 = vst [vmem:[%s1896_s2] sm:$0xff] %v179_v29  ;;  %1183 = vst [vmem:[%s1896_s2 + $0x10] sm:$0xff] %v268_v30  ;;  %v181_v31 = vpop.f32.mrb[1].mxu0  ;;  %v270_v32 = vpop.f32.mrb[1].mxu1 }
  0xdb   :  { %1182 = vst [vmem:[%s1896_s2 + $0x8] sm:$0xff] %v181_v31  ;;  %1184 = vst [vmem:[%s1896_s2 + $0x18] sm:$0xff] %v270_v32 }
  0xdd   :  { %v185_v33 = vpop.f32.mrb[2].mxu0  ;;  %v274_v34 = vpop.f32.mrb[2].mxu1 }
  0xde   :  { %1205 = vst [vmem:[%s1896_s2 + $0xc0] sm:$0xff] %v185_v33  ;;  %1207 = vst [vmem:[%s1896_s2 + $0xd0] sm:$0xff] %v274_v34  ;;  %v187_v35 = vpop.f32.mrb[3].mxu0  ;;  %v276_v36 = vpop.f32.mrb[3].mxu1 }
  0xdf   :  { %1206 = vst [vmem:[%s1896_s2 + $0xc8] sm:$0xff] %v187_v35  ;;  %1208 = vst [vmem:[%s1896_s2 + $0xd8] sm:$0xff] %v276_v36 }
  0xe1   :  { %v191_v37 = vpop.f32.mrb[4].mxu0  ;;  %v280_v38 = vpop.f32.mrb[4].mxu1 }
  0xe2   :  { %1229 = vst [vmem:[%s1896_s2 + $0x180] sm:$0xff] %v191_v37  ;;  %1231 = vst [vmem:[%s1896_s2 + $0x190] sm:$0xff] %v280_v38  ;;  %v193_v39 = vpop.f32.mrb[5].mxu0  ;;  %v282_v40 = vpop.f32.mrb[5].mxu1 }
  0xe3   :  { %1230 = vst [vmem:[%s1896_s2 + $0x188] sm:$0xff] %v193_v39  ;;  %1232 = vst [vmem:[%s1896_s2 + $0x198] sm:$0xff] %v282_v40 }
  0xe5   :  { %v197_v41 = vpop.f32.mrb[6].mxu0  ;;  %v286_v42 = vpop.f32.mrb[6].mxu1 }
  0xe6   :  { %1253 = vst [vmem:[%s1896_s2 + $0x240] sm:$0xff] %v197_v41  ;;  %1255 = vst [vmem:[%s1896_s2 + $0x250] sm:$0xff] %v286_v42  ;;  %v199_v43 = vpop.f32.mrb[7].mxu0  ;;  %v288_v44 = vpop.f32.mrb[7].mxu1 }
  0xe7   :  { %1254 = vst [vmem:[%s1896_s2 + $0x248] sm:$0xff] %v199_v43  ;;  %1256 = vst [vmem:[%s1896_s2 + $0x258] sm:$0xff] %v288_v44 }
  0xe9   :  { %v357_v45 = vpop.f32.mrb[8].mxu0  ;;  %v446_v46 = vpop.f32.mrb[8].mxu1 }
  0xea   :  { %1185 = vst [vmem:[%s1896_s2 + $0x20] sm:$0xff] %v357_v45  ;;  %1187 = vst [vmem:[%s1896_s2 + $0x30] sm:$0xff] %v446_v46  ;;  %v359_v47 = vpop.f32.mrb[9].mxu0  ;;  %v448_v48 = vpop.f32.mrb[9].mxu1 }
  0xeb   :  { %1186 = vst [vmem:[%s1896_s2 + $0x28] sm:$0xff] %v359_v47  ;;  %1188 = vst [vmem:[%s1896_s2 + $0x38] sm:$0xff] %v448_v48 }
  0xed   :  { %v363_v49 = vpop.f32.mrb[10].mxu0  ;;  %v452_v50 = vpop.f32.mrb[10].mxu1 }
  0xee   :  { %1209 = vst [vmem:[%s1896_s2 + $0xe0] sm:$0xff] %v363_v49  ;;  %1211 = vst [vmem:[%s1896_s2 + $0xf0] sm:$0xff] %v452_v50  ;;  %v365_v51 = vpop.f32.mrb[11].mxu0  ;;  %v454_v52 = vpop.f32.mrb[11].mxu1 }
  0xef   :  { %1210 = vst [vmem:[%s1896_s2 + $0xe8] sm:$0xff] %v365_v51  ;;  %1212 = vst [vmem:[%s1896_s2 + $0xf8] sm:$0xff] %v454_v52 }
  0xf1   :  { %v369_v53 = vpop.f32.mrb[12].mxu0  ;;  %v458_v54 = vpop.f32.mrb[12].mxu1 }
  0xf2   :  { %1233 = vst [vmem:[%s1896_s2 + $0x1a0] sm:$0xff] %v369_v53  ;;  %1235 = vst [vmem:[%s1896_s2 + $0x1b0] sm:$0xff] %v458_v54  ;;  %v371_v55 = vpop.f32.mrb[13].mxu0  ;;  %v460_v56 = vpop.f32.mrb[13].mxu1 }
  0xf3   :  { %1234 = vst [vmem:[%s1896_s2 + $0x1a8] sm:$0xff] %v371_v55  ;;  %1236 = vst [vmem:[%s1896_s2 + $0x1b8] sm:$0xff] %v460_v56 }
  0xf5   :  { %v375_v57 = vpop.f32.mrb[14].mxu0  ;;  %v464_v58 = vpop.f32.mrb[14].mxu1 }
  0xf6   :  { %1257 = vst [vmem:[%s1896_s2 + $0x260] sm:$0xff] %v375_v57  ;;  %1259 = vst [vmem:[%s1896_s2 + $0x270] sm:$0xff] %v464_v58  ;;  %v377_v59 = vpop.f32.mrb[15].mxu0  ;;  %v466_v60 = vpop.f32.mrb[15].mxu1 }
  0xf7   :  { %1258 = vst [vmem:[%s1896_s2 + $0x268] sm:$0xff] %v377_v59  ;;  %1260 = vst [vmem:[%s1896_s2 + $0x278] sm:$0xff] %v466_v60 }
  0xf9   :  { %v535_v61 = vpop.f32.mrb[16].mxu0  ;;  %v624_v62 = vpop.f32.mrb[16].mxu1 }
  0xfa   :  { %1189 = vst [vmem:[%s1896_s2 + $0x40] sm:$0xff] %v535_v61  ;;  %1191 = vst [vmem:[%s1896_s2 + $0x50] sm:$0xff] %v624_v62  ;;  %v537_v63 = vpop.f32.mrb[17].mxu0  ;;  %v626_v0 = vpop.f32.mrb[17].mxu1 }
  0xfb   :  { %1190 = vst [vmem:[%s1896_s2 + $0x48] sm:$0xff] %v537_v63  ;;  %1192 = vst [vmem:[%s1896_s2 + $0x58] sm:$0xff] %v626_v0 }
  0xfd   :  { %v541_v1 = vpop.f32.mrb[18].mxu0  ;;  %v630_v2 = vpop.f32.mrb[18].mxu1 }
  0xfe   :  { %1213 = vst [vmem:[%s1896_s2 + $0x100] sm:$0xff] %v541_v1  ;;  %1215 = vst [vmem:[%s1896_s2 + $0x110] sm:$0xff] %v630_v2  ;;  %v543_v3 = vpop.f32.mrb[19].mxu0  ;;  %v632_v4 = vpop.f32.mrb[19].mxu1 }
  0xff   :  { %1214 = vst [vmem:[%s1896_s2 + $0x108] sm:$0xff] %v543_v3  ;;  %1216 = vst [vmem:[%s1896_s2 + $0x118] sm:$0xff] %v632_v4 }
 0x101   :  { %v547_v5 = vpop.f32.mrb[20].mxu0  ;;  %v636_v6 = vpop.f32.mrb[20].mxu1 }
 0x102   :  { %1237 = vst [vmem:[%s1896_s2 + $0x1c0] sm:$0xff] %v547_v5  ;;  %1239 = vst [vmem:[%s1896_s2 + $0x1d0] sm:$0xff] %v636_v6  ;;  %v549_v7 = vpop.f32.mrb[21].mxu0  ;;  %v638_v8 = vpop.f32.mrb[21].mxu1 }
 0x103   :  { %1238 = vst [vmem:[%s1896_s2 + $0x1c8] sm:$0xff] %v549_v7  ;;  %1240 = vst [vmem:[%s1896_s2 + $0x1d8] sm:$0xff] %v638_v8 }
 0x105   :  { %v553_v9 = vpop.f32.mrb[22].mxu0  ;;  %v642_v10 = vpop.f32.mrb[22].mxu1 }
 0x106   :  { %1261 = vst [vmem:[%s1896_s2 + $0x280] sm:$0xff] %v553_v9  ;;  %1263 = vst [vmem:[%s1896_s2 + $0x290] sm:$0xff] %v642_v10  ;;  %v555_v11 = vpop.f32.mrb[23].mxu0  ;;  %v644_v12 = vpop.f32.mrb[23].mxu1 }
 0x107   :  { %1262 = vst [vmem:[%s1896_s2 + $0x288] sm:$0xff] %v555_v11  ;;  %1264 = vst [vmem:[%s1896_s2 + $0x298] sm:$0xff] %v644_v12 }
 0x109   :  { %v713_v13 = vpop.f32.mrb[24].mxu0  ;;  %v802_v14 = vpop.f32.mrb[24].mxu1 }
 0x10a   :  { %1193 = vst [vmem:[%s1896_s2 + $0x60] sm:$0xff] %v713_v13  ;;  %1195 = vst [vmem:[%s1896_s2 + $0x70] sm:$0xff] %v802_v14  ;;  %v715_v15 = vpop.f32.mrb[25].mxu0  ;;  %v804_v16 = vpop.f32.mrb[25].mxu1 }
 0x10b   :  { %1194 = vst [vmem:[%s1896_s2 + $0x68] sm:$0xff] %v715_v15  ;;  %1196 = vst [vmem:[%s1896_s2 + $0x78] sm:$0xff] %v804_v16 }
 0x10d   :  { %v719_v17 = vpop.f32.mrb[26].mxu0  ;;  %v808_v18 = vpop.f32.mrb[26].mxu1 }
 0x10e   :  { %1217 = vst [vmem:[%s1896_s2 + $0x120] sm:$0xff] %v719_v17  ;;  %1219 = vst [vmem:[%s1896_s2 + $0x130] sm:$0xff] %v808_v18  ;;  %v721_v19 = vpop.f32.mrb[27].mxu0  ;;  %v810_v20 = vpop.f32.mrb[27].mxu1 }
 0x10f   :  { %1218 = vst [vmem:[%s1896_s2 + $0x128] sm:$0xff] %v721_v19  ;;  %1220 = vst [vmem:[%s1896_s2 + $0x138] sm:$0xff] %v810_v20 }
 0x111   :  { %v725_v21 = vpop.f32.mrb[28].mxu0  ;;  %v814_v22 = vpop.f32.mrb[28].mxu1 }
 0x112   :  { %1241 = vst [vmem:[%s1896_s2 + $0x1e0] sm:$0xff] %v725_v21  ;;  %1243 = vst [vmem:[%s1896_s2 + $0x1f0] sm:$0xff] %v814_v22  ;;  %v727_v23 = vpop.f32.mrb[29].mxu0  ;;  %v816_v24 = vpop.f32.mrb[29].mxu1 }
 0x113   :  { %1242 = vst [vmem:[%s1896_s2 + $0x1e8] sm:$0xff] %v727_v23  ;;  %1244 = vst [vmem:[%s1896_s2 + $0x1f8] sm:$0xff] %v816_v24 }
 0x115   :  { %v731_v25 = vpop.f32.mrb[30].mxu0  ;;  %v820_v26 = vpop.f32.mrb[30].mxu1 }
 0x116   :  { %1265 = vst [vmem:[%s1896_s2 + $0x2a0] sm:$0xff] %v731_v25  ;;  %1267 = vst [vmem:[%s1896_s2 + $0x2b0] sm:$0xff] %v820_v26  ;;  %v733_v27 = vpop.f32.mrb[31].mxu0  ;;  %v822_v28 = vpop.f32.mrb[31].mxu1 }
 0x117   :  { %1266 = vst [vmem:[%s1896_s2 + $0x2a8] sm:$0xff] %v733_v27  ;;  %1268 = vst [vmem:[%s1896_s2 + $0x2b8] sm:$0xff] %v822_v28 }
 0x119   :  { %v891_v29 = vpop.f32.mrb[32].mxu0  ;;  %v980_v30 = vpop.f32.mrb[32].mxu1 }
 0x11a   :  { %1197 = vst [vmem:[%s1896_s2 + $0x80] sm:$0xff] %v891_v29  ;;  %1199 = vst [vmem:[%s1896_s2 + $0x90] sm:$0xff] %v980_v30  ;;  %v893_v31 = vpop.f32.mrb[33].mxu0  ;;  %v982_v32 = vpop.f32.mrb[33].mxu1 }
 0x11b   :  { %1198 = vst [vmem:[%s1896_s2 + $0x88] sm:$0xff] %v893_v31  ;;  %1200 = vst [vmem:[%s1896_s2 + $0x98] sm:$0xff] %v982_v32 }
 0x11d   :  { %v897_v33 = vpop.f32.mrb[34].mxu0  ;;  %v986_v34 = vpop.f32.mrb[34].mxu1 }
 0x11e   :  { %1221 = vst [vmem:[%s1896_s2 + $0x140] sm:$0xff] %v897_v33  ;;  %1223 = vst [vmem:[%s1896_s2 + $0x150] sm:$0xff] %v986_v34  ;;  %v899_v35 = vpop.f32.mrb[35].mxu0  ;;  %v988_v36 = vpop.f32.mrb[35].mxu1 }
 0x11f   :  { %1222 = vst [vmem:[%s1896_s2 + $0x148] sm:$0xff] %v899_v35  ;;  %1224 = vst [vmem:[%s1896_s2 + $0x158] sm:$0xff] %v988_v36 }
 0x121   :  { %v903_v37 = vpop.f32.mrb[36].mxu0  ;;  %v992_v38 = vpop.f32.mrb[36].mxu1 }
 0x122   :  { %1245 = vst [vmem:[%s1896_s2 + $0x200] sm:$0xff] %v903_v37  ;;  %1247 = vst [vmem:[%s1896_s2 + $0x210] sm:$0xff] %v992_v38  ;;  %v905_v39 = vpop.f32.mrb[37].mxu0  ;;  %v994_v40 = vpop.f32.mrb[37].mxu1 }
 0x123   :  { %1246 = vst [vmem:[%s1896_s2 + $0x208] sm:$0xff] %v905_v39  ;;  %1248 = vst [vmem:[%s1896_s2 + $0x218] sm:$0xff] %v994_v40 }
 0x125   :  { %v909_v41 = vpop.f32.mrb[38].mxu0  ;;  %v998_v42 = vpop.f32.mrb[38].mxu1 }
 0x126   :  { %1269 = vst [vmem:[%s1896_s2 + $0x2c0] sm:$0xff] %v909_v41  ;;  %1271 = vst [vmem:[%s1896_s2 + $0x2d0] sm:$0xff] %v998_v42  ;;  %v911_v43 = vpop.f32.mrb[39].mxu0  ;;  %v1000_v44 = vpop.f32.mrb[39].mxu1 }
 0x127   :  { %1270 = vst [vmem:[%s1896_s2 + $0x2c8] sm:$0xff] %v911_v43  ;;  %1272 = vst [vmem:[%s1896_s2 + $0x2d8] sm:$0xff] %v1000_v44 }
 0x129   :  { %v1069_v45 = vpop.f32.mrb[40].mxu0  ;;  %v1158_v46 = vpop.f32.mrb[40].mxu1 }
 0x12a   :  { %1201 = vst [vmem:[%s1896_s2 + $0xa0] sm:$0xff] %v1069_v45  ;;  %1203 = vst [vmem:[%s1896_s2 + $0xb0] sm:$0xff] %v1158_v46  ;;  %v1071_v47 = vpop.f32.mrb[41].mxu0  ;;  %v1160_v48 = vpop.f32.mrb[41].mxu1 }
 0x12b   :  { %1202 = vst [vmem:[%s1896_s2 + $0xa8] sm:$0xff] %v1071_v47  ;;  %1204 = vst [vmem:[%s1896_s2 + $0xb8] sm:$0xff] %v1160_v48 }
 0x12d   :  { %v1075_v49 = vpop.f32.mrb[42].mxu0  ;;  %v1164_v50 = vpop.f32.mrb[42].mxu1 }
 0x12e   :  { %1225 = vst [vmem:[%s1896_s2 + $0x160] sm:$0xff] %v1075_v49  ;;  %1227 = vst [vmem:[%s1896_s2 + $0x170] sm:$0xff] %v1164_v50  ;;  %v1077_v51 = vpop.f32.mrb[43].mxu0  ;;  %v1166_v52 = vpop.f32.mrb[43].mxu1 }
 0x12f   :  { %1226 = vst [vmem:[%s1896_s2 + $0x168] sm:$0xff] %v1077_v51  ;;  %1228 = vst [vmem:[%s1896_s2 + $0x178] sm:$0xff] %v1166_v52 }
 0x131   :  { %v1081_v53 = vpop.f32.mrb[44].mxu0  ;;  %v1170_v54 = vpop.f32.mrb[44].mxu1 }
 0x132   :  { %1249 = vst [vmem:[%s1896_s2 + $0x220] sm:$0xff] %v1081_v53  ;;  %1251 = vst [vmem:[%s1896_s2 + $0x230] sm:$0xff] %v1170_v54  ;;  %v1083_v55 = vpop.f32.mrb[45].mxu0  ;;  %v1172_v56 = vpop.f32.mrb[45].mxu1 }
 0x133   :  { %1250 = vst [vmem:[%s1896_s2 + $0x228] sm:$0xff] %v1083_v55  ;;  %1252 = vst [vmem:[%s1896_s2 + $0x238] sm:$0xff] %v1172_v56 }
 0x135   :  { %v1087_v57 = vpop.f32.mrb[46].mxu0  ;;  %v1176_v58 = vpop.f32.mrb[46].mxu1 }
 0x136   :  { %1273 = vst [vmem:[%s1896_s2 + $0x2e0] sm:$0xff] %v1087_v57  ;;  %1275 = vst [vmem:[%s1896_s2 + $0x2f0] sm:$0xff] %v1176_v58  ;;  %v1089_v59 = vpop.f32.mrb[47].mxu0  ;;  %v1178_v60 = vpop.f32.mrb[47].mxu1 }
 0x137   :  { %1274 = vst [vmem:[%s1896_s2 + $0x2e8] sm:$0xff] %v1089_v59  ;;  %1276 = vst [vmem:[%s1896_s2 + $0x2f8] sm:$0xff] %v1178_v60 }

// kernel: forward.9
= control target key start
LH: loop header
LB: loop body
LE: loop exit
PB: predicated region body
PF: predicated region fallthrough
CT: control target
= control target key end

     0   :  { %vm48_vm0 = vcmask 1042432   ;;  %s401_s0 = inlined_call_operand.vmem [shape: f32[2,3,1024], index: 0, kind: input, shape index: {}]   ;;  %s402_s1 = inlined_call_operand.vmem [shape: f32[2,3,1024], index: 1, kind: output, shape index: {}]  }
   0x1   :  { %v290_v0 = vld [vmem:[%s401_s0] sm:$0x77]  ;;  %v295_v1 = vld [vmem:[%s401_s0 + $0x8] sm:$0x77]  ;;  %v300_v2 = vld [vmem:[%s401_s0 + $0x10] sm:$0x77] }
   0x2   :  { %v16_v3 = vmul.f32 %v290_v0, %v290_v0  ;;  %v17_v4 = vmul.f32 %v295_v1, %v295_v1  ;;  %v18_v5 = vmul.f32 %v300_v2, %v300_v2  ;;  %v311_v6 = vld [vmem:[%s401_s0 + $0x18] sm:$0x77]  ;;  %v316_v7 = vld [vmem:[%s401_s0 + $0x20] sm:$0x77]  ;;  %v321_v8 = vld [vmem:[%s401_s0 + $0x28] sm:$0x77] }
   0x3   :  { %v19_v9 = vmul.f32 %v311_v6, %v311_v6  ;;  %v327_v10 = vmul.f32 %v316_v7, %v316_v7  ;;  %v331_v11 = vmul.f32 %v321_v8, %v321_v8 }
   0x4   :  { %v32_v12 = vcombine.high %v16_v3, %v16_v3  ;;  %v49_v13 = vsel %vm48_vm0, %v16_v3, 0.0  ;;  %v33_v14 = vcombine.high %v17_v4, %v17_v4  ;;  %v63_v15 = vsel %vm48_vm0, %v17_v4, 0.0 }
   0x5   :  { %v50_v16 = vrot.slane %v49_v13, 4  ;;  %v64_v17 = vrot.slane %v63_v15, 4  ;;  %v34_v18 = vcombine.high %v18_v5, %v18_v5  ;;  %v77_v19 = vsel %vm48_vm0, %v18_v5, 0.0 }
   0x6   :  { %v56_v20 = vsel %vm48_vm0, %v32_v12, 0.0  ;;  %v70_v21 = vsel %vm48_vm0, %v33_v14, 0.0  ;;  %v78_v22 = vrot.slane %v77_v19, 4  ;;  %v35_v23 = vcombine.high %v19_v9, %v19_v9 }
   0x7   :  { %v51_v24 = vadd.f32 %v50_v16, %v49_v13  ;;  %v57_v25 = vrot.slane %v56_v20, 4  ;;  %v65_v26 = vadd.f32 %v64_v17, %v63_v15  ;;  %v71_v27 = vrot.slane %v70_v21, 4 }
   0x8   :  { %v79_v28 = vadd.f32 %v78_v22, %v77_v19  ;;  %v84_v29 = vsel %vm48_vm0, %v34_v18, 0.0  ;;  %v91_v30 = vsel %vm48_vm0, %v19_v9, 0.0  ;;  %v98_v31 = vsel %vm48_vm0, %v35_v23, 0.0 }
   0x9   :  { %v52_v32 = vrot.slane %v51_v24, 2  ;;  %v58_v33 = vadd.f32 %v57_v25, %v56_v20  ;;  %v66_v34 = vrot.slane %v65_v26, 2  ;;  %v72_v35 = vadd.f32 %v71_v27, %v70_v21  ;;  %v351_v25 = vld [vmem:[%s401_s0 + $0x30] sm:$0x77] }
   0xa   :  { %v80_v36 = vrot.slane %v79_v28, 2  ;;  %v85_v37 = vrot.slane %v84_v29, 4  ;;  %v92_v38 = vrot.slane %v91_v30, 4  ;;  %v99_v39 = vrot.slane %v98_v31, 4 }
   0xb   :  { %v53_v40 = vadd.f32 %v52_v32, %v51_v24  ;;  %v59_v41 = vrot.slane %v58_v33, 2  ;;  %v67_v42 = vadd.f32 %v66_v34, %v65_v26  ;;  %v73_v43 = vrot.slane %v72_v35, 2 }
   0xc   :  { %v81_v44 = vadd.f32 %v80_v36, %v79_v28  ;;  %v86_v45 = vadd.f32 %v85_v37, %v84_v29  ;;  %v93_v46 = vadd.f32 %v92_v38, %v91_v30  ;;  %v100_v47 = vadd.f32 %v99_v39, %v98_v31  ;;  %v361_v37 = vld [vmem:[%s401_s0 + $0x38] sm:$0x77] }
   0xd   :  { %v54_v48 = vrot.slane %v53_v40, 1  ;;  %v60_v49 = vadd.f32 %v59_v41, %v58_v33  ;;  %v68_v50 = vrot.slane %v67_v42, 1  ;;  %v74_v51 = vadd.f32 %v73_v43, %v72_v35 }
   0xe   :  { %v82_v52 = vrot.slane %v81_v44, 1  ;;  %v87_v53 = vrot.slane %v86_v45, 2  ;;  %v94_v54 = vrot.slane %v93_v46, 2  ;;  %v101_v55 = vrot.slane %v100_v47, 2 }
   0xf   :  { %v55_v56 = vadd.f32 %v54_v48, %v53_v40  ;;  %v61_v57 = vrot.slane %v60_v49, 1  ;;  %v69_v58 = vadd.f32 %v68_v50, %v67_v42  ;;  %v75_v59 = vrot.slane %v74_v51, 1 }
  0x10   :  { %v83_v60 = vadd.f32 %v82_v52, %v81_v44  ;;  %v88_v61 = vadd.f32 %v87_v53, %v86_v45  ;;  %v95_v62 = vadd.f32 %v94_v54, %v93_v46  ;;  %v102_v63 = vadd.f32 %v101_v55, %v100_v47 }
  0x11   :  { %v62_v3 = vadd.f32 %v61_v57, %v60_v49  ;;  %v161_v4 = vadd.f32 1e-12, %v55_v56  ;;  %v76_v5 = vadd.f32 %v75_v59, %v74_v51  ;;  %v163_v9 = vadd.f32 1e-12, %v69_v58 }
  0x12   :  { %v89_v12 = vrot.slane %v88_v61, 1  ;;  %v165_v13 = vadd.f32 1e-12, %v83_v60  ;;  %v96_v14 = vrot.slane %v95_v62, 1  ;;  %v103_v15 = vrot.slane %v102_v63, 1 }
  0x13   :  { %v162_v16 = vadd.f32 1e-12, %v62_v3  ;;  %245 = vrsqrt.f32 %v161_v4  ;;  %v164_v17 = vadd.f32 1e-12, %v76_v5  ;;  %v36_v18 = vcombine.high %v327_v10, %v327_v10 }
  0x14   :  { %247 = vrsqrt.f32 %v163_v9  ;;  %v90_v19 = vadd.f32 %v89_v12, %v88_v61  ;;  %v97_v20 = vadd.f32 %v96_v14, %v95_v62  ;;  %v104_v21 = vadd.f32 %v103_v15, %v102_v63 }
  0x15   :  { %249 = vrsqrt.f32 %v162_v16  ;;  %v105_v22 = vsel %vm48_vm0, %v327_v10, 0.0  ;;  %v112_v23 = vsel %vm48_vm0, %v36_v18, 0.0  ;;  %v37_v24 = vcombine.high %v331_v11, %v331_v11 }
  0x16   :  { %251 = vrsqrt.f32 %v164_v17  ;;  %v166_v26 = vadd.f32 1e-12, %v90_v19  ;;  %v167_v27 = vadd.f32 1e-12, %v97_v20  ;;  %v168_v28 = vadd.f32 1e-12, %v104_v21 }
  0x17   :  { %253 = vrsqrt.f32 %v165_v13  ;;  %v106_v29 = vrot.slane %v105_v22, 4  ;;  %v113_v30 = vrot.slane %v112_v23, 4  ;;  %v119_v10 = vsel %vm48_vm0, %v331_v11, 0.0 }
  0x18   :  { %255 = vrsqrt.f32 %v166_v26  ;;  %v120_v31 = vrot.slane %v119_v10, 4  ;;  %v126_v32 = vsel %vm48_vm0, %v37_v24, 0.0  ;;  %v22_v33 = vmul.f32 %v351_v25, %v351_v25 }
  0x19   :  { %257 = vrsqrt.f32 %v167_v27  ;;  %v107_v34 = vadd.f32 %v106_v29, %v105_v22  ;;  %v114_v35 = vadd.f32 %v113_v30, %v112_v23  ;;  %v127_v36 = vrot.slane %v126_v32, 4 }
  0x1a   :  { %259 = vrsqrt.f32 %v168_v28  ;;  %v121_v38 = vadd.f32 %v120_v31, %v119_v10  ;;  %v38_v39 = vcombine.high %v22_v33, %v22_v33  ;;  %v133_v11 = vsel %vm48_vm0, %v22_v33, 0.0 }
  0x1b   :  { %v108_v40 = vrot.slane %v107_v34, 2  ;;  %v115_v41 = vrot.slane %v114_v35, 2  ;;  %v128_v42 = vadd.f32 %v127_v36, %v126_v32  ;;  %v134_v43 = vrot.slane %v133_v11, 4 }
  0x1c   :  { %v122_v44 = vrot.slane %v121_v38, 2  ;;  %v140_v45 = vsel %vm48_vm0, %v38_v39, 0.0  ;;  %v23_v46 = vmul.f32 %v361_v37, %v361_v37 }
  0x1d   :  { %v246_v47 = vpop.eup %245  ;;  %v109_v48 = vadd.f32 %v108_v40, %v107_v34  ;;  %v116_v49 = vadd.f32 %v115_v41, %v114_v35  ;;  %v129_v50 = vrot.slane %v128_v42, 2  ;;  %v135_v51 = vadd.f32 %v134_v43, %v133_v11 }
  0x1e   :  { %v248_v52 = vpop.eup %247  ;;  %v123_v53 = vadd.f32 %v122_v44, %v121_v38  ;;  %v141_v54 = vrot.slane %v140_v45, 4  ;;  %v39_v55 = vcombine.high %v23_v46, %v23_v46  ;;  %v147_v56 = vsel %vm48_vm0, %v23_v46, 0.0 }
  0x1f   :  { %v250_v57 = vpop.eup %249  ;;  %v110_v58 = vrot.slane %v109_v48, 1  ;;  %v117_v59 = vrot.slane %v116_v49, 1  ;;  %v130_v60 = vadd.f32 %v129_v50, %v128_v42  ;;  %v136_v61 = vrot.slane %v135_v51, 2 }
  0x20   :  { %v252_v62 = vpop.eup %251  ;;  %v209_v63 = vcombine.low %v246_v47, %v250_v57  ;;  %v124_v3 = vrot.slane %v123_v53, 1  ;;  %v142_v4 = vadd.f32 %v141_v54, %v140_v45  ;;  %v148_v5 = vrot.slane %v147_v56, 4 }
  0x21   :  { %v254_v9 = vpop.eup %253  ;;  %v210_v12 = vcombine.low %v248_v52, %v252_v62  ;;  %v111_v13 = vadd.f32 %v110_v58, %v109_v48  ;;  %v118_v14 = vadd.f32 %v117_v59, %v116_v49  ;;  %v131_v15 = vrot.slane %v130_v60, 1 }
  0x22   :  { %v256_v16 = vpop.eup %255  ;;  %v225_v17 = vmul.f32 %v209_v63, %v290_v0  ;;  %v125_v18 = vadd.f32 %v124_v3, %v123_v53  ;;  %v137_v19 = vadd.f32 %v136_v61, %v135_v51  ;;  %v143_v20 = vrot.slane %v142_v4, 2 }
  0x23   :  { %v258_v21 = vpop.eup %257  ;;  %v226_v22 = vmul.f32 %v210_v12, %v295_v1  ;;  %v211_v23 = vcombine.low %v254_v9, %v256_v16  ;;  %v169_v24 = vadd.f32 1e-12, %v111_v13  ;;  %v170_v26 = vadd.f32 1e-12, %v118_v14 }
  0x24   :  { %v260_v27 = vpop.eup %259  ;;  %233 = vst [vmem:[%s402_s1] sm:$0x77] %v225_v17  ;;  %v132_v28 = vadd.f32 %v131_v15, %v130_v60  ;;  %v171_v29 = vadd.f32 1e-12, %v125_v18  ;;  %v138_v30 = vrot.slane %v137_v19, 1  ;;  %v144_v10 = vadd.f32 %v143_v20, %v142_v4 }
  0x25   :  { %234 = vst [vmem:[%s402_s1 + $0x8] sm:$0x77] %v226_v22  ;;  %v227_v0 = vmul.f32 %v211_v23, %v300_v2  ;;  %v212_v31 = vcombine.low %v258_v21, %v260_v27  ;;  %261 = vrsqrt.f32 %v169_v24  ;;  %v149_v1 = vadd.f32 %v148_v5, %v147_v56 }
  0x26   :  { %263 = vrsqrt.f32 %v170_v26  ;;  %v172_v32 = vadd.f32 1e-12, %v132_v28  ;;  %v139_v33 = vadd.f32 %v138_v30, %v137_v19  ;;  %v145_v34 = vrot.slane %v144_v10, 1 }
  0x27   :  { %235 = vst [vmem:[%s402_s1 + $0x10] sm:$0x77] %v227_v0  ;;  %v228_v35 = vmul.f32 %v212_v31, %v311_v6  ;;  %265 = vrsqrt.f32 %v171_v29  ;;  %v150_v36 = vrot.slane %v149_v1, 2  ;;  %v154_v38 = vsel %vm48_vm0, %v39_v55, 0.0 }
  0x28   :  { %267 = vrsqrt.f32 %v172_v32  ;;  %v146_v39 = vadd.f32 %v145_v34, %v144_v10  ;;  %v173_v2 = vadd.f32 1e-12, %v139_v33  ;;  %v155_v11 = vrot.slane %v154_v38, 4 }
  0x29   :  { %236 = vst [vmem:[%s402_s1 + $0x18] sm:$0x77] %v228_v35  ;;  %v151_v40 = vadd.f32 %v150_v36, %v149_v1 }
  0x2a   :  { %v174_v41 = vadd.f32 1e-12, %v146_v39  ;;  %269 = vrsqrt.f32 %v173_v2  ;;  %v156_v42 = vadd.f32 %v155_v11, %v154_v38 }
  0x2b   :  { %v152_v43 = vrot.slane %v151_v40, 1 }
  0x2c   :  { %271 = vrsqrt.f32 %v174_v41  ;;  %v157_v44 = vrot.slane %v156_v42, 2 }
  0x2d   :  { %v153_v6 = vadd.f32 %v152_v43, %v151_v40 }
  0x2e   :  { %v158_v45 = vadd.f32 %v157_v44, %v156_v42 }
  0x2f   :  { %v262_v46 = vpop.eup %261  ;;  %v175_v49 = vadd.f32 1e-12, %v153_v6 }
  0x30   :  { %v264_v47 = vpop.eup %263  ;;  %v159_v48 = vrot.slane %v158_v45, 1 }
  0x31   :  { %v266_v50 = vpop.eup %265  ;;  %v213_v51 = vcombine.low %v262_v46, %v264_v47  ;;  %273 = vrsqrt.f32 %v175_v49 }
  0x32   :  { %v268_v52 = vpop.eup %267  ;;  %v160_v53 = vadd.f32 %v159_v48, %v158_v45 }
  0x33   :  { %v229_v54 = vmul.f32 %v213_v51, %v316_v7  ;;  %v214_v55 = vcombine.low %v266_v50, %v268_v52 }
  0x34   :  { %v270_v56 = vpop.eup %269  ;;  %v176_v57 = vadd.f32 1e-12, %v160_v53 }
  0x35   :  { %237 = vst [vmem:[%s402_s1 + $0x20] sm:$0x77] %v229_v54  ;;  %v230_v58 = vmul.f32 %v214_v55, %v321_v8 }
  0x36   :  { %v272_v59 = vpop.eup %271  ;;  %275 = vrsqrt.f32 %v176_v57 }
  0x37   :  { %238 = vst [vmem:[%s402_s1 + $0x28] sm:$0x77] %v230_v58  ;;  %v215_v60 = vcombine.low %v270_v56, %v272_v59 }
  0x39   :  { %v231_v61 = vmul.f32 %v215_v60, %v351_v25 }
  0x3b   :  { %239 = vst [vmem:[%s402_s1 + $0x30] sm:$0x77] %v231_v61  ;;  %v274_v7 = vpop.eup %273 }
  0x40   :  { %v276_v62 = vpop.eup %275 }
  0x41   :  { %v216_v63 = vcombine.low %v274_v7, %v276_v62 }
  0x43   :  { %v232_v3 = vmul.f32 %v216_v63, %v361_v37 }
  0x45   :  { %240 = vst [vmem:[%s402_s1 + $0x38] sm:$0x77] %v232_v3 }

</bundles_post_ra>
